<compile_context>
chip_gen: v5e
topology: v5e:2x2
jax: 0.10.0
libtpu: 0.0.40
codegen_flags: <defaults>
</compile_context>

<pallas_src>
import math
import functools

import jax
import jax.numpy as jnp
from jax.experimental import pallas as pl
from jax.experimental.pallas import tpu as pltpu

# ---------------- config (bert-tiny-like, small) ----------------
HIDDEN = 128          # bert-tiny hidden size
N_HEADS = 2
HEAD_DIM = HIDDEN // N_HEADS
INTERMEDIATE = 512
N_LAYERS = 2
VOCAB = 64            # small synthetic vocab
TYPE_VOCAB = 2
MAX_POS = 64
# TODO(synk): the torch module defaults to 10 prefix tokens; 8 is used here so T = prefix+seq = 16
# stays (8,128)-tile friendly at seq=8.
NUM_PREFIX = 8
LORA_R = 8
LORA_ALPHA = 16
LORA_SCALING = LORA_ALPHA / LORA_R
NUM_LABELS = 2
LN_EPS = 1e-12
NEG_MASK = -10000.0   # classic BERT additive mask value
LANE = 128            # lane-dense padded classifier width


# ---------------- in-kernel helpers (f32 math) ----------------
def _ln(x, g, b, eps=LN_EPS):
    mu = jnp.mean(x, axis=-1, keepdims=True)
    d = x - mu
    var = jnp.mean(d * d, axis=-1, keepdims=True)
    return d * jax.lax.rsqrt(var + eps) * g + b


def _erf_approx(x):
    # Abramowitz & Stegun 7.1.26 (|err| <= 1.5e-7) using only definitely-lowerable ops
    # (mul/add/div/exp/where) — matches HF's exact-erf GELU to well below f32 noise.
    a1, a2, a3, a4, a5 = 0.254829592, -0.284496736, 1.421413741, -1.453152027, 1.061405429
    pcoef = 0.3275911
    ax = jnp.abs(x)
    t = 1.0 / (1.0 + pcoef * ax)
    poly = ((((a5 * t + a4) * t + a3) * t + a2) * t + a1) * t
    y = 1.0 - poly * jnp.exp(-ax * ax)
    return jnp.where(x < 0.0, -y, y)


def _gelu(x):
    return 0.5 * x * (1.0 + _erf_approx(x * (1.0 / math.sqrt(2.0))))


# ---------------- the fused whole-model kernel ----------------
def _fused_kernel(emb_ref, mask_ref, embg_ref, embb_ref,
                  wqkv_ref, bqkv_ref, wao_ref, bao_ref, ln1g_ref, ln1b_ref,
                  wi_ref, bi_ref, wff_ref, bff_ref, ln2g_ref, ln2b_ref,
                  wp_ref, bp_ref, wc_ref, bc_ref,
                  out_ref, *, batch_tile, seq, scale):
    TB, T, H = batch_tile, seq, HIDDEN
    rows = TB * T

    x = emb_ref[...]                                   # (TB, T, H) f32 raw embeddings
    addm = mask_ref[...]                               # (TB, 1, T) f32 additive mask

    # embedding LayerNorm (no residual); keep activations flat (rows, H) for the dense matmuls
    h = _ln(x.reshape(rows, H), embg_ref[...], embb_ref[...])

    # ----- encoder layers (unrolled; weights are VMEM-resident stacks indexed statically) -----
    for layer in range(N_LAYERS):
        hb = h.astype(jnp.bfloat16)
        qkv = jnp.dot(hb, wqkv_ref[layer],
                      preferred_element_type=jnp.float32) + bqkv_ref[layer]      # (rows, 3H) f32
        qkvb = qkv.astype(jnp.bfloat16).reshape(TB, T, 3 * H)                     # cast once

        ao = jnp.zeros((rows, H), jnp.float32)
        for hd in range(N_HEADS):
            lo = hd * HEAD_DIM
            q = qkvb[:, :, lo:lo + HEAD_DIM]                                      # (TB, T, dH) bf16
            k = qkvb[:, :, H + lo:H + lo + HEAD_DIM]
            v = qkvb[:, :, 2 * H + lo:2 * H + lo + HEAD_DIM]
            s = jnp.einsum('bqd,bkd->bqk', q, k,
                           preferred_element_type=jnp.float32) * scale + addm     # (TB, T, T)
            s = s - jnp.max(s, axis=-1, keepdims=True)
            p = jnp.exp(s)
            p = p * pl.reciprocal(jnp.sum(p, axis=-1, keepdims=True), approx=True)
            # TODO(synk): attention-prob dropout is stochastic; treated as identity (eval mode).
            ctx = jnp.einsum('bqk,bkd->bqd', p.astype(jnp.bfloat16), v,
                             preferred_element_type=jnp.float32)                  # (TB, T, dH)
            # per-head accumulation into the attn-out dense (no head concat)
            ao = ao + jnp.dot(ctx.reshape(rows, HEAD_DIM).astype(jnp.bfloat16),
                              wao_ref[layer, hd],
                              preferred_element_type=jnp.float32)
        ao = ao + bao_ref[layer]

        h1 = _ln(ao + h, ln1g_ref[layer], ln1b_ref[layer])                        # residual LN

        inter = jnp.dot(h1.astype(jnp.bfloat16), wi_ref[layer],
                        preferred_element_type=jnp.float32) + bi_ref[layer]       # (rows, I)
        inter = _gelu(inter)
        ffo = jnp.dot(inter.astype(jnp.bfloat16), wff_ref[layer],
                      preferred_element_type=jnp.float32) + bff_ref[layer]        # (rows, H)
        h = _ln(ffo + h1, ln2g_ref[layer], ln2b_ref[layer])

    # ----- pooler (tanh dense on token 0 = first prefix token, as in HF BERT) + classifier -----
    cls = h.reshape(TB, T, H)[:, 0, :]                                            # (TB, H)
    pooled = jnp.tanh(jnp.dot(cls.astype(jnp.bfloat16), wp_ref[...],
                              preferred_element_type=jnp.float32) + bp_ref[...])
    logits = jnp.dot(pooled.astype(jnp.bfloat16), wc_ref[...],
                     preferred_element_type=jnp.float32) + bc_ref[...]            # (TB, 128) lane-dense
    out_ref[...] = logits.reshape(TB, 1, LANE).astype(out_ref.dtype)


def _pick_batch_tile(B):
    # >=2 parallel grid steps when possible (keeps both v7x TensorCores busy) while keeping
    # <=8 batch elements (128 matmul rows at T=16, v5e-friendly; v6e/v7x tolerate more).
    for tb in (8, 4, 2, 1):
        if tb <= max(1, B // 2) and B % tb == 0:
            return tb
    return 1


# ---------------- deterministic parameter init (mirrors the torch module layout) ----------------
def init_params(key):
    keys = iter(jax.random.split(key, 128))

    def nrm(shape, std=0.02):
        return jax.random.normal(next(keys), shape, jnp.float32) * std

    p = {
        "word_emb": nrm((VOCAB, HIDDEN)),
        "pos_emb": nrm((MAX_POS, HIDDEN)),
        "type_emb": nrm((TYPE_VOCAB, HIDDEN)),
        "emb_ln_g": jnp.ones((1, HIDDEN), jnp.float32),
        "emb_ln_b": jnp.zeros((1, HIDDEN), jnp.float32),
        # PrefixEncoder: nn.Embedding(num_prefix_tokens, hidden), std=0.02
        "prefix": nrm((NUM_PREFIX, HIDDEN)),
    }
    layers = []
    for _ in range(N_LAYERS):
        L = {}
        for name in ["q", "k", "v", "attn_out"]:
            L[f"W_{name}"] = nrm((HIDDEN, HIDDEN))                      # stored (in, out)
            L[f"b_{name}"] = jnp.zeros((1, HIDDEN), jnp.float32)
        for name in ["q", "v"]:                                         # LoRA on query/value only
            L[f"A_{name}"] = nrm((HIDDEN, LORA_R), std=1.0 / math.sqrt(HIDDEN))
            L[f"B_{name}"] = jnp.zeros((LORA_R, HIDDEN), jnp.float32)   # lora_B init zeros
        L["ln1_g"] = jnp.ones((1, HIDDEN), jnp.float32)
        L["ln1_b"] = jnp.zeros((1, HIDDEN), jnp.float32)
        L["W_inter"] = nrm((HIDDEN, INTERMEDIATE))
        L["b_inter"] = jnp.zeros((1, INTERMEDIATE), jnp.float32)
        L["W_out"] = nrm((INTERMEDIATE, HIDDEN))
        L["b_out"] = jnp.zeros((1, HIDDEN), jnp.float32)
        L["ln2_g"] = jnp.ones((1, HIDDEN), jnp.float32)
        L["ln2_b"] = jnp.zeros((1, HIDDEN), jnp.float32)
        layers.append(L)
    p["layers"] = layers
    p["W_pool"] = nrm((HIDDEN, HIDDEN))
    p["b_pool"] = jnp.zeros((1, HIDDEN), jnp.float32)
    p["W_cls"] = nrm((HIDDEN, NUM_LABELS))
    p["b_cls"] = jnp.zeros((1, NUM_LABELS), jnp.float32)
    return p


def pack_params(p):
    """Merge LoRA into the base weights (exact in eval: LoRA dropout = identity), fuse
    [W_q|W_k|W_v], split W_attn_out into per-head blocks, stack layers on a leading axis,
    pad the classifier to a lane-dense 128-wide output, and cast matmul weights to bf16."""
    layers = p["layers"]

    def st(fn, dtype=None):
        a = jnp.stack([fn(L) for L in layers], axis=0)
        return a.astype(dtype) if dtype is not None else a

    def merged_qkv(L):
        # TODO(synk): keep the un-merged LoRA path if this is ever used for training (dropout).
        w_q = L["W_q"] + LORA_SCALING * (L["A_q"] @ L["B_q"])
        w_v = L["W_v"] + LORA_SCALING * (L["A_v"] @ L["B_v"])
        return jnp.concatenate([w_q, L["W_k"], w_v], axis=1)           # (H, 3H)

    w_cls_pad = jnp.zeros((HIDDEN, LANE), jnp.float32).at[:, :NUM_LABELS].set(p["W_cls"])
    b_cls_pad = jnp.zeros((1, LANE), jnp.float32).at[:, :NUM_LABELS].set(p["b_cls"])

    return {
        "word_emb": p["word_emb"], "pos_emb": p["pos_emb"], "type_emb": p["type_emb"],
        "prefix": p["prefix"],
        "emb_ln_g": p["emb_ln_g"], "emb_ln_b": p["emb_ln_b"],
        "W_qkv": st(merged_qkv, jnp.bfloat16),                                              # (L,H,3H)
        "b_qkv": st(lambda L: jnp.concatenate([L["b_q"], L["b_k"], L["b_v"]], axis=1)),     # (L,1,3H)
        "W_ao": st(lambda L: L["W_attn_out"].reshape(N_HEADS, HEAD_DIM, HIDDEN),
                   jnp.bfloat16),                                                           # (L,nh,dH,H)
        "b_ao": st(lambda L: L["b_attn_out"]),
        "ln1_g": st(lambda L: L["ln1_g"]), "ln1_b": st(lambda L: L["ln1_b"]),
        "W_inter": st(lambda L: L["W_inter"], jnp.bfloat16), "b_inter": st(lambda L: L["b_inter"]),
        "W_ffn_out": st(lambda L: L["W_out"], jnp.bfloat16), "b_ffn_out": st(lambda L: L["b_out"]),
        "ln2_g": st(lambda L: L["ln2_g"]), "ln2_b": st(lambda L: L["ln2_b"]),
        "W_pool": p["W_pool"].astype(jnp.bfloat16), "b_pool": p["b_pool"],
        "W_cls": w_cls_pad.astype(jnp.bfloat16), "b_cls": b_cls_pad,
    }


# ---------------- forward pass (labels=None path -> logits), single pallas_call ----------------
def forward(packed, input_ids, attention_mask, token_type_ids):
    B, S = input_ids.shape
    T = NUM_PREFIX + S

    # prefix encoder + word embeddings, concatenated along the sequence axis (gathers stay in JAX)
    prefix = jnp.broadcast_to(packed["prefix"][None], (B, NUM_PREFIX, HIDDEN))
    word = jnp.take(packed["word_emb"], input_ids, axis=0)
    inputs_embeds = jnp.concatenate([prefix, word], axis=1)                        # (B, T, H)

    mask = jnp.concatenate(
        [jnp.ones((B, NUM_PREFIX), attention_mask.dtype), attention_mask], axis=1)
    ttids = jnp.concatenate(
        [jnp.zeros((B, NUM_PREFIX), token_type_ids.dtype), token_type_ids], axis=1)

    # positions 0..T-1 over prefix+input tokens (HF BERT assigns positions over inputs_embeds)
    pos = jnp.take(packed["pos_emb"], jnp.arange(T), axis=0)[None]                 # (1, T, H)
    typ = jnp.take(packed["type_emb"], ttids, axis=0)                              # (B, T, H)
    emb = (inputs_embeds + pos + typ).astype(jnp.float32)                          # (B, T, H)
    # TODO(synk): embedding / hidden-state dropout treated as identity (eval mode).

    addmask = ((1.0 - mask.astype(jnp.float32)) * NEG_MASK)[:, None, :]            # (B, 1, T)

    TB = _pick_batch_tile(B)
    scale = 1.0 / math.sqrt(HEAD_DIM)

    def full(a):
        nd = a.ndim
        return pl.BlockSpec(a.shape, lambda b, _n=nd: (0,) * _n)

    kernel = functools.partial(_fused_kernel, batch_tile=TB, seq=T, scale=scale)

    out = pl.pallas_call(
        kernel,
        grid=(B // TB,),
        in_specs=[
            pl.BlockSpec((TB, T, HIDDEN), lambda b: (b, 0, 0)),    # embeddings
            pl.BlockSpec((TB, 1, T), lambda b: (b, 0, 0)),         # additive mask
            full(packed["emb_ln_g"]), full(packed["emb_ln_b"]),
            full(packed["W_qkv"]), full(packed["b_qkv"]),
            full(packed["W_ao"]), full(packed["b_ao"]),
            full(packed["ln1_g"]), full(packed["ln1_b"]),
            full(packed["W_inter"]), full(packed["b_inter"]),
            full(packed["W_ffn_out"]), full(packed["b_ffn_out"]),
            full(packed["ln2_g"]), full(packed["ln2_b"]),
            full(packed["W_pool"]), full(packed["b_pool"]),
            full(packed["W_cls"]), full(packed["b_cls"]),
        ],
        out_specs=pl.BlockSpec((TB, 1, LANE), lambda b: (b, 0, 0)),
        out_shape=jax.ShapeDtypeStruct((B, 1, LANE), jnp.float32),
        compiler_params=pltpu.CompilerParams(dimension_semantics=("parallel",)),
    )(emb, addmask,
      packed["emb_ln_g"], packed["emb_ln_b"],
      packed["W_qkv"], packed["b_qkv"], packed["W_ao"], packed["b_ao"],
      packed["ln1_g"], packed["ln1_b"],
      packed["W_inter"], packed["b_inter"], packed["W_ffn_out"], packed["b_ffn_out"],
      packed["ln2_g"], packed["ln2_b"],
      packed["W_pool"], packed["b_pool"], packed["W_cls"], packed["b_cls"])

    return out[:, 0, :NUM_LABELS]                                                  # (B, num_labels)


if __name__ == "__main__":
    key = jax.random.PRNGKey(0)
    kp, ki = jax.random.split(key)
    params = init_params(kp)
    packed = pack_params(params)

    B, S = 2, 8
    input_ids = jax.random.randint(ki, (B, S), 0, VOCAB, dtype=jnp.int32)
    attention_mask = jnp.ones((B, S), jnp.int32).at[1, 6:].set(0)   # some padding
    token_type_ids = jnp.zeros((B, S), jnp.int32)

    logits = jax.jit(forward)(packed, input_ids, attention_mask, token_type_ids)
    jax.block_until_ready(logits)
    assert logits.shape == (B, NUM_LABELS)
    print("KERNEL_OK")
</pallas_src>

<mosaic_0001>
module attributes {stable_mosaic.version = 11 : i64} {
  func.func @_fused_kernel(%arg0: i32, %arg1: memref<1x16x128xf32, #tpu.memory_space<vmem>>, %arg2: memref<1x1x16xf32, #tpu.memory_space<vmem>>, %arg3: memref<1x128xf32, #tpu.memory_space<vmem>>, %arg4: memref<1x128xf32, #tpu.memory_space<vmem>>, %arg5: memref<2x128x384xbf16, #tpu.memory_space<vmem>>, %arg6: memref<2x1x384xf32, #tpu.memory_space<vmem>>, %arg7: memref<2x2x64x128xbf16, #tpu.memory_space<vmem>>, %arg8: memref<2x1x128xf32, #tpu.memory_space<vmem>>, %arg9: memref<2x1x128xf32, #tpu.memory_space<vmem>>, %arg10: memref<2x1x128xf32, #tpu.memory_space<vmem>>, %arg11: memref<2x128x512xbf16, #tpu.memory_space<vmem>>, %arg12: memref<2x1x512xf32, #tpu.memory_space<vmem>>, %arg13: memref<2x512x128xbf16, #tpu.memory_space<vmem>>, %arg14: memref<2x1x128xf32, #tpu.memory_space<vmem>>, %arg15: memref<2x1x128xf32, #tpu.memory_space<vmem>>, %arg16: memref<2x1x128xf32, #tpu.memory_space<vmem>>, %arg17: memref<128x128xbf16, #tpu.memory_space<vmem>>, %arg18: memref<1x128xf32, #tpu.memory_space<vmem>>, %arg19: memref<128x128xbf16, #tpu.memory_space<vmem>>, %arg20: memref<1x128xf32, #tpu.memory_space<vmem>>, %arg21: memref<1x1x128xf32, #tpu.memory_space<vmem>>) attributes {dimension_semantics = [#tpu.dimension_semantics<parallel>], iteration_bounds = array<i64: 2>, scalar_prefetch = 0 : i64, scratch_operands = 0 : i64, tpu.core_type = #tpu.core_type<tc>, window_params = [{transform_indices = @transform_0, window_bounds = array<i64: 1, 16, 128>}, {transform_indices = @transform_1, window_bounds = array<i64: 1, 1, 16>}, {pipeline_mode = #tpu.pipeline_mode<synchronous>, transform_indices = @transform_2, window_bounds = array<i64: 1, 128>}, {pipeline_mode = #tpu.pipeline_mode<synchronous>, transform_indices = @transform_3, window_bounds = array<i64: 1, 128>}, {pipeline_mode = #tpu.pipeline_mode<synchronous>, transform_indices = @transform_4, window_bounds = array<i64: 2, 128, 384>}, {pipeline_mode = #tpu.pipeline_mode<synchronous>, transform_indices = @transform_5, window_bounds = array<i64: 2, 1, 384>}, {pipeline_mode = #tpu.pipeline_mode<synchronous>, transform_indices = @transform_6, window_bounds = array<i64: 2, 2, 64, 128>}, {pipeline_mode = #tpu.pipeline_mode<synchronous>, transform_indices = @transform_7, window_bounds = array<i64: 2, 1, 128>}, {pipeline_mode = #tpu.pipeline_mode<synchronous>, transform_indices = @transform_8, window_bounds = array<i64: 2, 1, 128>}, {pipeline_mode = #tpu.pipeline_mode<synchronous>, transform_indices = @transform_9, window_bounds = array<i64: 2, 1, 128>}, {pipeline_mode = #tpu.pipeline_mode<synchronous>, transform_indices = @transform_10, window_bounds = array<i64: 2, 128, 512>}, {pipeline_mode = #tpu.pipeline_mode<synchronous>, transform_indices = @transform_11, window_bounds = array<i64: 2, 1, 512>}, {pipeline_mode = #tpu.pipeline_mode<synchronous>, transform_indices = @transform_12, window_bounds = array<i64: 2, 512, 128>}, {pipeline_mode = #tpu.pipeline_mode<synchronous>, transform_indices = @transform_13, window_bounds = array<i64: 2, 1, 128>}, {pipeline_mode = #tpu.pipeline_mode<synchronous>, transform_indices = @transform_14, window_bounds = array<i64: 2, 1, 128>}, {pipeline_mode = #tpu.pipeline_mode<synchronous>, transform_indices = @transform_15, window_bounds = array<i64: 2, 1, 128>}, {pipeline_mode = #tpu.pipeline_mode<synchronous>, transform_indices = @transform_16, window_bounds = array<i64: 128, 128>}, {pipeline_mode = #tpu.pipeline_mode<synchronous>, transform_indices = @transform_17, window_bounds = array<i64: 1, 128>}, {pipeline_mode = #tpu.pipeline_mode<synchronous>, transform_indices = @transform_18, window_bounds = array<i64: 128, 128>}, {pipeline_mode = #tpu.pipeline_mode<synchronous>, transform_indices = @transform_19, window_bounds = array<i64: 1, 128>}, {transform_indices = @transform_20, window_bounds = array<i64: 1, 1, 128>}]} {
    %c0 = arith.constant 0 : index
    %c0_0 = arith.constant 0 : index
    %c0_1 = arith.constant 0 : index
    %0 = vector.load %arg1[%c0, %c0_0, %c0_1] : memref<1x16x128xf32, #tpu.memory_space<vmem>>, vector<1x16x128xf32>
    %c0_2 = arith.constant 0 : index
    %c0_3 = arith.constant 0 : index
    %c0_4 = arith.constant 0 : index
    %1 = vector.load %arg2[%c0_2, %c0_3, %c0_4] : memref<1x1x16xf32, #tpu.memory_space<vmem>>, vector<1x1x16xf32>
    %2 = vector.shape_cast %0 : vector<1x16x128xf32> to vector<16x128xf32>
    %c0_5 = arith.constant 0 : index
    %c0_6 = arith.constant 0 : index
    %3 = vector.load %arg3[%c0_5, %c0_6] : memref<1x128xf32, #tpu.memory_space<vmem>>, vector<1x128xf32>
    %c0_7 = arith.constant 0 : index
    %c0_8 = arith.constant 0 : index
    %4 = vector.load %arg4[%c0_7, %c0_8] : memref<1x128xf32, #tpu.memory_space<vmem>>, vector<1x128xf32>
    %cst = arith.constant dense<0.000000e+00> : vector<16xf32>
    %5 = vector.multi_reduction <add>, %2, %cst [1] : vector<16x128xf32> to vector<16xf32>
    %6 = vector.shape_cast %5 : vector<16xf32> to vector<16x1xf32>
    %cst_9 = arith.constant 1.280000e+02 : f32
    %7 = vector.broadcast %cst_9 : f32 to vector<16x1xf32>
    %8 = arith.divf %6, %7 : vector<16x1xf32>
    %9 = vector.broadcast %8 : vector<16x1xf32> to vector<16x128xf32>
    %10 = arith.subf %2, %9 : vector<16x128xf32>
    %11 = arith.mulf %10, %10 : vector<16x128xf32>
    %cst_10 = arith.constant dense<0.000000e+00> : vector<16xf32>
    %12 = vector.multi_reduction <add>, %11, %cst_10 [1] : vector<16x128xf32> to vector<16xf32>
    %13 = vector.shape_cast %12 : vector<16xf32> to vector<16x1xf32>
    %cst_11 = arith.constant 1.280000e+02 : f32
    %14 = vector.broadcast %cst_11 : f32 to vector<16x1xf32>
    %15 = arith.divf %13, %14 : vector<16x1xf32>
    %cst_12 = arith.constant 9.99999996E-13 : f32
    %16 = vector.broadcast %cst_12 : f32 to vector<16x1xf32>
    %17 = arith.addf %15, %16 : vector<16x1xf32>
    %18 = math.rsqrt %17 : vector<16x1xf32>
    %19 = vector.broadcast %18 : vector<16x1xf32> to vector<16x128xf32>
    %20 = arith.mulf %10, %19 : vector<16x128xf32>
    %21 = vector.broadcast %3 : vector<1x128xf32> to vector<16x128xf32>
    %22 = arith.mulf %20, %21 : vector<16x128xf32>
    %23 = vector.broadcast %4 : vector<1x128xf32> to vector<16x128xf32>
    %24 = arith.addf %22, %23 : vector<16x128xf32>
    %25 = arith.truncf %24 : vector<16x128xf32> to vector<16x128xbf16>
    %c0_13 = arith.constant 0 : index
    %c0_14 = arith.constant 0 : index
    %c0_15 = arith.constant 0 : index
    %26 = vector.load %arg5[%c0_13, %c0_14, %c0_15] : memref<2x128x384xbf16, #tpu.memory_space<vmem>>, vector<1x128x384xbf16>
    %27 = vector.shape_cast %26 : vector<1x128x384xbf16> to vector<128x384xbf16>
    %cst_16 = arith.constant dense<0.000000e+00> : vector<16x384xf32>
    %28 = tpu.matmul %25, %27, %cst_16 {dimension_numbers = #tpu.dot_dimension_numbers<[1], [0], [0], [1], [0, 0, 1, 1], [], []>} : vector<16x128xbf16>, vector<128x384xbf16>, vector<16x384xf32> -> vector<16x384xf32>
    %c0_17 = arith.constant 0 : index
    %c0_18 = arith.constant 0 : index
    %c0_19 = arith.constant 0 : index
    %29 = vector.load %arg6[%c0_17, %c0_18, %c0_19] : memref<2x1x384xf32, #tpu.memory_space<vmem>>, vector<1x1x384xf32>
    %30 = vector.shape_cast %29 : vector<1x1x384xf32> to vector<1x384xf32>
    %31 = vector.broadcast %30 : vector<1x384xf32> to vector<16x384xf32>
    %32 = arith.addf %28, %31 : vector<16x384xf32>
    %33 = arith.truncf %32 : vector<16x384xf32> to vector<16x384xbf16>
    %34 = vector.shape_cast %33 : vector<16x384xbf16> to vector<1x16x384xbf16>
    %cst_20 = arith.constant 0.000000e+00 : f32
    %35 = vector.broadcast %cst_20 : f32 to vector<16x128xf32>
    %36 = vector.extract_strided_slice %34 {offsets = [0, 0, 0], sizes = [1, 16, 64], strides = [1, 1, 1]} : vector<1x16x384xbf16> to vector<1x16x64xbf16>
    %37 = vector.extract_strided_slice %34 {offsets = [0, 0, 128], sizes = [1, 16, 64], strides = [1, 1, 1]} : vector<1x16x384xbf16> to vector<1x16x64xbf16>
    %38 = vector.extract_strided_slice %34 {offsets = [0, 0, 256], sizes = [1, 16, 64], strides = [1, 1, 1]} : vector<1x16x384xbf16> to vector<1x16x64xbf16>
    "tpu.trace_start"() <{level = 10 : i32, message = "bqd,bkd->bqk"}> : () -> ()
    %cst_21 = arith.constant dense<0.000000e+00> : vector<1x16x16xf32>
    %39 = tpu.matmul %36, %37, %cst_21 {dimension_numbers = #tpu.dot_dimension_numbers<[2], [2], [1], [1], [0, 0, 0, 1, 1, 1], [0], [0]>} : vector<1x16x64xbf16>, vector<1x16x64xbf16>, vector<1x16x16xf32> -> vector<1x16x16xf32>
    "tpu.trace_stop"() : () -> ()
    %cst_22 = arith.constant 1.250000e-01 : f32
    %40 = vector.broadcast %cst_22 : f32 to vector<1x16x16xf32>
    %41 = arith.mulf %39, %40 : vector<1x16x16xf32>
    %42 = vector.broadcast %1 : vector<1x1x16xf32> to vector<1x16x16xf32>
    %43 = arith.addf %41, %42 : vector<1x16x16xf32>
    %cst_23 = arith.constant dense<0xFF800000> : vector<1x16xf32>
    %44 = vector.multi_reduction <maximumf>, %43, %cst_23 [2] : vector<1x16x16xf32> to vector<1x16xf32>
    %45 = vector.shape_cast %44 : vector<1x16xf32> to vector<1x16x1xf32>
    %46 = vector.broadcast %45 : vector<1x16x1xf32> to vector<1x16x16xf32>
    %47 = arith.subf %43, %46 : vector<1x16x16xf32>
    %48 = math.exp %47 : vector<1x16x16xf32>
    %cst_24 = arith.constant dense<0.000000e+00> : vector<1x16xf32>
    %49 = vector.multi_reduction <add>, %48, %cst_24 [2] : vector<1x16x16xf32> to vector<1x16xf32>
    %50 = vector.shape_cast %49 : vector<1x16xf32> to vector<1x16x1xf32>
    %51 = tpu.reciprocal %50 {approx = true} : vector<1x16x1xf32> -> vector<1x16x1xf32>
    %52 = vector.broadcast %51 : vector<1x16x1xf32> to vector<1x16x16xf32>
    %53 = arith.mulf %48, %52 : vector<1x16x16xf32>
    %54 = arith.truncf %53 : vector<1x16x16xf32> to vector<1x16x16xbf16>
    "tpu.trace_start"() <{level = 10 : i32, message = "bqk,bkd->bqd"}> : () -> ()
    %cst_25 = arith.constant dense<0.000000e+00> : vector<1x16x64xf32>
    %55 = tpu.matmul %54, %38, %cst_25 {dimension_numbers = #tpu.dot_dimension_numbers<[2], [1], [1], [2], [0, 0, 0, 1, 1, 2], [0], [0]>} : vector<1x16x16xbf16>, vector<1x16x64xbf16>, vector<1x16x64xf32> -> vector<1x16x64xf32>
    "tpu.trace_stop"() : () -> ()
    %56 = vector.shape_cast %55 : vector<1x16x64xf32> to vector<16x64xf32>
    %57 = arith.truncf %56 : vector<16x64xf32> to vector<16x64xbf16>
    %c0_26 = arith.constant 0 : index
    %c0_27 = arith.constant 0 : index
    %c0_28 = arith.constant 0 : index
    %c0_29 = arith.constant 0 : index
    %58 = vector.load %arg7[%c0_26, %c0_27, %c0_28, %c0_29] : memref<2x2x64x128xbf16, #tpu.memory_space<vmem>>, vector<1x1x64x128xbf16>
    %59 = vector.shape_cast %58 : vector<1x1x64x128xbf16> to vector<64x128xbf16>
    %cst_30 = arith.constant dense<0.000000e+00> : vector<16x128xf32>
    %60 = tpu.matmul %57, %59, %cst_30 {dimension_numbers = #tpu.dot_dimension_numbers<[1], [0], [0], [1], [0, 0, 1, 1], [], []>} : vector<16x64xbf16>, vector<64x128xbf16>, vector<16x128xf32> -> vector<16x128xf32>
    %61 = arith.addf %35, %60 : vector<16x128xf32>
    %62 = vector.extract_strided_slice %34 {offsets = [0, 0, 64], sizes = [1, 16, 64], strides = [1, 1, 1]} : vector<1x16x384xbf16> to vector<1x16x64xbf16>
    %63 = vector.extract_strided_slice %34 {offsets = [0, 0, 192], sizes = [1, 16, 64], strides = [1, 1, 1]} : vector<1x16x384xbf16> to vector<1x16x64xbf16>
    %64 = vector.extract_strided_slice %34 {offsets = [0, 0, 320], sizes = [1, 16, 64], strides = [1, 1, 1]} : vector<1x16x384xbf16> to vector<1x16x64xbf16>
    "tpu.trace_start"() <{level = 10 : i32, message = "bqd,bkd->bqk"}> : () -> ()
    %cst_31 = arith.constant dense<0.000000e+00> : vector<1x16x16xf32>
    %65 = tpu.matmul %62, %63, %cst_31 {dimension_numbers = #tpu.dot_dimension_numbers<[2], [2], [1], [1], [0, 0, 0, 1, 1, 1], [0], [0]>} : vector<1x16x64xbf16>, vector<1x16x64xbf16>, vector<1x16x16xf32> -> vector<1x16x16xf32>
    "tpu.trace_stop"() : () -> ()
    %cst_32 = arith.constant 1.250000e-01 : f32
    %66 = vector.broadcast %cst_32 : f32 to vector<1x16x16xf32>
    %67 = arith.mulf %65, %66 : vector<1x16x16xf32>
    %68 = vector.broadcast %1 : vector<1x1x16xf32> to vector<1x16x16xf32>
    %69 = arith.addf %67, %68 : vector<1x16x16xf32>
    %cst_33 = arith.constant dense<0xFF800000> : vector<1x16xf32>
    %70 = vector.multi_reduction <maximumf>, %69, %cst_33 [2] : vector<1x16x16xf32> to vector<1x16xf32>
    %71 = vector.shape_cast %70 : vector<1x16xf32> to vector<1x16x1xf32>
    %72 = vector.broadcast %71 : vector<1x16x1xf32> to vector<1x16x16xf32>
    %73 = arith.subf %69, %72 : vector<1x16x16xf32>
    %74 = math.exp %73 : vector<1x16x16xf32>
    %cst_34 = arith.constant dense<0.000000e+00> : vector<1x16xf32>
    %75 = vector.multi_reduction <add>, %74, %cst_34 [2] : vector<1x16x16xf32> to vector<1x16xf32>
    %76 = vector.shape_cast %75 : vector<1x16xf32> to vector<1x16x1xf32>
    %77 = tpu.reciprocal %76 {approx = true} : vector<1x16x1xf32> -> vector<1x16x1xf32>
    %78 = vector.broadcast %77 : vector<1x16x1xf32> to vector<1x16x16xf32>
    %79 = arith.mulf %74, %78 : vector<1x16x16xf32>
    %80 = arith.truncf %79 : vector<1x16x16xf32> to vector<1x16x16xbf16>
    "tpu.trace_start"() <{level = 10 : i32, message = "bqk,bkd->bqd"}> : () -> ()
    %cst_35 = arith.constant dense<0.000000e+00> : vector<1x16x64xf32>
    %81 = tpu.matmul %80, %64, %cst_35 {dimension_numbers = #tpu.dot_dimension_numbers<[2], [1], [1], [2], [0, 0, 0, 1, 1, 2], [0], [0]>} : vector<1x16x16xbf16>, vector<1x16x64xbf16>, vector<1x16x64xf32> -> vector<1x16x64xf32>
    "tpu.trace_stop"() : () -> ()
    %82 = vector.shape_cast %81 : vector<1x16x64xf32> to vector<16x64xf32>
    %83 = arith.truncf %82 : vector<16x64xf32> to vector<16x64xbf16>
    %c0_36 = arith.constant 0 : index
    %c1 = arith.constant 1 : index
    %c0_37 = arith.constant 0 : index
    %c0_38 = arith.constant 0 : index
    %84 = vector.load %arg7[%c0_36, %c1, %c0_37, %c0_38] : memref<2x2x64x128xbf16, #tpu.memory_space<vmem>>, vector<1x1x64x128xbf16>
    %85 = vector.shape_cast %84 : vector<1x1x64x128xbf16> to vector<64x128xbf16>
    %cst_39 = arith.constant dense<0.000000e+00> : vector<16x128xf32>
    %86 = tpu.matmul %83, %85, %cst_39 {dimension_numbers = #tpu.dot_dimension_numbers<[1], [0], [0], [1], [0, 0, 1, 1], [], []>} : vector<16x64xbf16>, vector<64x128xbf16>, vector<16x128xf32> -> vector<16x128xf32>
    %87 = arith.addf %61, %86 : vector<16x128xf32>
    %c0_40 = arith.constant 0 : index
    %c0_41 = arith.constant 0 : index
    %c0_42 = arith.constant 0 : index
    %88 = vector.load %arg8[%c0_40, %c0_41, %c0_42] : memref<2x1x128xf32, #tpu.memory_space<vmem>>, vector<1x1x128xf32>
    %89 = vector.shape_cast %88 : vector<1x1x128xf32> to vector<1x128xf32>
    %90 = vector.broadcast %89 : vector<1x128xf32> to vector<16x128xf32>
    %91 = arith.addf %87, %90 : vector<16x128xf32>
    %92 = arith.addf %91, %24 : vector<16x128xf32>
    %c0_43 = arith.constant 0 : index
    %c0_44 = arith.constant 0 : index
    %c0_45 = arith.constant 0 : index
    %93 = vector.load %arg9[%c0_43, %c0_44, %c0_45] : memref<2x1x128xf32, #tpu.memory_space<vmem>>, vector<1x1x128xf32>
    %94 = vector.shape_cast %93 : vector<1x1x128xf32> to vector<1x128xf32>
    %c0_46 = arith.constant 0 : index
    %c0_47 = arith.constant 0 : index
    %c0_48 = arith.constant 0 : index
    %95 = vector.load %arg10[%c0_46, %c0_47, %c0_48] : memref<2x1x128xf32, #tpu.memory_space<vmem>>, vector<1x1x128xf32>
    %96 = vector.shape_cast %95 : vector<1x1x128xf32> to vector<1x128xf32>
    %cst_49 = arith.constant dense<0.000000e+00> : vector<16xf32>
    %97 = vector.multi_reduction <add>, %92, %cst_49 [1] : vector<16x128xf32> to vector<16xf32>
    %98 = vector.shape_cast %97 : vector<16xf32> to vector<16x1xf32>
    %cst_50 = arith.constant 1.280000e+02 : f32
    %99 = vector.broadcast %cst_50 : f32 to vector<16x1xf32>
    %100 = arith.divf %98, %99 : vector<16x1xf32>
    %101 = vector.broadcast %100 : vector<16x1xf32> to vector<16x128xf32>
    %102 = arith.subf %92, %101 : vector<16x128xf32>
    %103 = arith.mulf %102, %102 : vector<16x128xf32>
    %cst_51 = arith.constant dense<0.000000e+00> : vector<16xf32>
    %104 = vector.multi_reduction <add>, %103, %cst_51 [1] : vector<16x128xf32> to vector<16xf32>
    %105 = vector.shape_cast %104 : vector<16xf32> to vector<16x1xf32>
    %cst_52 = arith.constant 1.280000e+02 : f32
    %106 = vector.broadcast %cst_52 : f32 to vector<16x1xf32>
    %107 = arith.divf %105, %106 : vector<16x1xf32>
    %cst_53 = arith.constant 9.99999996E-13 : f32
    %108 = vector.broadcast %cst_53 : f32 to vector<16x1xf32>
    %109 = arith.addf %107, %108 : vector<16x1xf32>
    %110 = math.rsqrt %109 : vector<16x1xf32>
    %111 = vector.broadcast %110 : vector<16x1xf32> to vector<16x128xf32>
    %112 = arith.mulf %102, %111 : vector<16x128xf32>
    %113 = vector.broadcast %94 : vector<1x128xf32> to vector<16x128xf32>
    %114 = arith.mulf %112, %113 : vector<16x128xf32>
    %115 = vector.broadcast %96 : vector<1x128xf32> to vector<16x128xf32>
    %116 = arith.addf %114, %115 : vector<16x128xf32>
    %117 = arith.truncf %116 : vector<16x128xf32> to vector<16x128xbf16>
    %c0_54 = arith.constant 0 : index
    %c0_55 = arith.constant 0 : index
    %c0_56 = arith.constant 0 : index
    %118 = vector.load %arg11[%c0_54, %c0_55, %c0_56] : memref<2x128x512xbf16, #tpu.memory_space<vmem>>, vector<1x128x512xbf16>
    %119 = vector.shape_cast %118 : vector<1x128x512xbf16> to vector<128x512xbf16>
    %cst_57 = arith.constant dense<0.000000e+00> : vector<16x512xf32>
    %120 = tpu.matmul %117, %119, %cst_57 {dimension_numbers = #tpu.dot_dimension_numbers<[1], [0], [0], [1], [0, 0, 1, 1], [], []>} : vector<16x128xbf16>, vector<128x512xbf16>, vector<16x512xf32> -> vector<16x512xf32>
    %c0_58 = arith.constant 0 : index
    %c0_59 = arith.constant 0 : index
    %c0_60 = arith.constant 0 : index
    %121 = vector.load %arg12[%c0_58, %c0_59, %c0_60] : memref<2x1x512xf32, #tpu.memory_space<vmem>>, vector<1x1x512xf32>
    %122 = vector.shape_cast %121 : vector<1x1x512xf32> to vector<1x512xf32>
    %123 = vector.broadcast %122 : vector<1x512xf32> to vector<16x512xf32>
    %124 = arith.addf %120, %123 : vector<16x512xf32>
    %cst_61 = arith.constant 5.000000e-01 : f32
    %125 = vector.broadcast %cst_61 : f32 to vector<16x512xf32>
    %126 = arith.mulf %125, %124 : vector<16x512xf32>
    %cst_62 = arith.constant 0.707106769 : f32
    %127 = vector.broadcast %cst_62 : f32 to vector<16x512xf32>
    %128 = arith.mulf %124, %127 : vector<16x512xf32>
    %129 = math.absf %128 : vector<16x512xf32>
    %cst_63 = arith.constant 0.327591091 : f32
    %130 = vector.broadcast %cst_63 : f32 to vector<16x512xf32>
    %131 = arith.mulf %130, %129 : vector<16x512xf32>
    %cst_64 = arith.constant 1.000000e+00 : f32
    %132 = vector.broadcast %cst_64 : f32 to vector<16x512xf32>
    %133 = arith.addf %132, %131 : vector<16x512xf32>
    %cst_65 = arith.constant 1.000000e+00 : f32
    %134 = vector.broadcast %cst_65 : f32 to vector<16x512xf32>
    %135 = arith.divf %134, %133 : vector<16x512xf32>
    %cst_66 = arith.constant 1.06140542 : f32
    %136 = vector.broadcast %cst_66 : f32 to vector<16x512xf32>
    %137 = arith.mulf %136, %135 : vector<16x512xf32>
    %cst_67 = arith.constant -1.45315206 : f32
    %138 = vector.broadcast %cst_67 : f32 to vector<16x512xf32>
    %139 = arith.addf %137, %138 : vector<16x512xf32>
    %140 = arith.mulf %139, %135 : vector<16x512xf32>
    %cst_68 = arith.constant 1.42141378 : f32
    %141 = vector.broadcast %cst_68 : f32 to vector<16x512xf32>
    %142 = arith.addf %140, %141 : vector<16x512xf32>
    %143 = arith.mulf %142, %135 : vector<16x512xf32>
    %cst_69 = arith.constant -0.284496725 : f32
    %144 = vector.broadcast %cst_69 : f32 to vector<16x512xf32>
    %145 = arith.addf %143, %144 : vector<16x512xf32>
    %146 = arith.mulf %145, %135 : vector<16x512xf32>
    %cst_70 = arith.constant 0.254829586 : f32
    %147 = vector.broadcast %cst_70 : f32 to vector<16x512xf32>
    %148 = arith.addf %146, %147 : vector<16x512xf32>
    %149 = arith.mulf %148, %135 : vector<16x512xf32>
    %cst_71 = arith.constant 0.000000e+00 : f32
    %150 = vector.broadcast %cst_71 : f32 to vector<16x512xf32>
    %151 = arith.subf %150, %129 : vector<16x512xf32>
    %152 = arith.mulf %151, %129 : vector<16x512xf32>
    %153 = math.exp %152 : vector<16x512xf32>
    %154 = arith.mulf %149, %153 : vector<16x512xf32>
    %cst_72 = arith.constant 1.000000e+00 : f32
    %155 = vector.broadcast %cst_72 : f32 to vector<16x512xf32>
    %156 = arith.subf %155, %154 : vector<16x512xf32>
    %cst_73 = arith.constant 0.000000e+00 : f32
    %157 = vector.broadcast %cst_73 : f32 to vector<16x512xf32>
    %158 = arith.cmpf olt, %128, %157 : vector<16x512xf32>
    %cst_74 = arith.constant 0.000000e+00 : f32
    %159 = vector.broadcast %cst_74 : f32 to vector<16x512xf32>
    %160 = arith.subf %159, %156 : vector<16x512xf32>
    %161 = arith.select %158, %160, %156 : vector<16x512xi1>, vector<16x512xf32>
    %cst_75 = arith.constant 1.000000e+00 : f32
    %162 = vector.broadcast %cst_75 : f32 to vector<16x512xf32>
    %163 = arith.addf %162, %161 : vector<16x512xf32>
    %164 = arith.mulf %126, %163 : vector<16x512xf32>
    %165 = arith.truncf %164 : vector<16x512xf32> to vector<16x512xbf16>
    %c0_76 = arith.constant 0 : index
    %c0_77 = arith.constant 0 : index
    %c0_78 = arith.constant 0 : index
    %166 = vector.load %arg13[%c0_76, %c0_77, %c0_78] : memref<2x512x128xbf16, #tpu.memory_space<vmem>>, vector<1x512x128xbf16>
    %167 = vector.shape_cast %166 : vector<1x512x128xbf16> to vector<512x128xbf16>
    %cst_79 = arith.constant dense<0.000000e+00> : vector<16x128xf32>
    %168 = tpu.matmul %165, %167, %cst_79 {dimension_numbers = #tpu.dot_dimension_numbers<[1], [0], [0], [1], [0, 0, 1, 1], [], []>} : vector<16x512xbf16>, vector<512x128xbf16>, vector<16x128xf32> -> vector<16x128xf32>
    %c0_80 = arith.constant 0 : index
    %c0_81 = arith.constant 0 : index
    %c0_82 = arith.constant 0 : index
    %169 = vector.load %arg14[%c0_80, %c0_81, %c0_82] : memref<2x1x128xf32, #tpu.memory_space<vmem>>, vector<1x1x128xf32>
    %170 = vector.shape_cast %169 : vector<1x1x128xf32> to vector<1x128xf32>
    %171 = vector.broadcast %170 : vector<1x128xf32> to vector<16x128xf32>
    %172 = arith.addf %168, %171 : vector<16x128xf32>
    %173 = arith.addf %172, %116 : vector<16x128xf32>
    %c0_83 = arith.constant 0 : index
    %c0_84 = arith.constant 0 : index
    %c0_85 = arith.constant 0 : index
    %174 = vector.load %arg15[%c0_83, %c0_84, %c0_85] : memref<2x1x128xf32, #tpu.memory_space<vmem>>, vector<1x1x128xf32>
    %175 = vector.shape_cast %174 : vector<1x1x128xf32> to vector<1x128xf32>
    %c0_86 = arith.constant 0 : index
    %c0_87 = arith.constant 0 : index
    %c0_88 = arith.constant 0 : index
    %176 = vector.load %arg16[%c0_86, %c0_87, %c0_88] : memref<2x1x128xf32, #tpu.memory_space<vmem>>, vector<1x1x128xf32>
    %177 = vector.shape_cast %176 : vector<1x1x128xf32> to vector<1x128xf32>
    %cst_89 = arith.constant dense<0.000000e+00> : vector<16xf32>
    %178 = vector.multi_reduction <add>, %173, %cst_89 [1] : vector<16x128xf32> to vector<16xf32>
    %179 = vector.shape_cast %178 : vector<16xf32> to vector<16x1xf32>
    %cst_90 = arith.constant 1.280000e+02 : f32
    %180 = vector.broadcast %cst_90 : f32 to vector<16x1xf32>
    %181 = arith.divf %179, %180 : vector<16x1xf32>
    %182 = vector.broadcast %181 : vector<16x1xf32> to vector<16x128xf32>
    %183 = arith.subf %173, %182 : vector<16x128xf32>
    %184 = arith.mulf %183, %183 : vector<16x128xf32>
    %cst_91 = arith.constant dense<0.000000e+00> : vector<16xf32>
    %185 = vector.multi_reduction <add>, %184, %cst_91 [1] : vector<16x128xf32> to vector<16xf32>
    %186 = vector.shape_cast %185 : vector<16xf32> to vector<16x1xf32>
    %cst_92 = arith.constant 1.280000e+02 : f32
    %187 = vector.broadcast %cst_92 : f32 to vector<16x1xf32>
    %188 = arith.divf %186, %187 : vector<16x1xf32>
    %cst_93 = arith.constant 9.99999996E-13 : f32
    %189 = vector.broadcast %cst_93 : f32 to vector<16x1xf32>
    %190 = arith.addf %188, %189 : vector<16x1xf32>
    %191 = math.rsqrt %190 : vector<16x1xf32>
    %192 = vector.broadcast %191 : vector<16x1xf32> to vector<16x128xf32>
    %193 = arith.mulf %183, %192 : vector<16x128xf32>
    %194 = vector.broadcast %175 : vector<1x128xf32> to vector<16x128xf32>
    %195 = arith.mulf %193, %194 : vector<16x128xf32>
    %196 = vector.broadcast %177 : vector<1x128xf32> to vector<16x128xf32>
    %197 = arith.addf %195, %196 : vector<16x128xf32>
    %198 = arith.truncf %197 : vector<16x128xf32> to vector<16x128xbf16>
    %c1_94 = arith.constant 1 : index
    %c0_95 = arith.constant 0 : index
    %c0_96 = arith.constant 0 : index
    %199 = vector.load %arg5[%c1_94, %c0_95, %c0_96] : memref<2x128x384xbf16, #tpu.memory_space<vmem>>, vector<1x128x384xbf16>
    %200 = vector.shape_cast %199 : vector<1x128x384xbf16> to vector<128x384xbf16>
    %cst_97 = arith.constant dense<0.000000e+00> : vector<16x384xf32>
    %201 = tpu.matmul %198, %200, %cst_97 {dimension_numbers = #tpu.dot_dimension_numbers<[1], [0], [0], [1], [0, 0, 1, 1], [], []>} : vector<16x128xbf16>, vector<128x384xbf16>, vector<16x384xf32> -> vector<16x384xf32>
    %c1_98 = arith.constant 1 : index
    %c0_99 = arith.constant 0 : index
    %c0_100 = arith.constant 0 : index
    %202 = vector.load %arg6[%c1_98, %c0_99, %c0_100] : memref<2x1x384xf32, #tpu.memory_space<vmem>>, vector<1x1x384xf32>
    %203 = vector.shape_cast %202 : vector<1x1x384xf32> to vector<1x384xf32>
    %204 = vector.broadcast %203 : vector<1x384xf32> to vector<16x384xf32>
    %205 = arith.addf %201, %204 : vector<16x384xf32>
    %206 = arith.truncf %205 : vector<16x384xf32> to vector<16x384xbf16>
    %207 = vector.shape_cast %206 : vector<16x384xbf16> to vector<1x16x384xbf16>
    %cst_101 = arith.constant 0.000000e+00 : f32
    %208 = vector.broadcast %cst_101 : f32 to vector<16x128xf32>
    %209 = vector.extract_strided_slice %207 {offsets = [0, 0, 0], sizes = [1, 16, 64], strides = [1, 1, 1]} : vector<1x16x384xbf16> to vector<1x16x64xbf16>
    %210 = vector.extract_strided_slice %207 {offsets = [0, 0, 128], sizes = [1, 16, 64], strides = [1, 1, 1]} : vector<1x16x384xbf16> to vector<1x16x64xbf16>
    %211 = vector.extract_strided_slice %207 {offsets = [0, 0, 256], sizes = [1, 16, 64], strides = [1, 1, 1]} : vector<1x16x384xbf16> to vector<1x16x64xbf16>
    "tpu.trace_start"() <{level = 10 : i32, message = "bqd,bkd->bqk"}> : () -> ()
    %cst_102 = arith.constant dense<0.000000e+00> : vector<1x16x16xf32>
    %212 = tpu.matmul %209, %210, %cst_102 {dimension_numbers = #tpu.dot_dimension_numbers<[2], [2], [1], [1], [0, 0, 0, 1, 1, 1], [0], [0]>} : vector<1x16x64xbf16>, vector<1x16x64xbf16>, vector<1x16x16xf32> -> vector<1x16x16xf32>
    "tpu.trace_stop"() : () -> ()
    %cst_103 = arith.constant 1.250000e-01 : f32
    %213 = vector.broadcast %cst_103 : f32 to vector<1x16x16xf32>
    %214 = arith.mulf %212, %213 : vector<1x16x16xf32>
    %215 = vector.broadcast %1 : vector<1x1x16xf32> to vector<1x16x16xf32>
    %216 = arith.addf %214, %215 : vector<1x16x16xf32>
    %cst_104 = arith.constant dense<0xFF800000> : vector<1x16xf32>
    %217 = vector.multi_reduction <maximumf>, %216, %cst_104 [2] : vector<1x16x16xf32> to vector<1x16xf32>
    %218 = vector.shape_cast %217 : vector<1x16xf32> to vector<1x16x1xf32>
    %219 = vector.broadcast %218 : vector<1x16x1xf32> to vector<1x16x16xf32>
    %220 = arith.subf %216, %219 : vector<1x16x16xf32>
    %221 = math.exp %220 : vector<1x16x16xf32>
    %cst_105 = arith.constant dense<0.000000e+00> : vector<1x16xf32>
    %222 = vector.multi_reduction <add>, %221, %cst_105 [2] : vector<1x16x16xf32> to vector<1x16xf32>
    %223 = vector.shape_cast %222 : vector<1x16xf32> to vector<1x16x1xf32>
    %224 = tpu.reciprocal %223 {approx = true} : vector<1x16x1xf32> -> vector<1x16x1xf32>
    %225 = vector.broadcast %224 : vector<1x16x1xf32> to vector<1x16x16xf32>
    %226 = arith.mulf %221, %225 : vector<1x16x16xf32>
    %227 = arith.truncf %226 : vector<1x16x16xf32> to vector<1x16x16xbf16>
    "tpu.trace_start"() <{level = 10 : i32, message = "bqk,bkd->bqd"}> : () -> ()
    %cst_106 = arith.constant dense<0.000000e+00> : vector<1x16x64xf32>
    %228 = tpu.matmul %227, %211, %cst_106 {dimension_numbers = #tpu.dot_dimension_numbers<[2], [1], [1], [2], [0, 0, 0, 1, 1, 2], [0], [0]>} : vector<1x16x16xbf16>, vector<1x16x64xbf16>, vector<1x16x64xf32> -> vector<1x16x64xf32>
    "tpu.trace_stop"() : () -> ()
    %229 = vector.shape_cast %228 : vector<1x16x64xf32> to vector<16x64xf32>
    %230 = arith.truncf %229 : vector<16x64xf32> to vector<16x64xbf16>
    %c1_107 = arith.constant 1 : index
    %c0_108 = arith.constant 0 : index
    %c0_109 = arith.constant 0 : index
    %c0_110 = arith.constant 0 : index
    %231 = vector.load %arg7[%c1_107, %c0_108, %c0_109, %c0_110] : memref<2x2x64x128xbf16, #tpu.memory_space<vmem>>, vector<1x1x64x128xbf16>
    %232 = vector.shape_cast %231 : vector<1x1x64x128xbf16> to vector<64x128xbf16>
    %cst_111 = arith.constant dense<0.000000e+00> : vector<16x128xf32>
    %233 = tpu.matmul %230, %232, %cst_111 {dimension_numbers = #tpu.dot_dimension_numbers<[1], [0], [0], [1], [0, 0, 1, 1], [], []>} : vector<16x64xbf16>, vector<64x128xbf16>, vector<16x128xf32> -> vector<16x128xf32>
    %234 = arith.addf %208, %233 : vector<16x128xf32>
    %235 = vector.extract_strided_slice %207 {offsets = [0, 0, 64], sizes = [1, 16, 64], strides = [1, 1, 1]} : vector<1x16x384xbf16> to vector<1x16x64xbf16>
    %236 = vector.extract_strided_slice %207 {offsets = [0, 0, 192], sizes = [1, 16, 64], strides = [1, 1, 1]} : vector<1x16x384xbf16> to vector<1x16x64xbf16>
    %237 = vector.extract_strided_slice %207 {offsets = [0, 0, 320], sizes = [1, 16, 64], strides = [1, 1, 1]} : vector<1x16x384xbf16> to vector<1x16x64xbf16>
    "tpu.trace_start"() <{level = 10 : i32, message = "bqd,bkd->bqk"}> : () -> ()
    %cst_112 = arith.constant dense<0.000000e+00> : vector<1x16x16xf32>
    %238 = tpu.matmul %235, %236, %cst_112 {dimension_numbers = #tpu.dot_dimension_numbers<[2], [2], [1], [1], [0, 0, 0, 1, 1, 1], [0], [0]>} : vector<1x16x64xbf16>, vector<1x16x64xbf16>, vector<1x16x16xf32> -> vector<1x16x16xf32>
    "tpu.trace_stop"() : () -> ()
    %cst_113 = arith.constant 1.250000e-01 : f32
    %239 = vector.broadcast %cst_113 : f32 to vector<1x16x16xf32>
    %240 = arith.mulf %238, %239 : vector<1x16x16xf32>
    %241 = vector.broadcast %1 : vector<1x1x16xf32> to vector<1x16x16xf32>
    %242 = arith.addf %240, %241 : vector<1x16x16xf32>
    %cst_114 = arith.constant dense<0xFF800000> : vector<1x16xf32>
    %243 = vector.multi_reduction <maximumf>, %242, %cst_114 [2] : vector<1x16x16xf32> to vector<1x16xf32>
    %244 = vector.shape_cast %243 : vector<1x16xf32> to vector<1x16x1xf32>
    %245 = vector.broadcast %244 : vector<1x16x1xf32> to vector<1x16x16xf32>
    %246 = arith.subf %242, %245 : vector<1x16x16xf32>
    %247 = math.exp %246 : vector<1x16x16xf32>
    %cst_115 = arith.constant dense<0.000000e+00> : vector<1x16xf32>
    %248 = vector.multi_reduction <add>, %247, %cst_115 [2] : vector<1x16x16xf32> to vector<1x16xf32>
    %249 = vector.shape_cast %248 : vector<1x16xf32> to vector<1x16x1xf32>
    %250 = tpu.reciprocal %249 {approx = true} : vector<1x16x1xf32> -> vector<1x16x1xf32>
    %251 = vector.broadcast %250 : vector<1x16x1xf32> to vector<1x16x16xf32>
    %252 = arith.mulf %247, %251 : vector<1x16x16xf32>
    %253 = arith.truncf %252 : vector<1x16x16xf32> to vector<1x16x16xbf16>
    "tpu.trace_start"() <{level = 10 : i32, message = "bqk,bkd->bqd"}> : () -> ()
    %cst_116 = arith.constant dense<0.000000e+00> : vector<1x16x64xf32>
    %254 = tpu.matmul %253, %237, %cst_116 {dimension_numbers = #tpu.dot_dimension_numbers<[2], [1], [1], [2], [0, 0, 0, 1, 1, 2], [0], [0]>} : vector<1x16x16xbf16>, vector<1x16x64xbf16>, vector<1x16x64xf32> -> vector<1x16x64xf32>
    "tpu.trace_stop"() : () -> ()
    %255 = vector.shape_cast %254 : vector<1x16x64xf32> to vector<16x64xf32>
    %256 = arith.truncf %255 : vector<16x64xf32> to vector<16x64xbf16>
    %c1_117 = arith.constant 1 : index
    %c1_118 = arith.constant 1 : index
    %c0_119 = arith.constant 0 : index
    %c0_120 = arith.constant 0 : index
    %257 = vector.load %arg7[%c1_117, %c1_118, %c0_119, %c0_120] : memref<2x2x64x128xbf16, #tpu.memory_space<vmem>>, vector<1x1x64x128xbf16>
    %258 = vector.shape_cast %257 : vector<1x1x64x128xbf16> to vector<64x128xbf16>
    %cst_121 = arith.constant dense<0.000000e+00> : vector<16x128xf32>
    %259 = tpu.matmul %256, %258, %cst_121 {dimension_numbers = #tpu.dot_dimension_numbers<[1], [0], [0], [1], [0, 0, 1, 1], [], []>} : vector<16x64xbf16>, vector<64x128xbf16>, vector<16x128xf32> -> vector<16x128xf32>
    %260 = arith.addf %234, %259 : vector<16x128xf32>
    %c1_122 = arith.constant 1 : index
    %c0_123 = arith.constant 0 : index
    %c0_124 = arith.constant 0 : index
    %261 = vector.load %arg8[%c1_122, %c0_123, %c0_124] : memref<2x1x128xf32, #tpu.memory_space<vmem>>, vector<1x1x128xf32>
    %262 = vector.shape_cast %261 : vector<1x1x128xf32> to vector<1x128xf32>
    %263 = vector.broadcast %262 : vector<1x128xf32> to vector<16x128xf32>
    %264 = arith.addf %260, %263 : vector<16x128xf32>
    %265 = arith.addf %264, %197 : vector<16x128xf32>
    %c1_125 = arith.constant 1 : index
    %c0_126 = arith.constant 0 : index
    %c0_127 = arith.constant 0 : index
    %266 = vector.load %arg9[%c1_125, %c0_126, %c0_127] : memref<2x1x128xf32, #tpu.memory_space<vmem>>, vector<1x1x128xf32>
    %267 = vector.shape_cast %266 : vector<1x1x128xf32> to vector<1x128xf32>
    %c1_128 = arith.constant 1 : index
    %c0_129 = arith.constant 0 : index
    %c0_130 = arith.constant 0 : index
    %268 = vector.load %arg10[%c1_128, %c0_129, %c0_130] : memref<2x1x128xf32, #tpu.memory_space<vmem>>, vector<1x1x128xf32>
    %269 = vector.shape_cast %268 : vector<1x1x128xf32> to vector<1x128xf32>
    %cst_131 = arith.constant dense<0.000000e+00> : vector<16xf32>
    %270 = vector.multi_reduction <add>, %265, %cst_131 [1] : vector<16x128xf32> to vector<16xf32>
    %271 = vector.shape_cast %270 : vector<16xf32> to vector<16x1xf32>
    %cst_132 = arith.constant 1.280000e+02 : f32
    %272 = vector.broadcast %cst_132 : f32 to vector<16x1xf32>
    %273 = arith.divf %271, %272 : vector<16x1xf32>
    %274 = vector.broadcast %273 : vector<16x1xf32> to vector<16x128xf32>
    %275 = arith.subf %265, %274 : vector<16x128xf32>
    %276 = arith.mulf %275, %275 : vector<16x128xf32>
    %cst_133 = arith.constant dense<0.000000e+00> : vector<16xf32>
    %277 = vector.multi_reduction <add>, %276, %cst_133 [1] : vector<16x128xf32> to vector<16xf32>
    %278 = vector.shape_cast %277 : vector<16xf32> to vector<16x1xf32>
    %cst_134 = arith.constant 1.280000e+02 : f32
    %279 = vector.broadcast %cst_134 : f32 to vector<16x1xf32>
    %280 = arith.divf %278, %279 : vector<16x1xf32>
    %cst_135 = arith.constant 9.99999996E-13 : f32
    %281 = vector.broadcast %cst_135 : f32 to vector<16x1xf32>
    %282 = arith.addf %280, %281 : vector<16x1xf32>
    %283 = math.rsqrt %282 : vector<16x1xf32>
    %284 = vector.broadcast %283 : vector<16x1xf32> to vector<16x128xf32>
    %285 = arith.mulf %275, %284 : vector<16x128xf32>
    %286 = vector.broadcast %267 : vector<1x128xf32> to vector<16x128xf32>
    %287 = arith.mulf %285, %286 : vector<16x128xf32>
    %288 = vector.broadcast %269 : vector<1x128xf32> to vector<16x128xf32>
    %289 = arith.addf %287, %288 : vector<16x128xf32>
    %290 = arith.truncf %289 : vector<16x128xf32> to vector<16x128xbf16>
    %c1_136 = arith.constant 1 : index
    %c0_137 = arith.constant 0 : index
    %c0_138 = arith.constant 0 : index
    %291 = vector.load %arg11[%c1_136, %c0_137, %c0_138] : memref<2x128x512xbf16, #tpu.memory_space<vmem>>, vector<1x128x512xbf16>
    %292 = vector.shape_cast %291 : vector<1x128x512xbf16> to vector<128x512xbf16>
    %cst_139 = arith.constant dense<0.000000e+00> : vector<16x512xf32>
    %293 = tpu.matmul %290, %292, %cst_139 {dimension_numbers = #tpu.dot_dimension_numbers<[1], [0], [0], [1], [0, 0, 1, 1], [], []>} : vector<16x128xbf16>, vector<128x512xbf16>, vector<16x512xf32> -> vector<16x512xf32>
    %c1_140 = arith.constant 1 : index
    %c0_141 = arith.constant 0 : index
    %c0_142 = arith.constant 0 : index
    %294 = vector.load %arg12[%c1_140, %c0_141, %c0_142] : memref<2x1x512xf32, #tpu.memory_space<vmem>>, vector<1x1x512xf32>
    %295 = vector.shape_cast %294 : vector<1x1x512xf32> to vector<1x512xf32>
    %296 = vector.broadcast %295 : vector<1x512xf32> to vector<16x512xf32>
    %297 = arith.addf %293, %296 : vector<16x512xf32>
    %cst_143 = arith.constant 5.000000e-01 : f32
    %298 = vector.broadcast %cst_143 : f32 to vector<16x512xf32>
    %299 = arith.mulf %298, %297 : vector<16x512xf32>
    %cst_144 = arith.constant 0.707106769 : f32
    %300 = vector.broadcast %cst_144 : f32 to vector<16x512xf32>
    %301 = arith.mulf %297, %300 : vector<16x512xf32>
    %302 = math.absf %301 : vector<16x512xf32>
    %cst_145 = arith.constant 0.327591091 : f32
    %303 = vector.broadcast %cst_145 : f32 to vector<16x512xf32>
    %304 = arith.mulf %303, %302 : vector<16x512xf32>
    %cst_146 = arith.constant 1.000000e+00 : f32
    %305 = vector.broadcast %cst_146 : f32 to vector<16x512xf32>
    %306 = arith.addf %305, %304 : vector<16x512xf32>
    %cst_147 = arith.constant 1.000000e+00 : f32
    %307 = vector.broadcast %cst_147 : f32 to vector<16x512xf32>
    %308 = arith.divf %307, %306 : vector<16x512xf32>
    %cst_148 = arith.constant 1.06140542 : f32
    %309 = vector.broadcast %cst_148 : f32 to vector<16x512xf32>
    %310 = arith.mulf %309, %308 : vector<16x512xf32>
    %cst_149 = arith.constant -1.45315206 : f32
    %311 = vector.broadcast %cst_149 : f32 to vector<16x512xf32>
    %312 = arith.addf %310, %311 : vector<16x512xf32>
    %313 = arith.mulf %312, %308 : vector<16x512xf32>
    %cst_150 = arith.constant 1.42141378 : f32
    %314 = vector.broadcast %cst_150 : f32 to vector<16x512xf32>
    %315 = arith.addf %313, %314 : vector<16x512xf32>
    %316 = arith.mulf %315, %308 : vector<16x512xf32>
    %cst_151 = arith.constant -0.284496725 : f32
    %317 = vector.broadcast %cst_151 : f32 to vector<16x512xf32>
    %318 = arith.addf %316, %317 : vector<16x512xf32>
    %319 = arith.mulf %318, %308 : vector<16x512xf32>
    %cst_152 = arith.constant 0.254829586 : f32
    %320 = vector.broadcast %cst_152 : f32 to vector<16x512xf32>
    %321 = arith.addf %319, %320 : vector<16x512xf32>
    %322 = arith.mulf %321, %308 : vector<16x512xf32>
    %cst_153 = arith.constant 0.000000e+00 : f32
    %323 = vector.broadcast %cst_153 : f32 to vector<16x512xf32>
    %324 = arith.subf %323, %302 : vector<16x512xf32>
    %325 = arith.mulf %324, %302 : vector<16x512xf32>
    %326 = math.exp %325 : vector<16x512xf32>
    %327 = arith.mulf %322, %326 : vector<16x512xf32>
    %cst_154 = arith.constant 1.000000e+00 : f32
    %328 = vector.broadcast %cst_154 : f32 to vector<16x512xf32>
    %329 = arith.subf %328, %327 : vector<16x512xf32>
    %cst_155 = arith.constant 0.000000e+00 : f32
    %330 = vector.broadcast %cst_155 : f32 to vector<16x512xf32>
    %331 = arith.cmpf olt, %301, %330 : vector<16x512xf32>
    %cst_156 = arith.constant 0.000000e+00 : f32
    %332 = vector.broadcast %cst_156 : f32 to vector<16x512xf32>
    %333 = arith.subf %332, %329 : vector<16x512xf32>
    %334 = arith.select %331, %333, %329 : vector<16x512xi1>, vector<16x512xf32>
    %cst_157 = arith.constant 1.000000e+00 : f32
    %335 = vector.broadcast %cst_157 : f32 to vector<16x512xf32>
    %336 = arith.addf %335, %334 : vector<16x512xf32>
    %337 = arith.mulf %299, %336 : vector<16x512xf32>
    %338 = arith.truncf %337 : vector<16x512xf32> to vector<16x512xbf16>
    %c1_158 = arith.constant 1 : index
    %c0_159 = arith.constant 0 : index
    %c0_160 = arith.constant 0 : index
    %339 = vector.load %arg13[%c1_158, %c0_159, %c0_160] : memref<2x512x128xbf16, #tpu.memory_space<vmem>>, vector<1x512x128xbf16>
    %340 = vector.shape_cast %339 : vector<1x512x128xbf16> to vector<512x128xbf16>
    %cst_161 = arith.constant dense<0.000000e+00> : vector<16x128xf32>
    %341 = tpu.matmul %338, %340, %cst_161 {dimension_numbers = #tpu.dot_dimension_numbers<[1], [0], [0], [1], [0, 0, 1, 1], [], []>} : vector<16x512xbf16>, vector<512x128xbf16>, vector<16x128xf32> -> vector<16x128xf32>
    %c1_162 = arith.constant 1 : index
    %c0_163 = arith.constant 0 : index
    %c0_164 = arith.constant 0 : index
    %342 = vector.load %arg14[%c1_162, %c0_163, %c0_164] : memref<2x1x128xf32, #tpu.memory_space<vmem>>, vector<1x1x128xf32>
    %343 = vector.shape_cast %342 : vector<1x1x128xf32> to vector<1x128xf32>
    %344 = vector.broadcast %343 : vector<1x128xf32> to vector<16x128xf32>
    %345 = arith.addf %341, %344 : vector<16x128xf32>
    %346 = arith.addf %345, %289 : vector<16x128xf32>
    %c1_165 = arith.constant 1 : index
    %c0_166 = arith.constant 0 : index
    %c0_167 = arith.constant 0 : index
    %347 = vector.load %arg15[%c1_165, %c0_166, %c0_167] : memref<2x1x128xf32, #tpu.memory_space<vmem>>, vector<1x1x128xf32>
    %348 = vector.shape_cast %347 : vector<1x1x128xf32> to vector<1x128xf32>
    %c1_168 = arith.constant 1 : index
    %c0_169 = arith.constant 0 : index
    %c0_170 = arith.constant 0 : index
    %349 = vector.load %arg16[%c1_168, %c0_169, %c0_170] : memref<2x1x128xf32, #tpu.memory_space<vmem>>, vector<1x1x128xf32>
    %350 = vector.shape_cast %349 : vector<1x1x128xf32> to vector<1x128xf32>
    %cst_171 = arith.constant dense<0.000000e+00> : vector<16xf32>
    %351 = vector.multi_reduction <add>, %346, %cst_171 [1] : vector<16x128xf32> to vector<16xf32>
    %352 = vector.shape_cast %351 : vector<16xf32> to vector<16x1xf32>
    %cst_172 = arith.constant 1.280000e+02 : f32
    %353 = vector.broadcast %cst_172 : f32 to vector<16x1xf32>
    %354 = arith.divf %352, %353 : vector<16x1xf32>
    %355 = vector.broadcast %354 : vector<16x1xf32> to vector<16x128xf32>
    %356 = arith.subf %346, %355 : vector<16x128xf32>
    %357 = arith.mulf %356, %356 : vector<16x128xf32>
    %cst_173 = arith.constant dense<0.000000e+00> : vector<16xf32>
    %358 = vector.multi_reduction <add>, %357, %cst_173 [1] : vector<16x128xf32> to vector<16xf32>
    %359 = vector.shape_cast %358 : vector<16xf32> to vector<16x1xf32>
    %cst_174 = arith.constant 1.280000e+02 : f32
    %360 = vector.broadcast %cst_174 : f32 to vector<16x1xf32>
    %361 = arith.divf %359, %360 : vector<16x1xf32>
    %cst_175 = arith.constant 9.99999996E-13 : f32
    %362 = vector.broadcast %cst_175 : f32 to vector<16x1xf32>
    %363 = arith.addf %361, %362 : vector<16x1xf32>
    %364 = math.rsqrt %363 : vector<16x1xf32>
    %365 = vector.broadcast %364 : vector<16x1xf32> to vector<16x128xf32>
    %366 = arith.mulf %356, %365 : vector<16x128xf32>
    %367 = vector.broadcast %348 : vector<1x128xf32> to vector<16x128xf32>
    %368 = arith.mulf %366, %367 : vector<16x128xf32>
    %369 = vector.broadcast %350 : vector<1x128xf32> to vector<16x128xf32>
    %370 = arith.addf %368, %369 : vector<16x128xf32>
    %371 = vector.shape_cast %370 : vector<16x128xf32> to vector<1x16x128xf32>
    %372 = vector.extract_strided_slice %371 {offsets = [0, 0, 0], sizes = [1, 1, 128], strides = [1, 1, 1]} : vector<1x16x128xf32> to vector<1x1x128xf32>
    %373 = vector.shape_cast %372 : vector<1x1x128xf32> to vector<1x128xf32>
    %374 = arith.truncf %373 : vector<1x128xf32> to vector<1x128xbf16>
    %c0_176 = arith.constant 0 : index
    %c0_177 = arith.constant 0 : index
    %375 = vector.load %arg17[%c0_176, %c0_177] : memref<128x128xbf16, #tpu.memory_space<vmem>>, vector<128x128xbf16>
    %cst_178 = arith.constant dense<0.000000e+00> : vector<1x128xf32>
    %376 = tpu.matmul %374, %375, %cst_178 {dimension_numbers = #tpu.dot_dimension_numbers<[1], [0], [0], [1], [0, 0, 1, 1], [], []>} : vector<1x128xbf16>, vector<128x128xbf16>, vector<1x128xf32> -> vector<1x128xf32>
    %c0_179 = arith.constant 0 : index
    %c0_180 = arith.constant 0 : index
    %377 = vector.load %arg18[%c0_179, %c0_180] : memref<1x128xf32, #tpu.memory_space<vmem>>, vector<1x128xf32>
    %378 = arith.addf %376, %377 : vector<1x128xf32>
    %379 = math.tanh %378 : vector<1x128xf32>
    %380 = arith.truncf %379 : vector<1x128xf32> to vector<1x128xbf16>
    %c0_181 = arith.constant 0 : index
    %c0_182 = arith.constant 0 : index
    %381 = vector.load %arg19[%c0_181, %c0_182] : memref<128x128xbf16, #tpu.memory_space<vmem>>, vector<128x128xbf16>
    %cst_183 = arith.constant dense<0.000000e+00> : vector<1x128xf32>
    %382 = tpu.matmul %380, %381, %cst_183 {dimension_numbers = #tpu.dot_dimension_numbers<[1], [0], [0], [1], [0, 0, 1, 1], [], []>} : vector<1x128xbf16>, vector<128x128xbf16>, vector<1x128xf32> -> vector<1x128xf32>
    %c0_184 = arith.constant 0 : index
    %c0_185 = arith.constant 0 : index
    %383 = vector.load %arg20[%c0_184, %c0_185] : memref<1x128xf32, #tpu.memory_space<vmem>>, vector<1x128xf32>
    %384 = arith.addf %382, %383 : vector<1x128xf32>
    %385 = vector.shape_cast %384 : vector<1x128xf32> to vector<1x1x128xf32>
    %c0_186 = arith.constant 0 : index
    %c0_187 = arith.constant 0 : index
    %c0_188 = arith.constant 0 : index
    %386 = vector.load %arg21[%c0_186, %c0_187, %c0_188] : memref<1x1x128xf32, #tpu.memory_space<vmem>>, vector<1x1x128xf32>
    tpu.vector_store %arg21[%c0_186, %c0_187, %c0_188], %385 {strides = array<i32>} : memref<1x1x128xf32, #tpu.memory_space<vmem>>, vector<1x1x128xf32>,
    return
  }
  func.func @transform_0(%arg0: i32) -> (i32, i32, i32) {
    %c0_i32 = arith.constant 0 : i32
    %c0_i32_0 = arith.constant 0 : i32
    %c0_i32_1 = arith.constant 0 : i32
    return %arg0, %c0_i32, %c0_i32_0 : i32, i32, i32
  }
  func.func @transform_1(%arg0: i32) -> (i32, i32, i32) {
    %c0_i32 = arith.constant 0 : i32
    %c0_i32_0 = arith.constant 0 : i32
    %c0_i32_1 = arith.constant 0 : i32
    return %arg0, %c0_i32, %c0_i32_0 : i32, i32, i32
  }
  func.func @transform_2(%arg0: i32) -> (i32, i32) {
    %c0_i32 = arith.constant 0 : i32
    %c0_i32_0 = arith.constant 0 : i32
    %c0_i32_1 = arith.constant 0 : i32
    return %c0_i32, %c0_i32_0 : i32, i32
  }
  func.func @transform_3(%arg0: i32) -> (i32, i32) {
    %c0_i32 = arith.constant 0 : i32
    %c0_i32_0 = arith.constant 0 : i32
    %c0_i32_1 = arith.constant 0 : i32
    return %c0_i32, %c0_i32_0 : i32, i32
  }
  func.func @transform_4(%arg0: i32) -> (i32, i32, i32) {
    %c0_i32 = arith.constant 0 : i32
    %c0_i32_0 = arith.constant 0 : i32
    %c0_i32_1 = arith.constant 0 : i32
    %c0_i32_2 = arith.constant 0 : i32
    return %c0_i32, %c0_i32_0, %c0_i32_1 : i32, i32, i32
  }
  func.func @transform_5(%arg0: i32) -> (i32, i32, i32) {
    %c0_i32 = arith.constant 0 : i32
    %c0_i32_0 = arith.constant 0 : i32
    %c0_i32_1 = arith.constant 0 : i32
    %c0_i32_2 = arith.constant 0 : i32
    return %c0_i32, %c0_i32_0, %c0_i32_1 : i32, i32, i32
  }
  func.func @transform_6(%arg0: i32) -> (i32, i32, i32, i32) {
    %c0_i32 = arith.constant 0 : i32
    %c0_i32_0 = arith.constant 0 : i32
    %c0_i32_1 = arith.constant 0 : i32
    %c0_i32_2 = arith.constant 0 : i32
    %c0_i32_3 = arith.constant 0 : i32
    return %c0_i32, %c0_i32_0, %c0_i32_1, %c0_i32_2 : i32, i32, i32, i32
  }
  func.func @transform_7(%arg0: i32) -> (i32, i32, i32) {
    %c0_i32 = arith.constant 0 : i32
    %c0_i32_0 = arith.constant 0 : i32
    %c0_i32_1 = arith.constant 0 : i32
    %c0_i32_2 = arith.constant 0 : i32
    return %c0_i32, %c0_i32_0, %c0_i32_1 : i32, i32, i32
  }
  func.func @transform_8(%arg0: i32) -> (i32, i32, i32) {
    %c0_i32 = arith.constant 0 : i32
    %c0_i32_0 = arith.constant 0 : i32
    %c0_i32_1 = arith.constant 0 : i32
    %c0_i32_2 = arith.constant 0 : i32
    return %c0_i32, %c0_i32_0, %c0_i32_1 : i32, i32, i32
  }
  func.func @transform_9(%arg0: i32) -> (i32, i32, i32) {
    %c0_i32 = arith.constant 0 : i32
    %c0_i32_0 = arith.constant 0 : i32
    %c0_i32_1 = arith.constant 0 : i32
    %c0_i32_2 = arith.constant 0 : i32
    return %c0_i32, %c0_i32_0, %c0_i32_1 : i32, i32, i32
  }
  func.func @transform_10(%arg0: i32) -> (i32, i32, i32) {
    %c0_i32 = arith.constant 0 : i32
    %c0_i32_0 = arith.constant 0 : i32
    %c0_i32_1 = arith.constant 0 : i32
    %c0_i32_2 = arith.constant 0 : i32
    return %c0_i32, %c0_i32_0, %c0_i32_1 : i32, i32, i32
  }
  func.func @transform_11(%arg0: i32) -> (i32, i32, i32) {
    %c0_i32 = arith.constant 0 : i32
    %c0_i32_0 = arith.constant 0 : i32
    %c0_i32_1 = arith.constant 0 : i32
    %c0_i32_2 = arith.constant 0 : i32
    return %c0_i32, %c0_i32_0, %c0_i32_1 : i32, i32, i32
  }
  func.func @transform_12(%arg0: i32) -> (i32, i32, i32) {
    %c0_i32 = arith.constant 0 : i32
    %c0_i32_0 = arith.constant 0 : i32
    %c0_i32_1 = arith.constant 0 : i32
    %c0_i32_2 = arith.constant 0 : i32
    return %c0_i32, %c0_i32_0, %c0_i32_1 : i32, i32, i32
  }
  func.func @transform_13(%arg0: i32) -> (i32, i32, i32) {
    %c0_i32 = arith.constant 0 : i32
    %c0_i32_0 = arith.constant 0 : i32
    %c0_i32_1 = arith.constant 0 : i32
    %c0_i32_2 = arith.constant 0 : i32
    return %c0_i32, %c0_i32_0, %c0_i32_1 : i32, i32, i32
  }
  func.func @transform_14(%arg0: i32) -> (i32, i32, i32) {
    %c0_i32 = arith.constant 0 : i32
    %c0_i32_0 = arith.constant 0 : i32
    %c0_i32_1 = arith.constant 0 : i32
    %c0_i32_2 = arith.constant 0 : i32
    return %c0_i32, %c0_i32_0, %c0_i32_1 : i32, i32, i32
  }
  func.func @transform_15(%arg0: i32) -> (i32, i32, i32) {
    %c0_i32 = arith.constant 0 : i32
    %c0_i32_0 = arith.constant 0 : i32
    %c0_i32_1 = arith.constant 0 : i32
    %c0_i32_2 = arith.constant 0 : i32
    return %c0_i32, %c0_i32_0, %c0_i32_1 : i32, i32, i32
  }
  func.func @transform_16(%arg0: i32) -> (i32, i32) {
    %c0_i32 = arith.constant 0 : i32
    %c0_i32_0 = arith.constant 0 : i32
    %c0_i32_1 = arith.constant 0 : i32
    return %c0_i32, %c0_i32_0 : i32, i32
  }
  func.func @transform_17(%arg0: i32) -> (i32, i32) {
    %c0_i32 = arith.constant 0 : i32
    %c0_i32_0 = arith.constant 0 : i32
    %c0_i32_1 = arith.constant 0 : i32
    return %c0_i32, %c0_i32_0 : i32, i32
  }
  func.func @transform_18(%arg0: i32) -> (i32, i32) {
    %c0_i32 = arith.constant 0 : i32
    %c0_i32_0 = arith.constant 0 : i32
    %c0_i32_1 = arith.constant 0 : i32
    return %c0_i32, %c0_i32_0 : i32, i32
  }
  func.func @transform_19(%arg0: i32) -> (i32, i32) {
    %c0_i32 = arith.constant 0 : i32
    %c0_i32_0 = arith.constant 0 : i32
    %c0_i32_1 = arith.constant 0 : i32
    return %c0_i32, %c0_i32_0 : i32, i32
  }
  func.func @transform_20(%arg0: i32) -> (i32, i32, i32) {
    %c0_i32 = arith.constant 0 : i32
    %c0_i32_0 = arith.constant 0 : i32
    %c0_i32_1 = arith.constant 0 : i32
    return %arg0, %c0_i32, %c0_i32_0 : i32, i32, i32
  }
}

</mosaic_0001>

<bundles_post_ra>
// kernel: forward.1
= control target key start
LH: loop header
LB: loop body
LE: loop exit
PB: predicated region body
PF: predicated region fallthrough
CT: control target
= control target key end

     0   :  { %s6762_s0 = inlined_call_operand.vmem [shape: f32[2,16,128], index: 0, kind: input, shape index: {}]   ;;  %s6763_s1 = inlined_call_operand.vmem [shape: f32[2,1,16], index: 1, kind: input, shape index: {}]   ;;  %s6764_s2 = inlined_call_operand.vmem [shape: f32[1,128], index: 2, kind: input, shape index: {}]   ;;  %s6765_s3 = inlined_call_operand.vmem [shape: f32[1,128], index: 3, kind: input, shape index: {}]   ;;  %s6766_s4 = inlined_call_operand.vmem [shape: bf16[2,128,384], index: 4, kind: input, shape index: {}]   ;;  %s6767_s5 = inlined_call_operand.vmem [shape: f32[2,1,384], index: 5, kind: input, shape index: {}]   ;;  %s6768_s6 = inlined_call_operand.vmem [shape: bf16[2,2,64,128], index: 6, kind: input, shape index: {}]   ;;  %s6769_s7 = inlined_call_operand.vmem [shape: f32[2,1,128], index: 7, kind: input, shape index: {}]   ;;  %s6770_s8 = inlined_call_operand.vmem [shape: f32[2,1,128], index: 8, kind: input, shape index: {}]   ;;  %s6771_s9 = inlined_call_operand.vmem [shape: f32[2,1,128], index: 9, kind: input, shape index: {}]   ;;  %s6772_s10 = inlined_call_operand.hbm [shape: bf16[2,128,512], index: 10, kind: input, shape index: {}]   ;;  %s6773_s11 = inlined_call_operand.vmem [shape: f32[2,1,512], index: 11, kind: input, shape index: {}]   ;;  %s6774_s12 = inlined_call_operand.hbm [shape: bf16[2,512,128], index: 12, kind: input, shape index: {}]   ;;  %s6775_s13 = inlined_call_operand.vmem [shape: f32[2,1,128], index: 13, kind: input, shape index: {}]   ;;  %s6776_s14 = inlined_call_operand.vmem [shape: f32[2,1,128], index: 14, kind: input, shape index: {}]   ;;  %s6777_s15 = inlined_call_operand.vmem [shape: f32[2,1,128], index: 15, kind: input, shape index: {}]   ;;  %s6778_s16 = inlined_call_operand.vmem [shape: bf16[128,128], index: 16, kind: input, shape index: {}]   ;;  %s6779_s17 = inlined_call_operand.vmem [shape: f32[1,128], index: 17, kind: input, shape index: {}]   ;;  %s6780_s18 = inlined_call_operand.vmem [shape: bf16[128,128], index: 18, kind: input, shape index: {}]   ;;  %s6781_s19 = inlined_call_operand.vmem [shape: f32[1,128], index: 19, kind: input, shape index: {}]   ;;  %s6782_s20 = inlined_call_operand.hbm [shape: f32[2,1,128], index: 20, kind: output, shape index: {}]  }
   0x1   :  { %6792 = sst [smem:[#allocation17_spill]] %s6762_s0 }
   0x2   :  { %6793 = sst [smem:[#allocation18_spill]] %s6763_s1 }
   0x3   :  { %6794 = sst [smem:[#allocation19_spill]] %s6764_s2 }
   0x4   :  { %6795 = sst [smem:[#allocation20_spill]] %s6765_s3 }
   0x5   :  { %6796 = sst [smem:[#allocation21_spill]] %s6766_s4 }
   0x6   :  { %6797 = sst [smem:[#allocation22_spill]] %s6772_s10 }
   0x7   :  { %6798 = sst [smem:[#allocation23_spill]] %s6774_s12 }
   0x8   :  { %25 = vsyncpa [#allocation3], 0 }
   0x9   :  { %26 = vsyncpa [#allocation6], 0 }
   0xa   :  { %27 = vsyncpa [#allocation4], 0 }
   0xb   :  { %29 = vsyncpa [#allocation4 + $0x1], 0  ;;  %s5559_s1 = smov 0   ;;  %s5561_s22 = smov 0  }
   0xc   :  { %s5563_s23 = smov 0   ;;  %s5565_s24 = smov 0  }
   0xd LB: > { %6799 = sst [smem:[#allocation11_spill]] %s5432_s1  ;;  %s5580_s2 = sadd.s32 4294967295, %s5444_s24   ;;  %s5444_s24 = sphi %s5565_s24, %s6819_s24   ;;  %s5440_s23 = sphi %s5563_s23, %s6821_s23   ;;  %s5436_s22 = sphi %s5561_s22, %s6823_s22   ;;  %s5432_s1 = sphi %s5559_s1, %s6822_s1  }
   0xe   : > { %6800 = sst [smem:[#allocation12_spill]] %s5440_s23  ;;  %s3985_s25 = sadd.s32 4294967294, %s5444_s24  }
   0xf   : > { %6801 = sst [smem:[#allocation13_spill]] %s5444_s24  ;;  %s5584_s3 = sadd.s32 1, %s5444_s24  }
  0x10   : > { %6802 = sst [smem:[#allocation14_spill]] %s5584_s3  ;;  %s472_s26 = sadd.s32 1, %s5440_s23 }
  0x11   : > { %s469_s27 = ssub.s32 %s5444_s24, %s5584_s3  ;;  %p482_p0 = scmp.ne.s32.totalorder %s5440_s23, %s5436_s22 }
  0x12   : > { %p470_p1 = scmp.eq.s32.totalorder %s469_s27, 0  ;;  %p483_p2 = scmp.eq.s32.totalorder %s5580_s2, 1 }
  0x13   : > { %p488_p3 = scmp.ne.s32.totalorder %s5436_s22, %s5432_s1  ;;  %p489_p4 = scmp.eq.s32.totalorder %s3985_s25, 1 }
  0x14   : > { %s5595_s28 = scalar_select %p470_p1, %s5440_s23, %s472_s26  }
  0x15   : > { %p5597_p5 = por %p483_p2, %p482_p0  ;;  %p5601_p6 = por %p489_p4, %p488_p3 }
  0x16   : > { %6803 = sst [smem:[#allocation15_spill]] %s5595_s28  ;;  %p3986_p7 = scmp.ge.s32.totalorder %s5444_s24, 1 }
  0x17   : > { %s6805_s29 = scalar_select %p5601_p6, 1, 0 }
  0x18   : > { %p496_p8 = scmp.lt.s32.totalorder %s5444_s24, 3  ;;  %p5135_p9 = scmp.eq.s32.totalorder %s5580_s2, 0 }
  0x19   : > { %6806 = sst [smem:[#allocation16_spill]] %s6805_s29  ;;  %s5446_s26 = smov [#allocation2]  }
  0x1a   : > { %p5608_p10 = pnand %p3986_p7, %p496_p8  ;;  %s6808_s10 = sld [smem:[#allocation22_spill]] }
  0x1b   : > { %s533_s27 = sshll.u32 %s5446_s26, 4  ;;  %s6809_s12 = sld [smem:[#allocation23_spill]]  ;;  %s534_s27 = int_to_ptr.vmem [resolvable:$true] %s533_s27 }
  0x1c   : > { %p5124_p11 = pneg %p5608_p10  ;;  %s5447_s29 = smov 256  }
  0x1d   : > { %s5448_s1 = smov 16   ;;  %s5449_s24 = smov [#allocation5]  }
  0x1e   : > { %p5125_p12 = pnand %p5135_p9, %p5124_p11  ;;  %s550_s0 = sshll.u32 %s5449_s24, 4  ;;  %s551_s0 = int_to_ptr.vmem [resolvable:$true] %s550_s0 }
  0x1f   : > { %s5450_s21 = smov 64   ;;  %601 = sbr.rel (%p5608_p10) target bundleno = 4612 (0x1204), region = 100 }
  0x20   : > { %s531_s25 = sshll.u32 %s6808_s10, 4  ;;  %s5451_s10 = smov 4   ;;  %s532_s25 = int_to_ptr.hbm [resolvable:$true] %s531_s25 }
  0x21   : > { %s548_s3 = sshll.u32 %s6809_s12, 4  ;;  %s549_s3 = int_to_ptr.hbm [resolvable:$true] %s548_s3 }
  0x22   : > { %5127 = dma.hbm_to_vmem [thread:$0]  (!%p5125_p12), %s532_s25, 8192, %s534_s27, [#allocation3], %s5447_s29, %s5447_s29, %s5448_s1  }
  0x23   : > { %5130 = dma.hbm_to_vmem [thread:$0]  (!%p5125_p12), %s549_s3, 8192, %s551_s0, [#allocation6], %s5450_s21, %s5450_s21, %s5451_s10  }
  0x24   : > { %5419 = dma.done.wait (%p5135_p9), [#allocation3], 8192  }
  0x25   : > { %5421 = vsyncadd (%p5135_p9), [#allocation3], 4294959104 }
  0x26   : > { %5423 = dma.done.wait (%p5135_p9), [#allocation6], 8192  }
  0x27   : > { %5425 = vsyncadd (%p5135_p9), [#allocation6], 4294959104  ;;  %p667_p13 = scmp.lt.s32.totalorder %s5580_s2, 1  ;;  %s6810_s3 = sld [smem:[#allocation17_spill]]  ;;  %v5452_v2 = vmov 128.0   ;;  %vm963_vm7 = vcmask 523264  }
  0x28   : > { %s6811_s25 = sld [smem:[#allocation18_spill]]  ;;  %5195 = vrcp.f32 %v5452_v2  ;;  %vm991_vm8 = vcmask 130048   ;;  %s6790_s24 = smov 64  }
  0x29   : > { %s668_s1 = scalar_select %p667_p13, %s5580_s2, 1 }
  0x2a   : > { %s6812_s21 = sld [smem:[#allocation21_spill]]  ;;  %s3895_s23 = scalar_lea.hbm %s6782_s20, %s5580_s2 }
  0x2b   : > { %s4905_s10 = sshll.u32 %s668_s1, 4 }
  0x2d   : > { %s671_s28 = scalar_lea.vmem %s6810_s3, %s4905_s10 }
  0x2e   : > { %s5640_s26 = scalar_lea.vmem %s6811_s25, %s668_s1  ;;  %v676_v0 = vld [vmem:[%s671_s28] sm:$0xff]  ;;  %v677_v1 = vld [vmem:[%s671_s28 + $0x8] sm:$0xff]  ;;  %v5196_v3 = vpop.eup %5195  ;;  %s6813_s25 = sld [smem:[#allocation19_spill]] }
  0x2f   : > { %681 = vadd.xlane.f32.xlu0 %v676_v0  ;;  %v686_v4 = vmul.f32 128.0, %v5196_v3  ;;  %vm690_vm0 = vweird.f32 %v5196_v3  ;;  %s6814_s1 = sld [smem:[#allocation20_spill]] }
  0x30   : > { %v4081_v17 = vld [vmem:[%s6812_s21 + $0xa8] sm:$0xf]  ;;  %v4928_v18 = vld [vmem:[%s6812_s21 + $0xb0] sm:$0xf0]  ;;  %v4927_v19 = vld [vmem:[%s6812_s21 + $0xac] sm:$0xf] }
  0x31   : > { %v687_v5 = vsub.f32 1.0, %v686_v4  ;;  %v4082_v20 = vor.u32 %v4928_v18, %v4081_v17  ;;  %v4083_v21 = vld [vmem:[%s6812_s21 + $0xb4] sm:$0xf0]  ;;  %v4089_v22 = vld [vmem:[%s6812_s21 + $0xb0] sm:$0xf] }
  0x32   : > { %v4929_v23 = vld [vmem:[%s6812_s21 + $0xb8] sm:$0xf0]  ;;  %v4086_v24 = vor.u32 %v4927_v19, %v4083_v21  ;;  %v4069_v26 = vld [vmem:[%s6812_s21 + $0x90] sm:$0xf]  ;;  %v4924_v28 = vld [vmem:[%s6812_s21 + $0x94] sm:$0xf] }
  0x33   : > { %v688_v6 = vmul.f32 %v5196_v3, %v687_v5  ;;  %v4090_v25 = vor.u32 %v4929_v23, %v4089_v22  ;;  %907 = vmatpush.bf16.msra.mxu0 %v4082_v20  ;;  %v4925_v27 = vld [vmem:[%s6812_s21 + $0x98] sm:$0xf0]  ;;  %v4071_v30 = vld [vmem:[%s6812_s21 + $0x9c] sm:$0xf0]  ;;  %v4077_v31 = vld [vmem:[%s6812_s21 + $0x98] sm:$0xf] }
  0x34   : > { %921 = vmatpush.bf16.msra.mxu1 %v4086_v24  ;;  %v4070_v29 = vor.u32 %v4925_v27, %v4069_v26  ;;  %v4926_v32 = vld [vmem:[%s6812_s21 + $0xa0] sm:$0xf0]  ;;  %v4074_v33 = vor.u32 %v4924_v28, %v4071_v30  ;;  %v4057_v35 = vld [vmem:[%s6812_s21 + $0x78] sm:$0xf]  ;;  %v4921_v37 = vld [vmem:[%s6812_s21 + $0x7c] sm:$0xf] }
  0x35   : > { %v689_v7 = vadd.f32 %v5196_v3, %v688_v6  ;;  %935 = vmatpush.bf16.msra.mxu2 %v4090_v25  ;;  %v4078_v34 = vor.u32 %v4926_v32, %v4077_v31  ;;  %v4922_v36 = vld [vmem:[%s6812_s21 + $0x80] sm:$0xf0]  ;;  %v4059_v39 = vld [vmem:[%s6812_s21 + $0x84] sm:$0xf0]  ;;  %v4065_v40 = vld [vmem:[%s6812_s21 + $0x80] sm:$0xf] }
  0x36   : > { %v4058_v38 = vor.u32 %v4922_v36, %v4057_v35  ;;  %v4923_v41 = vld [vmem:[%s6812_s21 + $0x88] sm:$0xf0]  ;;  %v4062_v42 = vor.u32 %v4921_v37, %v4059_v39  ;;  %v4045_v44 = vld [vmem:[%s6812_s21 + $0x60] sm:$0xf]  ;;  %v4918_v46 = vld [vmem:[%s6812_s21 + $0x64] sm:$0xf] }
  0x37   : > { %683 = vadd.xlane.f32.xlu0 %v677_v1  ;;  %v5642_v8 = vsel %vm690_vm0, %v5196_v3, %v689_v7  ;;  %908 = vmatpush.bf16.msra.mxu0 %v4070_v29  ;;  %v4066_v43 = vor.u32 %v4923_v41, %v4065_v40  ;;  %v4919_v45 = vld [vmem:[%s6812_s21 + $0x68] sm:$0xf0]  ;;  %v4047_v48 = vld [vmem:[%s6812_s21 + $0x6c] sm:$0xf0]  ;;  %v4053_v49 = vld [vmem:[%s6812_s21 + $0x68] sm:$0xf] }
  0x38   : > { %922 = vmatpush.bf16.msra.mxu1 %v4074_v33  ;;  %v4046_v47 = vor.u32 %v4919_v45, %v4045_v44  ;;  %v4920_v50 = vld [vmem:[%s6812_s21 + $0x70] sm:$0xf0]  ;;  %v4050_v51 = vor.u32 %v4918_v46, %v4047_v48  ;;  %v4033_v53 = vld [vmem:[%s6812_s21 + $0x48] sm:$0xf]  ;;  %v4915_v55 = vld [vmem:[%s6812_s21 + $0x4c] sm:$0xf] }
  0x39   : > { %936 = vmatpush.bf16.msra.mxu2 %v4078_v34  ;;  %v4054_v52 = vor.u32 %v4920_v50, %v4053_v49  ;;  %v4916_v54 = vld [vmem:[%s6812_s21 + $0x50] sm:$0xf0]  ;;  %v4035_v57 = vld [vmem:[%s6812_s21 + $0x54] sm:$0xf0]  ;;  %v4041_v58 = vld [vmem:[%s6812_s21 + $0x50] sm:$0xf] }
  0x3a   : > { %v4034_v56 = vor.u32 %v4916_v54, %v4033_v53  ;;  %v4917_v59 = vld [vmem:[%s6812_s21 + $0x58] sm:$0xf0]  ;;  %v4038_v60 = vor.u32 %v4915_v55, %v4035_v57  ;;  %v4021_v62 = vld [vmem:[%s6812_s21 + $0x30] sm:$0xf]  ;;  %v4023_v2 = vld [vmem:[%s6812_s21 + $0x3c] sm:$0xf0] }
  0x3b   : > { %909 = vmatpush.bf16.msra.mxu0 %v4058_v38  ;;  %v4042_v61 = vor.u32 %v4917_v59, %v4041_v58  ;;  %v4913_v63 = vld [vmem:[%s6812_s21 + $0x38] sm:$0xf0]  ;;  %v4029_v3 = vld [vmem:[%s6812_s21 + $0x38] sm:$0xf]  ;;  %v4914_v4 = vld [vmem:[%s6812_s21 + $0x40] sm:$0xf0] }
  0x3c   : > { %923 = vmatpush.bf16.msra.mxu1 %v4062_v42  ;;  %v4030_v6 = vor.u32 %v4914_v4, %v4029_v3  ;;  %v4009_v7 = vld [vmem:[%s6812_s21 + $0x18] sm:$0xf]  ;;  %v3997_v19 = vld [vmem:[%s6812_s21] sm:$0xf]  ;;  %v4907_v20 = vld [vmem:[%s6812_s21 + $0x8] sm:$0xf0] }
  0x3d   : > { %937 = vmatpush.bf16.msra.mxu2 %v4066_v43  ;;  %v4906_v21 = vld [vmem:[%s6812_s21 + $0x4] sm:$0xf]  ;;  %v3998_v23 = vor.u32 %v4907_v20, %v3997_v19  ;;  %v3999_v24 = vld [vmem:[%s6812_s21 + $0xc] sm:$0xf0]  ;;  %v4005_v25 = vld [vmem:[%s6812_s21 + $0x8] sm:$0xf] }
  0x3e   : > { %v4908_v26 = vld [vmem:[%s6812_s21 + $0x10] sm:$0xf0]  ;;  %v4002_v28 = vor.u32 %v4906_v21, %v3999_v24 }
  0x3f   : > { %910 = vmatpush.bf16.msra.mxu0 %v4046_v47  ;;  %v4006_v29 = vor.u32 %v4908_v26, %v4005_v25  ;;  %v5181_v47 = vld [vmem:[%s6813_s25] ss:$0 sm:$0xff] }
  0x40   : > { %924 = vmatpush.bf16.msra.mxu1 %v4050_v51  ;;  %v5823_v26 = vld [vmem:[%s5640_s26] ss:$0 sm:$0xff] }
  0x41   : > { %938 = vmatpush.bf16.msra.mxu2 %v4054_v52  ;;  %v5182_v52 = vld [vmem:[%s6814_s1] ss:$0 sm:$0xff]  ;;  %s6815_s1 = smov 64  }
  0x43   : > { %911 = vmatpush.bf16.msra.mxu0 %v4034_v56 }
  0x44   : > { %925 = vmatpush.bf16.msra.mxu1 %v4038_v60 }
  0x45   : > { %939 = vmatpush.bf16.msra.mxu2 %v4042_v61 }
  0x49   : > { %940 = vmatpush.bf16.msra.mxu2 %v4030_v6 }
  0xa2   : > { %v682_v9 = vpop.xlane.xlu0 %681 }
  0xa3   : > { %v692_v10 = vmul.f32 %v5642_v8, %v682_v9  ;;  %v4910_v9 = vld [vmem:[%s6812_s21 + $0x20] sm:$0xf0] }
  0xa5   : > { %v5645_v11 = vsub.f32 %v676_v0, %v692_v10  ;;  %v4912_v0 = vld [vmem:[%s6812_s21 + $0x34] sm:$0xf]  ;;  %v4909_v10 = vld [vmem:[%s6812_s21 + $0x1c] sm:$0xf] }
  0xa6   : > { %v4026_v5 = vor.u32 %v4912_v0, %v4023_v2 }
  0xa7   : > { %v696_v12 = vmul.f32 %v5645_v11, %v5645_v11 }
  0xa8   : > { %926 = vmatpush.bf16.msra.mxu1 %v4026_v5 }
  0xa9   : > { %698 = vadd.xlane.f32.xlu1 %v696_v12  ;;  %v4010_v12 = vor.u32 %v4910_v9, %v4009_v7 }
  0xaa   : > { %v684_v13 = vpop.xlane.xlu0 %683 }
  0xab   : > { %v693_v14 = vmul.f32 %v5642_v8, %v684_v13  ;;  %v4011_v13 = vld [vmem:[%s6812_s21 + $0x24] sm:$0xf0] }
  0xac   : > { %v4014_v17 = vor.u32 %v4909_v10, %v4011_v13 }
  0xad   : > { %v5650_v15 = vsub.f32 %v677_v1, %v693_v14  ;;  %v4022_v1 = vor.u32 %v4913_v63, %v4021_v62  ;;  %v4017_v14 = vld [vmem:[%s6812_s21 + $0x20] sm:$0xf] }
  0xae   : > { %927 = vmatpush.bf16.msra.mxu1 %v4014_v17 }
  0xaf   : > { %v697_v16 = vmul.f32 %v5650_v15, %v5650_v15  ;;  %912 = vmatpush.bf16.msra.mxu0 %v4022_v1 }
  0xb1   : > { %700 = vadd.xlane.f32.xlu1 %v697_v16  ;;  %v4911_v16 = vld [vmem:[%s6812_s21 + $0x28] sm:$0xf0] }
  0xb2   : > { %v4018_v18 = vor.u32 %v4911_v16, %v4017_v14  ;;  %928 = vmatpush.bf16.msra.mxu1 %v4002_v28 }
  0xb3   : > { %913 = vmatpush.bf16.msra.mxu0 %v4010_v12 }
  0xb4   : > { %941 = vmatpush.bf16.msra.mxu2 %v4018_v18 }
  0xb7   : > { %914 = vmatpush.bf16.msra.mxu0 %v3998_v23 }
  0xb8   : > { %942 = vmatpush.bf16.msra.mxu2 %v4006_v29 }
 0x11c   : > { %v699_v22 = vpop.xlane.xlu1 %698 }
 0x11d   : > { %v702_v27 = vmul.f32 %v699_v22, %v5642_v8 }
 0x11f   : > { %v704_v30 = vadd.f32 1e-12, %v702_v27 }
 0x121   : > { %5197 = vrsqrt.f32 %v704_v30  ;;  %vm712_vm2 = vweird.f32 %v704_v30 }
 0x124   : > { %v701_v31 = vpop.xlane.xlu1 %700 }
 0x125   : > { %v703_v32 = vmul.f32 %v701_v31, %v5642_v8 }
 0x127   : > { %v5198_v33 = vpop.eup %5197  ;;  %v705_v34 = vadd.f32 1e-12, %v703_v32 }
 0x128   : > { %v707_v35 = vmul.f32 %v5198_v33, %v704_v30  ;;  %vm713_vm1 = vweird.f32 %v5198_v33 }
 0x129   : > { %5199 = vrsqrt.f32 %v705_v34  ;;  %vm714_vm3 = vmor %vm712_vm2, %vm713_vm1  ;;  %vm722_vm5 = vweird.f32 %v705_v34 }
 0x12a   : > { %v708_v36 = vmul.f32 %v5198_v33, %v707_v35 }
 0x12c   : > { %v709_v37 = vmul.f32 0.5, %v708_v36 }
 0x12e   : > { %v710_v38 = vsub.f32 1.5, %v709_v37 }
 0x12f   : > { %v5200_v39 = vpop.eup %5199 }
 0x130   : > { %v711_v40 = vmul.f32 %v5198_v33, %v710_v38  ;;  %v717_v41 = vmul.f32 %v5200_v39, %v705_v34  ;;  %vm723_vm4 = vweird.f32 %v5200_v39 }
 0x131   : > { %vm724_vm6 = vmor %vm722_vm5, %vm723_vm4 }
 0x132   : > { %v718_v42 = vmul.f32 %v5200_v39, %v717_v41  ;;  %v715_v43 = vsel %vm714_vm3, %v5198_v33, %v711_v40 }
 0x133   : > { %v726_v46 = vmul.f32 %v715_v43, %v5645_v11 }
 0x134   : > { %v719_v44 = vmul.f32 0.5, %v718_v42 }
 0x135   : > { %v731_v51 = vmul.f32 %v5181_v47, %v726_v46 }
 0x136   : > { %v720_v45 = vsub.f32 1.5, %v719_v44 }
 0x137   : > { %v5808_v54 = vadd.f32 %v5182_v52, %v731_v51 }
 0x138   : > { %v721_v48 = vmul.f32 %v5200_v39, %v720_v45 }
 0x13a   : > { %v725_v49 = vsel %vm724_vm6, %v5200_v39, %v721_v48 }
 0x13b   : > { %v727_v50 = vmul.f32 %v725_v49, %v5650_v15  ;;  %v771_v15 = vld [vmem:[%s6767_s5] sm:$0x7] }
 0x13c   : > { %v773_v56 = vperm.slane %v771_v15, 0  ;;  %v774_v57 = vperm.slane %v771_v15, 1  ;;  %v775_v0 = vperm.slane %v771_v15, 2 }
 0x13d   : > { %v732_v53 = vmul.f32 %v5181_v47, %v727_v50  ;;  %v4933_v47 = vld [vmem:[%s6768_s6 + $0x18] sm:$0xff] }
 0x13f   : > { %v5810_v55 = vadd.f32 %v5182_v52, %v732_v53 }
 0x141   : > { %v738_v11 = vpack.c.bf16 %v5810_v55, %v5808_v54 }
 0x143   : > { %915 = vmatmul.bf16.vlgmr.msra.gmra.mxu0 %v738_v11  ;;  %929 = vmatmul.bf16.vlgmr.msra.gmra.mxu1 %v738_v11 }
 0x144   : > { %943 = vmatmul.bf16.vlgmr.msra.gmra.mxu2 %v738_v11 }
 0x1c0   : > { %v916_v58 = vpop.f32.mrf.mxu0  ;;  %v930_v59 = vpop.f32.mrf.mxu1 }
 0x1c1   : > { %v917_v60 = vadd.f32 %v916_v58, %v773_v56  ;;  %v931_v61 = vadd.f32 %v930_v59, %v774_v57 }
 0x1c3   : > { %v949_v62 = vpack.c.bf16 %v931_v61, %v917_v60 }
 0x1c5   : > { %v955_v6 = vrot.slane %v949_v62, 4  ;;  %v957_v24 = vunpack.c.l.b16 %v949_v62 }
 0x1c7   : > { %v944_v63 = vpop.f32.mrf.mxu2  ;;  %v960_v12 = vunpack.c.l.b16 %v955_v6 }
 0x1c8   : > { %v918_v1 = vpop.f32.mrf.mxu0  ;;  %v932_v2 = vpop.f32.mrf.mxu1  ;;  %v945_v7 = vadd.f32 %v944_v63, %v775_v0 }
 0x1c9   : > { %v919_v3 = vadd.f32 %v918_v1, %v773_v56  ;;  %v933_v4 = vadd.f32 %v932_v2, %v774_v57  ;;  %v4932_v2 = vld [vmem:[%s6768_s6 + $0x10] sm:$0xff] }
 0x1ca   : > { %v950_v14 = vpack.c.bf16 %v945_v7, %v945_v7 }
 0x1cb   : > { %v951_v5 = vpack.c.bf16 %v933_v4, %v919_v3  ;;  %v4931_v3 = vld [vmem:[%s6768_s6 + $0x8] sm:$0xff]  ;;  %v4930_v4 = vld [vmem:[%s6768_s6] sm:$0xff] }
 0x1cc   : > { %v1023_v20 = vunpack.c.l.b16 %v950_v14 }
 0x1cd   : > { %v956_v9 = vrot.slane %v951_v5, 4  ;;  %v958_v22 = vunpack.c.l.b16 %v951_v5 }
 0x1cf   : > { %v946_v10 = vpop.f32.mrf.mxu2  ;;  %v961_v13 = vunpack.c.l.b16 %v956_v9  ;;  %v959_v25 = vpack.c.b16 %v958_v22, %v957_v24 }
 0x1d0   : > { %v947_v16 = vadd.f32 %v946_v10, %v775_v0 }
 0x1d1   : > { %v962_v17 = vpack.c.b16 %v961_v13, %v960_v12 }
 0x1d2   : > { %v952_v18 = vpack.c.bf16 %v947_v16, %v947_v16 }
 0x1d3   : > { %v968_v19 = vsel %vm963_vm7, %v962_v17, 0 }
 0x1d4   : > { %v1024_v21 = vunpack.c.l.b16 %v952_v18  ;;  %977 = vmatpush.bf16.xpose.msrb.mxu2 %v968_v19 }
 0x1d6   : > { %v5818_v23 = vpack.c.b16 %v1024_v21, %v1023_v20 }
 0x1d8   : > { %1037 = vmatpush.bf16.msra.mxu3 %v5818_v23 }
 0x1db   : > { %4091 = vmatmul.msk.bf16.vlgmr.msrb.gmra.mxu2 %vm963_vm7, %v959_v25 }
 0x1dc   : > { %1219 = vmatpush.bf16.msra.mxu2 %v4933_v47 }
 0x1e0   : > { %1220 = vmatpush.bf16.msra.mxu2 %v4932_v2  ;;  %v4968_v2 = vld [vmem:[#allocation2 + $0xec] sm:$0xf0] }
 0x1e4   : > { %1221 = vmatpush.bf16.msra.mxu2 %v4931_v3  ;;  %v4966_v3 = vld [vmem:[#allocation2 + $0xe4] sm:$0xf] }
 0x1e8   : > { %1222 = vmatpush.bf16.msra.mxu2 %v4930_v4 }
 0x25e   : > { %v979_v27 = vpop.f32.mrf.mxu2 }
 0x25f   : > { %v984_v28 = vmul.f32 0.125, %v979_v27 }
 0x261   : > { %v989_v29 = vadd.f32 %v5823_v26, %v984_v28 }
 0x263   : > { %v992_v30 = vsel %vm991_vm8, %v989_v29, -inf }
 0x264   : > { %993 = vmax.xlane.f32.xlu2 %v992_v30 }
 0x266   : > { %v981_v31 = vpop.f32.mrf.mxu2 }
 0x267   : > { %v985_v32 = vmul.f32 0.125, %v981_v31 }
 0x269   : > { %v990_v33 = vadd.f32 %v5823_v26, %v985_v32 }
 0x26b   : > { %v995_v34 = vsel %vm991_vm8, %v990_v33, -inf }
 0x26c   : > { %996 = vmax.xlane.f32.xlu2 %v995_v34 }
 0x284   : > { %1053 = vrot.lane.b32.xlu2 %v949_v62, %s6790_s24 }
 0x2d7   : > { %v994_v35 = vpop.xlane.xlu2 %993 }
 0x2d8   : > { %v998_v36 = vsub.f32 %v989_v29, %v994_v35 }
 0x2da   : > { %v1000_v37 = vmul.f32 1.442695, %v998_v36 }
 0x2dc   : > { %5201 = vpow2.f32 %v1000_v37 }
 0x2df   : > { %v997_v38 = vpop.xlane.xlu2 %996 }
 0x2e0   : > { %v999_v39 = vsub.f32 %v990_v33, %v997_v38 }
 0x2e2   : > { %v5202_v40 = vpop.eup %5201  ;;  %v1002_v41 = vmul.f32 1.442695, %v999_v39 }
 0x2e3   : > { %v1004_v42 = vsel %vm991_vm8, %v5202_v40, 0.0 }
 0x2e4   : > { %5203 = vpow2.f32 %v1002_v41  ;;  %1005 = vadd.xlane.f32.xlu0 %v1004_v42  ;;  %v4936_v42 = vld [vmem:[%s6768_s6 + $0x30] sm:$0xff] }
 0x2e7   : > { %v1054_v51 = vpop.permute.xlu2 %1053 }
 0x2e8   : > { %v1057_v11 = vrot.slane %v1054_v51, 4 }
 0x2ea   : > { %v5204_v43 = vpop.eup %5203  ;;  %v1061_v60 = vunpack.c.l.b16 %v1057_v11 }
 0x2eb   : > { %v1007_v44 = vsel %vm991_vm8, %v5204_v43, 0.0 }
 0x2ec   : > { %1008 = vadd.xlane.f32.xlu1 %v1007_v44  ;;  %v4934_v44 = vld [vmem:[%s6768_s6 + $0x20] sm:$0xff] }
 0x2f8   : > { %1055 = vrot.lane.b32.xlu0 %v951_v5, %s6790_s24 }
 0x305   : > { %1059 = vrot.lane.b32.xlu1 %v959_v25, %s6790_s24 }
 0x357   : > { %v1006_v45 = vpop.xlane.xlu0 %1005 }
 0x358   : > { %5205 = vrcp.f32 %v1006_v45 }
 0x35e   : > { %v5206_v48 = vpop.eup %5205 }
 0x35f   : > { %v1009_v46 = vpop.xlane.xlu1 %1008  ;;  %v1012_v49 = vmul.f32 %v5206_v48, %v5202_v40 }
 0x360   : > { %5207 = vrcp.f32 %v1009_v46 }
 0x361   : > { %v1014_v53 = vpack.c.bf16 %v1012_v49, %v1012_v49  ;;  %v5183_v49 = vld [vmem:[%s6769_s7] ss:$0 sm:$0xff] }
 0x363   : > { %v1018_v58 = vunpack.c.l.b16 %v1014_v53 }
 0x366   : > { %v5208_v50 = vpop.eup %5207 }
 0x367   : > { %v1013_v52 = vmul.f32 %v5208_v50, %v5204_v43  ;;  %v4935_v43 = vld [vmem:[%s6768_s6 + $0x28] sm:$0xff] }
 0x369   : > { %v1015_v15 = vpack.c.bf16 %v1013_v52, %v1013_v52 }
 0x36a   : > { %v1056_v56 = vpop.permute.xlu0 %1055 }
 0x36b   : > { %v1058_v57 = vrot.slane %v1056_v56, 4  ;;  %v1019_v59 = vunpack.c.l.b16 %v1015_v15 }
 0x36d   : > { %v1062_v61 = vunpack.c.l.b16 %v1058_v57  ;;  %v1020_v62 = vpack.c.b16 %v1019_v59, %v1018_v58 }
 0x36f   : > { %4092 = vmatmul.msk.bf16.vlgmr.msra.gmra.mxu3 %vm991_vm8, %v1020_v62  ;;  %v1063_v63 = vpack.c.b16 %v1062_v61, %v1061_v60 }
 0x371   : > { %v1068_v0 = vsel %vm963_vm7, %v1063_v63, 0 }
 0x372   : > { %1077 = vmatpush.bf16.xpose.msrb.mxu3 %v1068_v0 }
 0x377   : > { %v1060_v1 = vpop.permute.xlu1 %1059 }
 0x37f   : > { %4093 = vmatmul.msk.bf16.vlgmr.msrb.gmra.mxu3 %vm963_vm7, %v1060_v1 }
 0x3f2   : > { %v1039_v5 = vpop.f32.mrf.mxu3 }
 0x3fa   : > { %v1041_v6 = vpop.f32.mrf.mxu3 }
 0x3fb   : > { %v1044_v7 = vpack.c.bf16 %v1041_v6, %v1039_v5  ;;  %v4253_v5 = vld [vmem:[#allocation2 + $0xf0] sm:$0xf0]  ;;  %v4259_v6 = vld [vmem:[#allocation2 + $0xe8] sm:$0xf] }
 0x3fd   : > { %4136 = vmatmul.msk.bf16.vlgmr.msra.gmra.mxu2 %vm963_vm7, %v1044_v7  ;;  %v4969_v7 = vld [vmem:[#allocation2 + $0xf4] sm:$0xf0] }
 0x402   : > { %v1079_v9 = vpop.f32.mrf.mxu3 }
 0x403   : > { %v1084_v10 = vmul.f32 0.125, %v1079_v9  ;;  %v4256_v9 = vor.u32 %v4966_v3, %v4253_v5  ;;  %v4179_v5 = vld [vmem:[#allocation2 + $0x48] sm:$0xf] }
 0x405   : > { %v1086_v12 = vadd.f32 %v5823_v26, %v1084_v10  ;;  %v4260_v10 = vor.u32 %v4969_v7, %v4259_v6  ;;  %1506 = vmatpush.bf16.msrb.mxu0 %v4256_v9  ;;  %v4949_v6 = vld [vmem:[#allocation2 + $0x54] sm:$0xf0] }
 0x406   : > { %v4180_v9 = vor.u32 %v4949_v6, %v4179_v5 }
 0x407   : > { %v1088_v13 = vsel %vm991_vm8, %v1086_v12, -inf }
 0x408   : > { %1089 = vmax.xlane.f32.xlu2 %v1088_v13  ;;  %v4261_v13 = vld [vmem:[#allocation2 + $0xf8] sm:$0xf0] }
 0x40a   : > { %v1081_v14 = vpop.f32.mrf.mxu3 }
 0x40b   : > { %v1085_v16 = vmul.f32 0.125, %v1081_v14 }
 0x40d   : > { %v1087_v17 = vadd.f32 %v5823_v26, %v1085_v16  ;;  %v4235_v16 = vld [vmem:[#allocation2 + $0xc0] sm:$0xf] }
 0x40f   : > { %v1091_v18 = vsel %vm991_vm8, %v1087_v17, -inf }
 0x410   : > { %1092 = vmax.xlane.f32.xlu0 %v1091_v18  ;;  %v4962_v18 = vld [vmem:[#allocation2 + $0xc4] sm:$0xf] }
 0x424   : > { %1117 = vrot.lane.b32.xlu0 %v5818_v23, %s6790_s24  ;;  %v4937_v23 = vld [vmem:[%s6768_s6 + $0x38] sm:$0xff]  ;;  %s3899_s24 = sshll.u32 %s3895_s23, 4  ;;  %s3900_s24 = int_to_ptr.hbm [resolvable:$true] %s3899_s24 }
 0x425   : > { %s5388_s25 = sshra.s32 %s3900_s24, 4  ;;  %s5389_s25 = int_to_ptr.hbm [resolvable:$true] %s5388_s25 }
 0x426   : > { %s5390_s27 = scalar_lea.hbm %s5389_s25, 1  ;;  %p5395_p3 = scmp.lt.s32.totalorder %s5389_s25, %s6782_s20 }
 0x427   : > { %p5391_p0 = scmp.ne.s32.totalorder %s5389_s25, %s5390_s27 }
 0x429   : > { %p5392_p1 = pnand %p5391_p0, %p5597_p5 }
 0x42b   : > { %p5393_p2 = pneg %p5392_p1 }
 0x47b   : > { %v1090_v19 = vpop.xlane.xlu2 %1089 }
 0x47c   : > { %v1094_v20 = vsub.f32 %v1086_v12, %v1090_v19  ;;  %v4967_v12 = vld [vmem:[#allocation2 + $0xec] sm:$0xf] }
 0x47d   : > { %v4264_v14 = vor.u32 %v4967_v12, %v4261_v13  ;;  %v4181_v12 = vld [vmem:[#allocation2 + $0x58] sm:$0xf0] }
 0x47e   : > { %v1096_v21 = vmul.f32 1.442695, %v1094_v20  ;;  %v4237_v20 = vld [vmem:[#allocation2 + $0xd0] sm:$0xf0] }
 0x47f   : > { %1534 = vmatpush.bf16.msrb.mxu2 %v4264_v14  ;;  %v4155_v14 = vld [vmem:[#allocation2 + $0x20] sm:$0xf] }
 0x480   : > { %5209 = vpow2.f32 %v1096_v21  ;;  %v1224_v48 = vpop.f32.mrf.mxu2  ;;  %v4243_v21 = vld [vmem:[#allocation2 + $0xc8] sm:$0xf] }
 0x483   : > { %v1093_v22 = vpop.xlane.xlu0 %1092 }
 0x484   : > { %v1095_v24 = vsub.f32 %v1087_v17, %v1093_v22  ;;  %v4964_v17 = vld [vmem:[#allocation2 + $0xcc] sm:$0xf0]  ;;  %v4965_v22 = vld [vmem:[#allocation2 + $0xd4] sm:$0xf0] }
 0x485   : > { %v4236_v19 = vor.u32 %v4964_v17, %v4235_v16  ;;  %v4944_v16 = vld [vmem:[#allocation2 + $0x2c] sm:$0xf0]  ;;  %v4942_v17 = vld [vmem:[#allocation2 + $0x24] sm:$0xf] }
 0x486   : > { %v5210_v25 = vpop.eup %5209  ;;  %v1098_v27 = vmul.f32 1.442695, %v1095_v24  ;;  %v4240_v24 = vor.u32 %v4962_v18, %v4237_v20  ;;  %v4156_v18 = vor.u32 %v4944_v16, %v4155_v14  ;;  %v4163_v20 = vld [vmem:[#allocation2 + $0x28] sm:$0xf] }
 0x487   : > { %v1100_v28 = vsel %vm991_vm8, %v5210_v25, 0.0 }
 0x488   : > { %5211 = vpow2.f32 %v1098_v27  ;;  %1101 = vadd.xlane.f32.xlu1 %v1100_v28  ;;  %v1226_v11 = vpop.f32.mrf.mxu2  ;;  %v4963_v27 = vld [vmem:[#allocation2 + $0xcc] sm:$0xf]  ;;  %v4245_v28 = vld [vmem:[#allocation2 + $0xd8] sm:$0xf0]  ;;  %1507 = vmatpush.bf16.msrb.mxu0 %v4240_v24 }
 0x48e   : > { %v5212_v29 = vpop.eup %5211 }
 0x48f   : > { %v1103_v26 = vsel %vm991_vm8, %v5212_v29, 0.0 }
 0x490   : > { %1104 = vadd.xlane.f32.xlu2 %v1103_v26  ;;  %v4219_v26 = vld [vmem:[#allocation2 + $0xa0] sm:$0xf] }
 0x496   : > { %v1118_v30 = vpop.permute.xlu0 %1117 }
 0x497   : > { %1130 = vmatpush.bf16.msrb.mxu1 %v1118_v30  ;;  %v4960_v30 = vld [vmem:[#allocation2 + $0xac] sm:$0xf0] }
 0x49b   : > { %1178 = vmatpush.bf16.msra.mxu1 %v4937_v23  ;;  %v4958_v23 = vld [vmem:[#allocation2 + $0xa4] sm:$0xf] }
 0x49f   : > { %1179 = vmatpush.bf16.msra.mxu1 %v4936_v42  ;;  %v4954_v42 = vld [vmem:[#allocation2 + $0x84] sm:$0xf] }
 0x4a3   : > { %1180 = vmatpush.bf16.msra.mxu1 %v4935_v43 }
 0x4a7   : > { %1181 = vmatpush.bf16.msra.mxu1 %v4934_v44  ;;  %v4205_v44 = vld [vmem:[#allocation2 + $0x90] sm:$0xf0] }
 0x4fb   : > { %v1102_v31 = vpop.xlane.xlu1 %1101 }
 0x4fc   : > { %5213 = vrcp.f32 %v1102_v31  ;;  %v4220_v31 = vor.u32 %v4960_v30, %v4219_v26 }
 0x502   : > { %v5214_v33 = vpop.eup %5213 }
 0x503   : > { %v1105_v32 = vpop.xlane.xlu2 %1104  ;;  %v1108_v34 = vmul.f32 %v5214_v33, %v5210_v25  ;;  %v4244_v25 = vor.u32 %v4965_v22, %v4243_v21  ;;  %v4227_v33 = vld [vmem:[#allocation2 + $0xa8] sm:$0xf]  ;;  %v4945_v21 = vld [vmem:[#allocation2 + $0x34] sm:$0xf0] }
 0x504   : > { %5215 = vrcp.f32 %v1105_v32  ;;  %v4221_v32 = vld [vmem:[#allocation2 + $0xb0] sm:$0xf0] }
 0x505   : > { %v1110_v36 = vpack.c.bf16 %v1108_v34, %v1108_v34  ;;  %v4961_v34 = vld [vmem:[#allocation2 + $0xb4] sm:$0xf0] }
 0x507   : > { %v1114_v39 = vunpack.c.l.b16 %v1110_v36  ;;  %v4228_v36 = vor.u32 %v4961_v34, %v4227_v33 }
 0x50a   : > { %v5216_v35 = vpop.eup %5215 }
 0x50b   : > { %v1109_v37 = vmul.f32 %v5216_v35, %v5212_v29  ;;  %v4248_v29 = vor.u32 %v4963_v27, %v4245_v28  ;;  %v4224_v35 = vor.u32 %v4958_v23, %v4221_v32  ;;  %v4943_v27 = vld [vmem:[#allocation2 + $0x2c] sm:$0xf]  ;;  %v4165_v28 = vld [vmem:[#allocation2 + $0x38] sm:$0xf0]  ;;  %v4940_v23 = vld [vmem:[#allocation2 + $0xc] sm:$0xf0] }
 0x50c   : > { %v4168_v30 = vor.u32 %v4943_v27, %v4165_v28  ;;  %v4141_v32 = vld [vmem:[#allocation2 + $0x10] sm:$0xf0] }
 0x50d   : > { %v1111_v38 = vpack.c.bf16 %v1109_v37, %v1109_v37  ;;  %1535 = vmatpush.bf16.msrb.mxu2 %v4248_v29  ;;  %v4959_v37 = vld [vmem:[#allocation2 + $0xac] sm:$0xf]  ;;  %1508 = vmatpush.bf16.msrb.mxu0 %v4224_v35  ;;  %v4139_v29 = vld [vmem:[#allocation2] sm:$0xf]  ;;  %v4147_v35 = vld [vmem:[#allocation2 + $0x8] sm:$0xf] }
 0x50e   : > { %v4140_v33 = vor.u32 %v4940_v23, %v4139_v29 }
 0x50f   : > { %v1115_v40 = vunpack.c.l.b16 %v1111_v38  ;;  %v4229_v38 = vld [vmem:[#allocation2 + $0xb8] sm:$0xf0] }
 0x511   : > { %v1116_v41 = vpack.c.b16 %v1115_v40, %v1114_v39  ;;  %v4232_v39 = vor.u32 %v4959_v37, %v4229_v38  ;;  %v4203_v40 = vld [vmem:[#allocation2 + $0x80] sm:$0xf]  ;;  %v4939_v37 = vld [vmem:[#allocation2 + $0xc] sm:$0xf] }
 0x513   : > { %4094 = vmatmul.msk.bf16.vlgmr.msrb.gmra.mxu1 %vm991_vm8, %v1116_v41  ;;  %v4956_v41 = vld [vmem:[#allocation2 + $0x8c] sm:$0xf0]  ;;  %1536 = vmatpush.bf16.msrb.mxu2 %v4232_v39 }
 0x514   : > { %1520 = vmatpush.bf16.msrb.mxu1 %v4260_v10  ;;  %v4204_v43 = vor.u32 %v4956_v41, %v4203_v40  ;;  %v4947_v10 = vld [vmem:[#allocation2 + $0x4c] sm:$0xf]  ;;  %v4149_v40 = vld [vmem:[#allocation2 + $0x18] sm:$0xf0] }
 0x515   : > { %v4184_v13 = vor.u32 %v4947_v10, %v4181_v12  ;;  %v4152_v41 = vor.u32 %v4939_v37, %v4149_v40 }
 0x518   : > { %1521 = vmatpush.bf16.msrb.mxu1 %v4244_v25  ;;  %v4164_v25 = vor.u32 %v4945_v21, %v4163_v20 }
 0x51c   : > { %1522 = vmatpush.bf16.msrb.mxu1 %v4228_v36  ;;  %v4941_v36 = vld [vmem:[#allocation2 + $0x14] sm:$0xf0] }
 0x51d   : > { %v4148_v39 = vor.u32 %v4941_v36, %v4147_v35 }
 0x590   : > { %v1132_v45 = vpop.f32.mrf.mxu1 }
 0x598   : > { %v1134_v46 = vpop.f32.mrf.mxu1 }
 0x599   : > { %v1137_v47 = vpack.c.bf16 %v1134_v46, %v1132_v45  ;;  %v4211_v45 = vld [vmem:[#allocation2 + $0x88] sm:$0xf]  ;;  %v4957_v46 = vld [vmem:[#allocation2 + $0x94] sm:$0xf0] }
 0x59b   : > { %4119 = vmatmul.msk.bf16.vlgmr.msra.gmra.mxu1 %vm963_vm7, %v1137_v47  ;;  %v4208_v47 = vor.u32 %v4954_v42, %v4205_v44 }
 0x59d   : > { %1509 = vmatpush.bf16.msrb.mxu0 %v4208_v47 }
 0x618   : > { %v1183_v50 = vpop.f32.mrf.mxu1 }
 0x619   : > { %v1225_v51 = vadd.f32 %v1224_v48, %v1183_v50  ;;  %v4212_v48 = vor.u32 %v4957_v46, %v4211_v45  ;;  %v4213_v50 = vld [vmem:[#allocation2 + $0x98] sm:$0xf0] }
 0x61b   : > { %v1233_v52 = vadd.f32 %v5183_v49, %v1225_v51  ;;  %1523 = vmatpush.bf16.msrb.mxu1 %v4212_v48 }
 0x61d   : > { %v1235_v53 = vadd.f32 %v1233_v52, %v5808_v54  ;;  %v4187_v52 = vld [vmem:[#allocation2 + $0x60] sm:$0xf] }
 0x61f   : > { %1239 = vadd.xlane.f32.xlu2 %v1235_v53 }
 0x620   : > { %v1185_v15 = vpop.f32.mrf.mxu1 }
 0x621   : > { %v1227_v56 = vadd.f32 %v1226_v11, %v1185_v15  ;;  %v4950_v11 = vld [vmem:[#allocation2 + $0x64] sm:$0xf] }
 0x623   : > { %v1234_v57 = vadd.f32 %v5183_v49, %v1227_v56  ;;  %v4955_v49 = vld [vmem:[#allocation2 + $0x8c] sm:$0xf]  ;;  %v4189_v56 = vld [vmem:[#allocation2 + $0x70] sm:$0xf0] }
 0x624   : > { %v4216_v51 = vor.u32 %v4955_v49, %v4213_v50 }
 0x625   : > { %v1236_v58 = vadd.f32 %v1234_v57, %v5810_v55  ;;  %v4251_v55 = vld [vmem:[#allocation2 + $0xe0] sm:$0xf]  ;;  %v4195_v57 = vld [vmem:[#allocation2 + $0x68] sm:$0xf] }
 0x626   : > { %v4252_v4 = vor.u32 %v4968_v2, %v4251_v55  ;;  %1537 = vmatpush.bf16.msrb.mxu2 %v4216_v51  ;;  %v4948_v55 = vld [vmem:[#allocation2 + $0x4c] sm:$0xf0]  ;;  %v4946_v2 = vld [vmem:[#allocation2 + $0x44] sm:$0xf] }
 0x627   : > { %1241 = vadd.xlane.f32.xlu1 %v1236_v58 }
 0x628   : > { %1492 = vmatpush.bf16.msra.mxu3 %v4252_v4  ;;  %v4173_v4 = vld [vmem:[#allocation2 + $0x50] sm:$0xf0] }
 0x629   : > { %v4176_v7 = vor.u32 %v4946_v2, %v4173_v4 }
 0x62c   : > { %1493 = vmatpush.bf16.msra.mxu3 %v4236_v19  ;;  %v4157_v19 = vld [vmem:[#allocation2 + $0x30] sm:$0xf0] }
 0x62d   : > { %v4160_v24 = vor.u32 %v4942_v17, %v4157_v19 }
 0x630   : > { %1494 = vmatpush.bf16.msra.mxu3 %v4220_v31  ;;  %v4938_v31 = vld [vmem:[#allocation2 + $0x4] sm:$0xf] }
 0x631   : > { %v4144_v34 = vor.u32 %v4938_v31, %v4141_v32 }
 0x634   : > { %1495 = vmatpush.bf16.msra.mxu3 %v4204_v43 }
 0x692   : > { %v1240_v59 = vpop.xlane.xlu2 %1239 }
 0x693   : > { %v1243_v60 = vmul.f32 %v1240_v59, %v5642_v8  ;;  %v4192_v59 = vor.u32 %v4950_v11, %v4189_v56 }
 0x695   : > { %v5878_v61 = vsub.f32 %v1235_v53, %v1243_v60  ;;  %v4952_v53 = vld [vmem:[#allocation2 + $0x6c] sm:$0xf0]  ;;  %1510 = vmatpush.bf16.msrb.mxu0 %v4192_v59 }
 0x696   : > { %v4188_v15 = vor.u32 %v4952_v53, %v4187_v52 }
 0x697   : > { %v1247_v62 = vmul.f32 %v5878_v61, %v5878_v61 }
 0x698   : > { %1496 = vmatpush.bf16.msra.mxu3 %v4188_v15 }
 0x699   : > { %1249 = vadd.xlane.f32.xlu2 %v1247_v62  ;;  %v4951_v62 = vld [vmem:[#allocation2 + $0x6c] sm:$0xf]  ;;  %1511 = vmatpush.bf16.msrb.mxu0 %v4176_v7 }
 0x69a   : > { %v1242_v63 = vpop.xlane.xlu1 %1241 }
 0x69b   : > { %v1244_v54 = vmul.f32 %v1242_v63, %v5642_v8  ;;  %v4197_v63 = vld [vmem:[#allocation2 + $0x78] sm:$0xf0] }
 0x69d   : > { %v5883_v0 = vsub.f32 %v1236_v58, %v1244_v54  ;;  %v4953_v58 = vld [vmem:[#allocation2 + $0x74] sm:$0xf0]  ;;  %v4200_v54 = vor.u32 %v4951_v62, %v4197_v63  ;;  %1512 = vmatpush.bf16.msrb.mxu0 %v4160_v24 }
 0x69e   : > { %v4196_v60 = vor.u32 %v4953_v58, %v4195_v57  ;;  %v5184_v58 = vld [vmem:[%s6770_s8] ss:$0 sm:$0xff] }
 0x69f   : > { %v1248_v1 = vmul.f32 %v5883_v0, %v5883_v0  ;;  %1538 = vmatpush.bf16.msrb.mxu2 %v4200_v54  ;;  %v5185_v54 = vld [vmem:[%s6771_s9] ss:$0 sm:$0xff] }
 0x6a0   : > { %1524 = vmatpush.bf16.msrb.mxu1 %v4196_v60 }
 0x6a1   : > { %1251 = vadd.xlane.f32.xlu1 %v1248_v1  ;;  %v4171_v1 = vld [vmem:[#allocation2 + $0x40] sm:$0xf]  ;;  %1513 = vmatpush.bf16.msrb.mxu0 %v4144_v34 }
 0x6a2   : > { %v4172_v3 = vor.u32 %v4948_v55, %v4171_v1 }
 0x6a3   : > { %1539 = vmatpush.bf16.msrb.mxu2 %v4184_v13 }
 0x6a4   : > { %1497 = vmatpush.bf16.msra.mxu3 %v4172_v3  ;;  %1525 = vmatpush.bf16.msrb.mxu1 %v4180_v9 }
 0x6a7   : > { %1540 = vmatpush.bf16.msrb.mxu2 %v4168_v30 }
 0x6a8   : > { %1498 = vmatpush.bf16.msra.mxu3 %v4156_v18  ;;  %1526 = vmatpush.bf16.msrb.mxu1 %v4164_v25 }
 0x6ab   : > { %1541 = vmatpush.bf16.msrb.mxu2 %v4152_v41 }
 0x6ac   : > { %1499 = vmatpush.bf16.msra.mxu3 %v4140_v33  ;;  %1527 = vmatpush.bf16.msrb.mxu1 %v4148_v39 }
 0x70c   : > { %v1250_v22 = vpop.xlane.xlu2 %1249 }
 0x70d   : > { %v1253_v26 = vmul.f32 %v1250_v22, %v5642_v8 }
 0x70f   : > { %v1255_v38 = vadd.f32 1e-12, %v1253_v26 }
 0x711   : > { %5217 = vrsqrt.f32 %v1255_v38  ;;  %vm1263_vm10 = vweird.f32 %v1255_v38 }
 0x714   : > { %v1252_v42 = vpop.xlane.xlu1 %1251 }
 0x715   : > { %v1254_v43 = vmul.f32 %v1252_v42, %v5642_v8 }
 0x717   : > { %v5218_v44 = vpop.eup %5217  ;;  %v1256_v45 = vadd.f32 1e-12, %v1254_v43 }
 0x718   : > { %v1258_v46 = vmul.f32 %v5218_v44, %v1255_v38  ;;  %vm1264_vm9 = vweird.f32 %v5218_v44 }
 0x719   : > { %5219 = vrsqrt.f32 %v1256_v45  ;;  %vm1265_vm11 = vmor %vm1263_vm10, %vm1264_vm9  ;;  %vm1273_vm13 = vweird.f32 %v1256_v45 }
 0x71a   : > { %v1259_v47 = vmul.f32 %v5218_v44, %v1258_v46 }
 0x71c   : > { %v1260_v48 = vmul.f32 0.5, %v1259_v47 }
 0x71e   : > { %v1261_v49 = vsub.f32 1.5, %v1260_v48 }
 0x71f   : > { %v5220_v50 = vpop.eup %5219 }
 0x720   : > { %v1262_v51 = vmul.f32 %v5218_v44, %v1261_v49  ;;  %v1268_v52 = vmul.f32 %v5220_v50, %v1256_v45  ;;  %vm1274_vm12 = vweird.f32 %v5220_v50 }
 0x721   : > { %vm1275_vm14 = vmor %vm1273_vm13, %vm1274_vm12 }
 0x722   : > { %v1269_v53 = vmul.f32 %v5220_v50, %v1268_v52  ;;  %v1266_v11 = vsel %vm1265_vm11, %v5218_v44, %v1262_v51 }
 0x723   : > { %v1277_v57 = vmul.f32 %v1266_v11, %v5878_v61 }
 0x724   : > { %v1270_v15 = vmul.f32 0.5, %v1269_v53 }
 0x725   : > { %v1282_v63 = vmul.f32 %v5184_v58, %v1277_v57 }
 0x726   : > { %v1271_v56 = vsub.f32 1.5, %v1270_v15 }
 0x727   : > { %v5897_v55 = vadd.f32 %v5185_v54, %v1282_v63 }
 0x728   : > { %v1272_v59 = vmul.f32 %v5220_v50, %v1271_v56 }
 0x72a   : > { %v1276_v60 = vsel %vm1275_vm14, %v5220_v50, %v1272_v59 }
 0x72b   : > { %v1278_v62 = vmul.f32 %v1276_v60, %v5883_v0  ;;  %v5906_v0 = vld [vmem:[%s6773_s11] sm:$0xf] }
 0x72c   : > { %v1325_v3 = vperm.slane %v5906_v0, 1  ;;  %v1326_v4 = vperm.slane %v5906_v0, 2  ;;  %v1324_v12 = vperm.slane %v5906_v0, 0  ;;  %v1327_v14 = vperm.slane %v5906_v0, 3 }
 0x72d   : > { %v1283_v1 = vmul.f32 %v5184_v58, %v1278_v62 }
 0x72f   : > { %v5899_v2 = vadd.f32 %v5185_v54, %v1283_v1 }
 0x731   : > { %v1289_v61 = vpack.c.bf16 %v5899_v2, %v5897_v55 }
 0x733   : > { %1500 = vmatmul.bf16.vlgmr.msra.gmra.mxu3 %v1289_v61  ;;  %1514 = vmatmul.bf16.vlgmr.msrb.gmra.mxu0 %v1289_v61 }
 0x734   : > { %1528 = vmatmul.bf16.vlgmr.msrb.gmra.mxu1 %v1289_v61  ;;  %1542 = vmatmul.bf16.vlgmr.msrb.gmra.mxu2 %v1289_v61 }
 0x7b0   : > { %v1515_v5 = vpop.f32.mrf.mxu0 }
 0x7b1   : > { %v5910_v6 = vadd.f32 %v1515_v5, %v1325_v3  ;;  %v1529_v7 = vpop.f32.mrf.mxu1 }
 0x7b2   : > { %v5912_v9 = vadd.f32 %v1529_v7, %v1326_v4 }
 0x7b3   : > { %v5915_v10 = vmul.f32 0.70710677, %v5910_v6 }
 0x7b4   : > { %v5919_v13 = vmul.f32 0.70710677, %v5912_v9 }
 0x7b5   : > { %v5923_v16 = vand.u32 2147483647, %v5915_v10 }
 0x7b6   : > { %v5926_v17 = vand.u32 2147483647, %v5919_v13  ;;  %v1501_v18 = vpop.f32.mrf.mxu3 }
 0x7b7   : > { %v1573_v19 = vmul.f32 0.3275911, %v5923_v16  ;;  %v5931_v20 = vadd.f32 %v1501_v18, %v1324_v12  ;;  %v1543_v21 = vpop.f32.mrf.mxu2 }
 0x7b8   : > { %v1574_v22 = vmul.f32 0.3275911, %v5926_v17  ;;  %v5936_v24 = vadd.f32 %v1543_v21, %v1327_v14  ;;  %v1517_v36 = vpop.f32.mrf.mxu0 }
 0x7b9   : > { %v1581_v25 = vadd.f32 1.0, %v1573_v19  ;;  %v5939_v28 = vmul.f32 0.70710677, %v5931_v20  ;;  %v1531_v39 = vpop.f32.mrf.mxu1  ;;  %v5958_v44 = vadd.f32 %v1517_v36, %v1325_v3 }
 0x7ba   : > { %v1582_v27 = vadd.f32 1.0, %v1574_v22  ;;  %v5942_v29 = vmul.f32 0.70710677, %v5936_v24  ;;  %v5960_v47 = vadd.f32 %v1531_v39, %v1326_v4 }
 0x7bb   : > { %5221 = vrcp.f32 %v1581_v25  ;;  %v5945_v26 = vand.u32 2147483647, %v5939_v28  ;;  %v1612_v41 = vand.u32 2147483647, %v1581_v25  ;;  %v1614_v42 = vand.u32 2147483648, %v1581_v25 }
 0x7bc   : > { %5223 = vrcp.f32 %v1582_v27  ;;  %v5948_v30 = vand.u32 2147483647, %v5942_v29  ;;  %v1629_v46 = vand.u32 2147483648, %v1582_v27  ;;  %v1627_v49 = vand.u32 2147483647, %v1582_v27 }
 0x7bd   : > { %v1572_v23 = vmul.f32 0.3275911, %v5945_v26  ;;  %vm1608_vm1 = vweird.f32 %v1581_v25  ;;  %v1615_v51 = vor.u32 1.1754944e-38, %v1614_v42  ;;  %vm1623_vm3 = vweird.f32 %v1582_v27 }
 0x7be   : > { %v1575_v32 = vmul.f32 0.3275911, %v5948_v30  ;;  %v5963_v53 = vmul.f32 0.70710677, %v5958_v44  ;;  %vm1613_vm4 = vcmp.eq.f32.partialorder %v1612_v41, 8.507059e+37  ;;  %v1630_v56 = vor.u32 1.1754944e-38, %v1629_v46 }
 0x7bf   : > { %v5952_v35 = vadd.f32 1.0, %v1572_v23  ;;  %v5966_v57 = vmul.f32 0.70710677, %v5960_v47  ;;  %vm1628_vm6 = vcmp.eq.f32.partialorder %v1627_v49, 8.507059e+37  ;;  %v1782_v41 = vsub.f32 0.0, %v5926_v17 }
 0x7c0   : > { %v5954_v38 = vadd.f32 1.0, %v1575_v32  ;;  %v5980_v4 = vand.u32 2147483647, %v5963_v53 }
 0x7c1   : > { %v5222_v31 = vpop.eup %5221  ;;  %5225 = vrcp.f32 %v5952_v35  ;;  %v5983_v18 = vand.u32 2147483647, %v5966_v57  ;;  %v1597_v32 = vand.u32 2147483647, %v5952_v35  ;;  %vm1593_vm10 = vweird.f32 %v5952_v35 }
 0x7c2   : > { %v5224_v33 = vpop.eup %5223  ;;  %v1604_v34 = vmul.f32 %v5222_v31, %v1581_v25  ;;  %5227 = vrcp.f32 %v5954_v38  ;;  %vm1609_vm15 = vweird.f32 %v5222_v31  ;;  %v1577_v22 = vmul.f32 0.3275911, %v5980_v4 }
 0x7c3   : > { %v1619_v37 = vmul.f32 %v5224_v33, %v1582_v27  ;;  %vm1624_vm0 = vweird.f32 %v5224_v33  ;;  %vm1610_vm2 = vmor %vm1608_vm1, %vm1609_vm15  ;;  %v1781_v27 = vsub.f32 0.0, %v5923_v16  ;;  %v1578_v23 = vmul.f32 0.3275911, %v5983_v18 }
 0x7c4   : > { %v1605_v40 = vsub.f32 1.0, %v1604_v34  ;;  %vm1625_vm5 = vmor %vm1623_vm3, %vm1624_vm0  ;;  %v5991_v34 = vadd.f32 1.0, %v1577_v22  ;;  %vm1598_vm12 = vcmp.eq.f32.partialorder %v1597_v32, 8.507059e+37  ;;  %v1790_v49 = vmul.f32 %v1782_v41, %v5926_v17 }
 0x7c5   : > { %v1620_v43 = vsub.f32 1.0, %v1619_v37  ;;  %v5996_v39 = vadd.f32 1.0, %v1578_v23  ;;  %v1789_v42 = vmul.f32 %v1781_v27, %v5923_v16  ;;  %vm1638_vm14 = vweird.f32 %v5954_v38 }
 0x7c6   : > { %v1606_v45 = vmul.f32 %v5222_v31, %v1605_v40  ;;  %5229 = vrcp.f32 %v5991_v34  ;;  %v1642_v16 = vand.u32 2147483647, %v5954_v38 }
 0x7c7   : > { %v1621_v48 = vmul.f32 %v5224_v33, %v1620_v43  ;;  %v5226_v11 = vpop.eup %5225  ;;  %5231 = vrcp.f32 %v5996_v39 }
 0x7c8   : > { %v1607_v50 = vadd.f32 %v5222_v31, %v1606_v45  ;;  %v5968_v58 = vpop.eup %5227  ;;  %v1589_v62 = vmul.f32 %v5226_v11, %v5952_v35  ;;  %vm1594_vm9 = vweird.f32 %v5226_v11  ;;  %vm1643_vm0 = vcmp.eq.f32.partialorder %v1642_v16, 8.507059e+37 }
 0x7c9   : > { %v1622_v52 = vadd.f32 %v5224_v33, %v1621_v48  ;;  %v1634_v1 = vmul.f32 %v5968_v58, %v5954_v38  ;;  %vm1595_vm11 = vmor %vm1593_vm10, %vm1594_vm9  ;;  %vm1639_vm13 = vweird.f32 %v5968_v58 }
 0x7ca   : > { %v1611_v15 = vsel %vm1610_vm2, %v5222_v31, %v1607_v50  ;;  %v1590_v3 = vsub.f32 1.0, %v1589_v62  ;;  %vm1640_vm15 = vmor %vm1638_vm14, %vm1639_vm13  ;;  %vm1668_vm2 = vweird.f32 %v5991_v34 }
 0x7cb   : > { %v5970_v59 = vsel %vm1613_vm4, %v1615_v51, %v1611_v15  ;;  %v1626_v60 = vsel %vm1625_vm5, %v5224_v33, %v1622_v52  ;;  %v1635_v7 = vsub.f32 1.0, %v1634_v1  ;;  %v1599_v33 = vand.u32 2147483648, %v5952_v35 }
 0x7cc   : > { %v1709_v63 = vmul.f32 1.0614054, %v5970_v59  ;;  %v5974_v54 = vsel %vm1628_vm6, %v1630_v56, %v1626_v60  ;;  %v1591_v21 = vmul.f32 %v5226_v11, %v1590_v3  ;;  %v1644_v51 = vand.u32 2147483648, %v5954_v38  ;;  %v5230_v15 = vpop.eup %5229 }
 0x7cd   : > { %v1710_v61 = vmul.f32 1.0614054, %v5974_v54  ;;  %v1636_v37 = vmul.f32 %v5968_v58, %v1635_v7  ;;  %v1600_v45 = vor.u32 1.1754944e-38, %v1599_v33  ;;  %v1798_v52 = vmul.f32 1.442695, %v1789_v42 }
 0x7ce   : > { %v1717_v5 = vadd.f32 -1.4531521, %v1709_v63  ;;  %v1592_v31 = vadd.f32 %v5226_v11, %v1591_v21  ;;  %v1664_v17 = vmul.f32 %v5230_v15, %v5991_v34  ;;  %v1800_v1 = vmul.f32 1.442695, %v1790_v49 }
 0x7cf   : > { %v1718_v19 = vadd.f32 -1.4531521, %v1710_v61  ;;  %v1637_v48 = vadd.f32 %v5968_v58, %v1636_v37  ;;  %v1645_v61 = vor.u32 1.1754944e-38, %v1644_v51  ;;  %5233 = vpow2.f32 %v1798_v52 }
 0x7d0   : > { %v1725_v25 = vmul.f32 %v1717_v5, %v5970_v59  ;;  %v1596_v43 = vsel %vm1595_vm11, %v5226_v11, %v1592_v31  ;;  %v1503_v11 = vpop.f32.mrf.mxu3  ;;  %v5232_v5 = vpop.eup %5231  ;;  %v1665_v38 = vsub.f32 1.0, %v1664_v17  ;;  %v1674_v7 = vand.u32 2147483648, %v5991_v34 }
 0x7d1   : > { %v1726_v36 = vmul.f32 %v1718_v19, %v5974_v54  ;;  %v6006_v50 = vsel %vm1598_vm12, %v1600_v45, %v1596_v43  ;;  %v1641_v62 = vsel %vm1640_vm15, %v5968_v58, %v1637_v48  ;;  %v6017_v3 = vadd.f32 %v1503_v11, %v1324_v12  ;;  %v4985_v45 = vld [vmem:[#allocation5 + $0x78] sm:$0xff] }
 0x7d2   : > { %v1733_v40 = vadd.f32 1.4214138, %v1725_v25  ;;  %v1708_v60 = vmul.f32 1.0614054, %v6006_v50  ;;  %v6020_v19 = vsel %vm1643_vm0, %v1645_v61, %v1641_v62  ;;  %v1672_v21 = vand.u32 2147483647, %v5991_v34  ;;  %2146 = vmatpush.bf16.msra.mxu0 %v4985_v45 }
 0x7d3   : > { %v1734_v46 = vadd.f32 1.4214138, %v1726_v36  ;;  %v1785_v58 = vsub.f32 0.0, %v5980_v4  ;;  %v1679_v22 = vmul.f32 %v5232_v5, %v5996_v39  ;;  %v1666_v23 = vmul.f32 %v5230_v15, %v1665_v38  ;;  %v4993_v34 = vld [vmem:[#allocation5 + $0xb8] sm:$0xff]  ;;  %v4992_v61 = vld [vmem:[#allocation5 + $0xb0] sm:$0xff] }
 0x7d4   : > { %v1741_v35 = vmul.f32 %v1733_v40, %v5970_v59  ;;  %v1716_v27 = vadd.f32 -1.4531521, %v1708_v60  ;;  %vm1669_vm1 = vweird.f32 %v5230_v15  ;;  %v6028_v32 = vmul.f32 0.70710677, %v6017_v3  ;;  %2160 = vmatpush.bf16.msra.mxu1 %v4993_v34 }
 0x7d5   : > { %v1742_v56 = vmul.f32 %v1734_v46, %v5974_v54  ;;  %v1680_v31 = vsub.f32 1.0, %v1679_v22  ;;  %v1711_v33 = vmul.f32 1.0614054, %v6020_v19  ;;  %v1667_v36 = vadd.f32 %v5230_v15, %v1666_v23  ;;  %vm1670_vm3 = vmor %vm1668_vm2, %vm1669_vm1  ;;  %v5234_v46 = vpop.eup %5233  ;;  %v1545_v22 = vpop.f32.mrf.mxu2 }
 0x7d6   : > { %v1749_v63 = vadd.f32 -0.28449672, %v1741_v35  ;;  %v1675_v37 = vor.u32 1.1754944e-38, %v1674_v7  ;;  %v1689_v40 = vand.u32 2147483648, %v5996_v39  ;;  %vm1684_vm4 = vweird.f32 %v5232_v5 }
 0x7d7   : > { %v1750_v25 = vadd.f32 -0.28449672, %v1742_v56  ;;  %v1681_v41 = vmul.f32 %v5232_v5, %v1680_v31  ;;  %v1687_v42 = vand.u32 2147483647, %v5996_v39  ;;  %v6034_v43 = vand.u32 2147483647, %v6028_v32 }
 0x7d8   : > { %v1757_v12 = vmul.f32 %v1749_v63, %v5970_v59  ;;  %v1724_v35 = vmul.f32 %v1716_v27, %v6006_v50  ;;  %v1671_v49 = vsel %vm1670_vm3, %v5230_v15, %v1667_v36  ;;  %vm1673_vm5 = vcmp.eq.f32.partialorder %v1672_v21, 8.507059e+37  ;;  %v4984_v63 = vld [vmem:[#allocation5 + $0x70] sm:$0xff]  ;;  %2161 = vmatpush.bf16.msra.mxu1 %v4992_v61 }
 0x7d9   : > { %v1758_v48 = vmul.f32 %v1750_v25, %v5974_v54  ;;  %v6038_v52 = vsel %vm1673_vm5, %v1675_v37, %v1671_v49  ;;  %v1682_v16 = vadd.f32 %v5232_v5, %v1681_v41  ;;  %vm1683_vm6 = vweird.f32 %v5996_v39  ;;  %2147 = vmatpush.bf16.msra.mxu0 %v4984_v63 }
 0x7da   : > { %v1765_v51 = vadd.f32 0.2548296, %v1757_v12  ;;  %v1780_v11 = vsub.f32 0.0, %v5945_v26  ;;  %v1713_v56 = vmul.f32 1.0614054, %v6038_v52  ;;  %vm1685_vm9 = vmor %vm1683_vm6, %vm1684_vm4  ;;  %v1690_v60 = vor.u32 1.1754944e-38, %v1689_v40 }
 0x7db   : > { %v1576_v62 = vmul.f32 0.3275911, %v6034_v43  ;;  %5235 = vpow2.f32 %v1800_v1  ;;  %v1686_v15 = vsel %vm1685_vm9, %v5232_v5, %v1682_v16  ;;  %vm1688_vm10 = vcmp.eq.f32.partialorder %v1687_v42, 8.507059e+37  ;;  %v4977_v1 = vld [vmem:[#allocation5 + $0x38] sm:$0xff] }
 0x7dc   : > { %v1786_v17 = vsub.f32 0.0, %v5983_v18  ;;  %v1766_v38 = vadd.f32 0.2548296, %v1758_v48  ;;  %v1732_v39 = vadd.f32 1.4214138, %v1724_v35  ;;  %v6046_v21 = vsel %vm1688_vm10, %v1690_v60, %v1686_v15  ;;  %v5001_v5 = vld [vmem:[#allocation5 + $0xf8] sm:$0xff]  ;;  %2132 = vmatpush.bf16.msrb.mxu3 %v4977_v1 }
 0x7dd   : > { %v1721_v7 = vadd.f32 -1.4531521, %v1713_v56  ;;  %v1773_v25 = vmul.f32 %v1765_v51, %v5970_v59  ;;  %v1793_v27 = vmul.f32 %v1785_v58, %v5980_v4  ;;  %v1714_v23 = vmul.f32 1.0614054, %v6046_v21  ;;  %2174 = vmatpush.bf16.msra.mxu2 %v5001_v5  ;;  %v4983_v4 = vld [vmem:[#allocation5 + $0x68] sm:$0xff]  ;;  %v5000_v35 = vld [vmem:[#allocation5 + $0xf0] sm:$0xff] }
 0x7de   : > { %v6051_v12 = vadd.f32 1.0, %v1576_v62  ;;  %v1788_v31 = vmul.f32 %v1780_v11, %v5945_v26  ;;  %v1719_v36 = vadd.f32 -1.4531521, %v1711_v33  ;;  %v1794_v41 = vmul.f32 %v1786_v17, %v5983_v18  ;;  %v4991_v58 = vld [vmem:[#allocation5 + $0xa8] sm:$0xff]  ;;  %2148 = vmatpush.bf16.msra.mxu0 %v4983_v4  ;;  %v4990_v15 = vld [vmem:[#allocation5 + $0xa0] sm:$0xff]  ;;  %v4989_v4 = vld [vmem:[#allocation5 + $0x98] sm:$0xff] }
 0x7df   : > { %v1729_v37 = vmul.f32 %v1721_v7, %v6038_v52  ;;  %v1722_v40 = vadd.f32 -1.4531521, %v1714_v23  ;;  %v6059_v59 = vadd.f32 %v1545_v22, %v1327_v14  ;;  %v1774_v42 = vmul.f32 %v1766_v38, %v5974_v54  ;;  %2162 = vmatpush.bf16.msra.mxu1 %v4991_v58  ;;  %v4976_v14 = vld [vmem:[#allocation5 + $0x30] sm:$0xff]  ;;  %v4999_v7 = vld [vmem:[#allocation5 + $0xe8] sm:$0xff] }
 0x7e0   : > { %5237 = vrcp.f32 %v6051_v12  ;;  %v1740_v26 = vmul.f32 %v1732_v39, %v6006_v50  ;;  %v6064_v34 = vmul.f32 0.5, %v5910_v6  ;;  %v6066_v18 = vmul.f32 %v5234_v46, %v1773_v25  ;;  %2133 = vmatpush.bf16.msrb.mxu3 %v4976_v14  ;;  %v4975_v39 = vld [vmem:[#allocation5 + $0x28] sm:$0xff] }
 0x7e1   : > { %v1737_v33 = vadd.f32 1.4214138, %v1729_v37  ;;  %v5236_v45 = vpop.eup %5235  ;;  %v1806_v48 = vmul.f32 1.442695, %v1793_v27  ;;  %v1730_v0 = vmul.f32 %v1722_v40, %v6046_v21  ;;  %v6070_v49 = vmul.f32 0.5, %v5912_v9  ;;  %2175 = vmatpush.bf16.msra.mxu2 %v5000_v35  ;;  %v4982_v9 = vld [vmem:[#allocation5 + $0x60] sm:$0xff] }
 0x7e2   : > { %v1796_v54 = vmul.f32 1.442695, %v1788_v31  ;;  %v1727_v51 = vmul.f32 %v1719_v36, %v6020_v19  ;;  %v1808_v6 = vmul.f32 1.442695, %v1794_v41  ;;  %v6075_v46 = vmul.f32 0.70710677, %v6059_v59  ;;  %2149 = vmatpush.bf16.msra.mxu0 %v4982_v9 }
 0x7e3   : > { %v1745_v16 = vmul.f32 %v1737_v33, %v6038_v52  ;;  %v1738_v11 = vadd.f32 1.4214138, %v1730_v0  ;;  %vm1829_vm11 = vcmp.lt.f32.partialorder %v5915_v10, 0.0  ;;  %v6078_v56 = vmul.f32 %v5236_v45, %v1774_v42  ;;  %2163 = vmatpush.bf16.msra.mxu1 %v4990_v15  ;;  %v4981_v31 = vld [vmem:[#allocation5 + $0x58] sm:$0xff]  ;;  %v4974_v45 = vld [vmem:[#allocation5 + $0x20] sm:$0xff] }
 0x7e4   : > { %v1748_v60 = vadd.f32 -0.28449672, %v1740_v26  ;;  %v1821_v63 = vsub.f32 1.0, %v6066_v18  ;;  %5239 = vpow2.f32 %v1806_v48  ;;  %v6085_v38 = vand.u32 2147483647, %v6075_v46  ;;  %2134 = vmatpush.bf16.msrb.mxu3 %v4975_v39  ;;  %v4998_v18 = vld [vmem:[#allocation5 + $0xe0] sm:$0xff] }
 0x7e5   : > { %v1753_v62 = vadd.f32 -0.28449672, %v1745_v16  ;;  %v1746_v61 = vmul.f32 %v1738_v11, %v6046_v21  ;;  %5241 = vpow2.f32 %v1796_v54  ;;  %v1735_v22 = vadd.f32 1.4214138, %v1727_v51  ;;  %2176 = vmatpush.bf16.msra.mxu2 %v4999_v7  ;;  %v4988_v11 = vld [vmem:[#allocation5 + $0x90] sm:$0xff]  ;;  %v4973_v7 = vld [vmem:[#allocation5 + $0x18] sm:$0xff] }
 0x7e6   : > { %v6080_v17 = vpop.eup %5237  ;;  %vm1830_vm12 = vcmp.lt.f32.partialorder %v5919_v13, 0.0  ;;  %v1783_v23 = vsub.f32 0.0, %v5948_v30  ;;  %5243 = vpow2.f32 %v1808_v6  ;;  %v1579_v5 = vmul.f32 0.3275911, %v6085_v38  ;;  %2150 = vmatpush.bf16.msra.mxu0 %v4981_v31 }
 0x7e7   : > { %v1761_v25 = vmul.f32 %v1753_v62, %v6038_v52  ;;  %v1649_v27 = vmul.f32 %v6080_v17, %v6051_v12  ;;  %v1754_v1 = vadd.f32 -0.28449672, %v1746_v61  ;;  %v1822_v36 = vsub.f32 1.0, %v6078_v56  ;;  %2164 = vmatpush.bf16.msra.mxu1 %v4989_v4 }
 0x7e8   : > { %v1756_v37 = vmul.f32 %v1748_v60, %v6006_v50  ;;  %v1837_v58 = vsub.f32 0.0, %v1821_v63  ;;  %v1659_v26 = vand.u32 2147483648, %v6051_v12  ;;  %v6097_v33 = vadd.f32 1.0, %v1579_v5  ;;  %2135 = vmatpush.bf16.msrb.mxu3 %v4974_v45 }
 0x7e9   : > { %v1769_v40 = vadd.f32 0.2548296, %v1761_v25  ;;  %v1650_v41 = vsub.f32 1.0, %v1649_v27  ;;  %v1762_v42 = vmul.f32 %v1754_v1, %v6046_v21  ;;  %vm1654_vm13 = vweird.f32 %v6080_v17  ;;  %2177 = vmatpush.bf16.msra.mxu2 %v4998_v18  ;;  %v4987_v1 = vld [vmem:[#allocation5 + $0x88] sm:$0xff] }
 0x7ea   : > { %v1657_v14 = vand.u32 2147483647, %v6051_v12  ;;  %v5240_v35 = vpop.eup %5239  ;;  %v1743_v54 = vmul.f32 %v1735_v22, %v6020_v19  ;;  %v6105_v51 = vmul.f32 %v1783_v23, %v5948_v30  ;;  %5245 = vrcp.f32 %v6097_v33  ;;  %v4997_v22 = vld [vmem:[#allocation5 + $0xd8] sm:$0xff] }
 0x7eb   : > { %v1777_v48 = vmul.f32 %v1769_v40, %v6038_v52  ;;  %v1651_v0 = vmul.f32 %v6080_v17, %v1650_v41  ;;  %v1770_v16 = vadd.f32 0.2548296, %v1762_v42  ;;  %v4980_v52 = vld [vmem:[#allocation5 + $0x50] sm:$0xff]  ;;  %v6108_v6 = vpop.eup %5241  ;;  %v1838_v56 = vsub.f32 0.0, %v1822_v36  ;;  %2165 = vmatpush.bf16.msra.mxu1 %v4988_v11 }
 0x7ec   : > { %vm1653_vm14 = vweird.f32 %v6051_v12  ;;  %v5244_v9 = vpop.eup %5243  ;;  %v1845_v30 = vsel %vm1829_vm11, %v1837_v58, %v1821_v63  ;;  %v1553_v15 = vmul.f32 0.5, %v5958_v44  ;;  %v1660_v39 = vor.u32 1.1754944e-38, %v1659_v26  ;;  %2151 = vmatpush.bf16.msra.mxu0 %v4980_v52  ;;  %2136 = vmatpush.bf16.msrb.mxu3 %v4973_v7  ;;  %v4972_v58 = vld [vmem:[#allocation5 + $0x10] sm:$0xff] }
 0x7ed   : > { %v1817_v60 = vmul.f32 %v5240_v35, %v1777_v48  ;;  %v1652_v62 = vadd.f32 %v6080_v17, %v1651_v0  ;;  %v1778_v61 = vmul.f32 %v1770_v16, %v6046_v21  ;;  %vm1655_vm15 = vmor %vm1653_vm14, %vm1654_vm13  ;;  %v1764_v25 = vadd.f32 0.2548296, %v1756_v37  ;;  %2178 = vmatpush.bf16.msra.mxu2 %v4997_v22  ;;  %v4979_v21 = vld [vmem:[#allocation5 + $0x48] sm:$0xff]  ;;  %v4996_v42 = vld [vmem:[#allocation5 + $0xd0] sm:$0xff] }
 0x7ee   : > { %vm1658_vm0 = vcmp.eq.f32.partialorder %v1657_v14, 8.507059e+37  ;;  %v1751_v12 = vadd.f32 -0.28449672, %v1743_v54  ;;  %v1784_v44 = vsub.f32 0.0, %v6034_v43  ;;  %v1853_v5 = vadd.f32 1.0, %v1845_v30  ;;  %v4986_v14 = vld [vmem:[#allocation5 + $0x80] sm:$0xff] }
 0x7ef   : > { %v1825_v27 = vsub.f32 1.0, %v1817_v60  ;;  %v1656_v23 = vsel %vm1655_vm15, %v6080_v17, %v1652_v62  ;;  %v1818_v10 = vmul.f32 %v5244_v9, %v1778_v61  ;;  %v1846_v31 = vsel %vm1830_vm12, %v1838_v56, %v1822_v36  ;;  %2166 = vmatpush.bf16.msra.mxu1 %v4987_v1  ;;  %v4995_v62 = vld [vmem:[#allocation5 + $0xc8] sm:$0xff] }
 0x7f0   : > { %v6119_v63 = vsel %vm1658_vm0, %v1660_v39, %v1656_v23  ;;  %v5246_v40 = vpop.eup %5245  ;;  %vm1833_vm1 = vcmp.lt.f32.partialorder %v5963_v53, 0.0  ;;  %v1554_v41 = vmul.f32 0.5, %v5960_v47  ;;  %vm1834_vm2 = vcmp.lt.f32.partialorder %v5966_v57, 0.0  ;;  %2152 = vmatpush.bf16.msra.mxu0 %v4979_v21  ;;  %2137 = vmatpush.bf16.msrb.mxu3 %v4972_v58  ;;  %v4978_v47 = vld [vmem:[#allocation5 + $0x40] sm:$0xff] }
 0x7f1   : > { %v1841_v37 = vsub.f32 0.0, %v1825_v27  ;;  %v1712_v17 = vmul.f32 1.0614054, %v6119_v63  ;;  %v1826_v4 = vsub.f32 1.0, %v1818_v10  ;;  %v1772_v26 = vmul.f32 %v1764_v25, %v6006_v50  ;;  %2179 = vmatpush.bf16.msra.mxu2 %v4996_v42  ;;  %v4994_v10 = vld [vmem:[#allocation5 + $0xc0] sm:$0xff] }
 0x7f2   : > { %v1694_v13 = vmul.f32 %v5246_v40, %v6097_v33  ;;  %v1854_v36 = vadd.f32 1.0, %v1846_v31  ;;  %v1792_v53 = vmul.f32 %v1784_v44, %v6034_v43  ;;  %v1861_v35 = vmul.f32 %v1853_v5, %v6064_v34  ;;  %v4971_v43 = vld [vmem:[#allocation5 + $0x8] sm:$0xff] }
 0x7f3   : > { %v1849_v45 = vsel %vm1833_vm1, %v1841_v37, %v1825_v27  ;;  %v1720_v18 = vadd.f32 -1.4531521, %v1712_v17  ;;  %v1842_v0 = vsub.f32 0.0, %v1826_v4  ;;  %v1759_v54 = vmul.f32 %v1751_v12, %v6020_v19  ;;  %2167 = vmatpush.bf16.msra.mxu1 %v4986_v14  ;;  %v4970_v12 = vld [vmem:[#allocation5] sm:$0xff] }
 0x7f4   : > { %v1857_v48 = vadd.f32 1.0, %v1849_v45  ;;  %v1695_v16 = vsub.f32 1.0, %v1694_v13  ;;  %v1702_v56 = vand.u32 2147483647, %v6097_v33  ;;  %v1704_v60 = vand.u32 2147483648, %v6097_v33  ;;  %2153 = vmatpush.bf16.msra.mxu0 %v4978_v47  ;;  %2138 = vmatpush.bf16.msrb.mxu3 %v4971_v43 }
 0x7f5   : > { %v1728_v50 = vmul.f32 %v1720_v18, %v6119_v63  ;;  %v1850_v11 = vsel %vm1834_vm2, %v1842_v0, %v1826_v4  ;;  %vm1699_vm3 = vweird.f32 %v5246_v40  ;;  %v1862_v34 = vmul.f32 %v1854_v36, %v6070_v49  ;;  %2180 = vmatpush.bf16.msra.mxu2 %v4995_v62 }
 0x7f6   : > { %v1865_v52 = vmul.f32 %v1857_v48, %v1553_v15  ;;  %v1858_v9 = vadd.f32 1.0, %v1850_v11  ;;  %v1696_v61 = vmul.f32 %v5246_v40, %v1695_v16  ;;  %v1812_v39 = vmul.f32 %v6108_v6, %v1772_v26 }
 0x7f7   : > { %v1736_v30 = vadd.f32 1.4214138, %v1728_v50  ;;  %v1804_v7 = vmul.f32 1.442695, %v1792_v53  ;;  %vm1698_vm4 = vweird.f32 %v6097_v33  ;;  %v1802_v27 = vmul.f32 1.442695, %v6105_v51 }
 0x7f8   : > { %v1869_v15 = vpack.c.bf16 %v1865_v52, %v1861_v35  ;;  %v1866_v57 = vmul.f32 %v1858_v9, %v1554_v41  ;;  %v1697_v25 = vadd.f32 %v5246_v40, %v1696_v61  ;;  %vm1700_vm5 = vmor %vm1698_vm4, %vm1699_vm3  ;;  %v1705_v23 = vor.u32 1.1754944e-38, %v1704_v60  ;;  %2139 = vmatpush.bf16.msrb.mxu3 %v4970_v12 }
 0x7f9   : > { %v1744_v22 = vmul.f32 %v1736_v30, %v6119_v63  ;;  %vm1703_vm6 = vcmp.eq.f32.partialorder %v1702_v56, 8.507059e+37  ;;  %5247 = vpow2.f32 %v1804_v7  ;;  %v1787_v1 = vsub.f32 0.0, %v6085_v38  ;;  %2181 = vmatpush.bf16.msra.mxu2 %v4994_v10 }
 0x7fa   : > { %2154 = vmatmul.bf16.vlgmr.msra.gmra.mxu0 %v1869_v15  ;;  %v1870_v49 = vpack.c.bf16 %v1866_v57, %v1862_v34  ;;  %v1701_v6 = vsel %vm1700_vm5, %v5246_v40, %v1697_v25  ;;  %v1820_v5 = vsub.f32 1.0, %v1812_v39  ;;  %v1767_v31 = vadd.f32 0.2548296, %v1759_v54 }
 0x7fb   : > { %v1752_v44 = vadd.f32 -0.28449672, %v1744_v22  ;;  %v1706_v21 = vsel %vm1703_vm6, %v1705_v23, %v1701_v6  ;;  %5249 = vpow2.f32 %v1802_v27  ;;  %v1795_v41 = vmul.f32 %v1787_v1, %v6085_v38 }
 0x7fc   : > { %v1715_v51 = vmul.f32 1.0614054, %v1706_v21  ;;  %2168 = vmatmul.bf16.vlgmr.msra.gmra.mxu1 %v1870_v49  ;;  %v1836_v4 = vsub.f32 0.0, %v1820_v5  ;;  %v1775_v40 = vmul.f32 %v1767_v31, %v6020_v19  ;;  %vm1828_vm9 = vcmp.lt.f32.partialorder %v5939_v28, 0.0 }
 0x7fd   : > { %v1760_v33 = vmul.f32 %v1752_v44, %v6119_v63  ;;  %v1810_v36 = vmul.f32 1.442695, %v1795_v41  ;;  %vm1832_vm10 = vcmp.lt.f32.partialorder %v6028_v32, 0.0  ;;  %v1548_v50 = vmul.f32 0.5, %v5931_v20 }
 0x7fe   : > { %v1723_v17 = vadd.f32 -1.4531521, %v1715_v51  ;;  %v1844_v48 = vsel %vm1828_vm9, %v1836_v4, %v1820_v5  ;;  %v1552_v16 = vmul.f32 0.5, %v6017_v3  ;;  %vm1831_vm11 = vcmp.lt.f32.partialorder %v5942_v29, 0.0  ;;  %v5186_v29 = vld [vmem:[%s6775_s13] ss:$0 sm:$0xff] }
 0x7ff   : > { %v1768_v37 = vadd.f32 0.2548296, %v1760_v33  ;;  %v5248_v26 = vpop.eup %5247  ;;  %v1852_v38 = vadd.f32 1.0, %v1844_v48  ;;  %5251 = vpow2.f32 %v1810_v36  ;;  %vm1835_vm12 = vcmp.lt.f32.partialorder %v6075_v46, 0.0  ;;  %v4514_v48 = vld [vmem:[%s6812_s21 + $0x174] sm:$0xf0] }
 0x800   : > { %v1731_v42 = vmul.f32 %v1723_v17, %v1706_v21  ;;  %v1551_v3 = vmul.f32 0.5, %v5936_v24  ;;  %v1555_v15 = vmul.f32 0.5, %v6059_v59 }
 0x801   : > { %v1776_v58 = vmul.f32 %v1768_v37, %v6119_v63  ;;  %v5250_v13 = vpop.eup %5249  ;;  %v1860_v11 = vmul.f32 %v1852_v38, %v1548_v50  ;;  %v5021_v38 = vld [vmem:[%s6812_s21 + $0x158] sm:$0xf0]  ;;  %v4508_v50 = vld [vmem:[%s6812_s21 + $0x158] sm:$0xf] }
 0x802   : > { %v1739_v18 = vadd.f32 1.4214138, %v1731_v42  ;;  %v1815_v0 = vmul.f32 %v5250_v13, %v1775_v40  ;;  %v5023_v13 = vld [vmem:[%s6812_s21 + $0x16c] sm:$0xf] }
 0x803   : > { %v1816_v45 = vmul.f32 %v5248_v26, %v1776_v58 }
 0x804   : > { %v1747_v47 = vmul.f32 %v1739_v18, %v1706_v21  ;;  %v1823_v19 = vsub.f32 1.0, %v1815_v0  ;;  %v5024_v18 = vld [vmem:[%s6812_s21 + $0x170] sm:$0xf0]  ;;  %v4520_v0 = vld [vmem:[%s6812_s21 + $0x170] sm:$0xf] }
 0x805   : > { %v1824_v53 = vsub.f32 1.0, %v1816_v45  ;;  %v5252_v62 = vpop.eup %5251 }
 0x806   : > { %v1755_v35 = vadd.f32 -0.28449672, %v1747_v47  ;;  %v1839_v60 = vsub.f32 0.0, %v1823_v19  ;;  %v4517_v47 = vor.u32 %v5023_v13, %v4514_v48 }
 0x807   : > { %v1840_v14 = vsub.f32 0.0, %v1824_v53 }
 0x808   : > { %v1763_v54 = vmul.f32 %v1755_v35, %v1706_v21  ;;  %v1847_v32 = vsel %vm1831_vm11, %v1839_v60, %v1823_v19  ;;  %2427 = vmatpush.bf16.msrb.mxu0 %v4517_v47  ;;  %v4500_v35 = vld [vmem:[%s6812_s21 + $0x150] sm:$0xf]  ;;  %v5020_v19 = vld [vmem:[%s6812_s21 + $0x154] sm:$0xf]  ;;  %v5017_v60 = vld [vmem:[%s6812_s21 + $0x13c] sm:$0xf] }
 0x809   : > { %v1848_v63 = vsel %vm1832_vm10, %v1840_v14, %v1824_v53  ;;  %v1855_v39 = vadd.f32 1.0, %v1847_v32  ;;  %v5025_v53 = vld [vmem:[%s6812_s21 + $0x178] sm:$0xf0]  ;;  %v5002_v47 = vld [vmem:[%s6812_s21 + $0xc4] sm:$0xf] }
 0x80a   : > { %v1856_v52 = vadd.f32 1.0, %v1848_v63  ;;  %v1771_v28 = vadd.f32 0.2548296, %v1763_v54  ;;  %v4521_v14 = vor.u32 %v5025_v53, %v4520_v0  ;;  %v4501_v63 = vor.u32 %v5021_v38, %v4500_v35  ;;  %v4502_v54 = vld [vmem:[%s6812_s21 + $0x15c] sm:$0xf0] }
 0x80b   : > { %v1863_v57 = vmul.f32 %v1855_v39, %v1551_v3  ;;  %v5015_v39 = vld [vmem:[%s6812_s21 + $0x128] sm:$0xf0]  ;;  %v4428_v0 = vld [vmem:[%s6812_s21 + $0xc0] sm:$0xf]  ;;  %v4436_v35 = vld [vmem:[%s6812_s21 + $0xc8] sm:$0xf] }
 0x80c   : > { %v1864_v56 = vmul.f32 %v1856_v52, %v1552_v16  ;;  %v1779_v43 = vmul.f32 %v1771_v28, %v1706_v21  ;;  %2441 = vmatpush.bf16.msrb.mxu1 %v4521_v14  ;;  %v5022_v16 = vld [vmem:[%s6812_s21 + $0x160] sm:$0xf0]  ;;  %v4505_v52 = vor.u32 %v5020_v19, %v4502_v54  ;;  %v5003_v53 = vld [vmem:[%s6812_s21 + $0xc8] sm:$0xf0]  ;;  %v4430_v14 = vld [vmem:[%s6812_s21 + $0xcc] sm:$0xf0] }
 0x80d   : > { %v4509_v28 = vor.u32 %v5022_v16, %v4508_v50  ;;  %v5004_v38 = vld [vmem:[%s6812_s21 + $0xd0] sm:$0xf0]  ;;  %v4429_v54 = vor.u32 %v5003_v53, %v4428_v0  ;;  %v4433_v50 = vor.u32 %v5002_v47, %v4430_v14 }
 0x80e   : > { %v1868_v9 = vpack.c.bf16 %v1864_v56, %v1860_v11  ;;  %v1819_v30 = vmul.f32 %v5252_v62, %v1779_v43  ;;  %2428 = vmatpush.bf16.msrb.mxu0 %v4505_v52  ;;  %v4488_v11 = vld [vmem:[%s6812_s21 + $0x138] sm:$0xf]  ;;  %v5018_v56 = vld [vmem:[%s6812_s21 + $0x140] sm:$0xf0]  ;;  %v4490_v62 = vld [vmem:[%s6812_s21 + $0x144] sm:$0xf0]  ;;  %v4437_v16 = vor.u32 %v5004_v38, %v4436_v35 }
 0x80f   : > { %v4489_v43 = vor.u32 %v5018_v56, %v4488_v11  ;;  %v4493_v32 = vor.u32 %v5017_v60, %v4490_v62 }
 0x810   : > { %2140 = vmatmul.bf16.vlgmr.msrb.gmra.mxu3 %v1868_v9  ;;  %v1827_v61 = vsub.f32 1.0, %v1819_v30  ;;  %2442 = vmatpush.bf16.msrb.mxu1 %v4509_v28  ;;  %v4496_v9 = vld [vmem:[%s6812_s21 + $0x140] sm:$0xf]  ;;  %v5019_v30 = vld [vmem:[%s6812_s21 + $0x148] sm:$0xf0] }
 0x812   : > { %v1843_v34 = vsub.f32 0.0, %v1827_v61  ;;  %2429 = vmatpush.bf16.msrb.mxu0 %v4493_v32 }
 0x814   : > { %v1851_v20 = vsel %vm1835_vm12, %v1843_v34, %v1827_v61  ;;  %v4497_v61 = vor.u32 %v5019_v30, %v4496_v9  ;;  %v4476_v34 = vld [vmem:[%s6812_s21 + $0x120] sm:$0xf] }
 0x815   : > { %v1859_v7 = vadd.f32 1.0, %v1851_v20  ;;  %v5014_v20 = vld [vmem:[%s6812_s21 + $0x124] sm:$0xf]  ;;  %v4477_v3 = vor.u32 %v5015_v39, %v4476_v34 }
 0x816   : > { %2443 = vmatpush.bf16.msrb.mxu1 %v4497_v61 }
 0x817   : > { %v1867_v22 = vmul.f32 %v1859_v7, %v1555_v15  ;;  %v4478_v15 = vld [vmem:[%s6812_s21 + $0x12c] sm:$0xf0]  ;;  %v4484_v7 = vld [vmem:[%s6812_s21 + $0x128] sm:$0xf] }
 0x819   : > { %v1871_v25 = vpack.c.bf16 %v1867_v22, %v1863_v57  ;;  %v5016_v57 = vld [vmem:[%s6812_s21 + $0x130] sm:$0xf0]  ;;  %v4481_v22 = vor.u32 %v5014_v20, %v4478_v15 }
 0x81b   : > { %2182 = vmatmul.bf16.vlgmr.msra.gmra.mxu2 %v1871_v25  ;;  %v4485_v25 = vor.u32 %v5016_v57, %v4484_v7  ;;  %2430 = vmatpush.bf16.msrb.mxu0 %v4481_v22 }
 0x81d   : > { %2444 = vmatpush.bf16.msrb.mxu1 %v4485_v25  ;;  %v5188_v25 = vld [vmem:[%s6777_s15] ss:$0 sm:$0xff] }
 0x877   : > { %v2155_v12 = vpop.f32.mrf.mxu0 }
 0x879   : > { %v2169_v49 = vpop.f32.mrf.mxu1 }
 0x87f   : > { %v2157_v24 = vpop.f32.mrf.mxu0 }
 0x881   : > { %v2171_v31 = vpop.f32.mrf.mxu1 }
 0x893   : > { %v2141_v27 = vpop.f32.mrf.mxu3 }
 0x894   : > { %v2142_v23 = vadd.f32 %v5186_v29, %v2141_v27  ;;  %v5012_v27 = vld [vmem:[%s6812_s21 + $0x110] sm:$0xf0] }
 0x896   : > { %v2156_v10 = vadd.f32 %v2155_v12, %v2142_v23  ;;  %v5011_v23 = vld [vmem:[%s6812_s21 + $0x10c] sm:$0xf] }
 0x898   : > { %v2170_v44 = vadd.f32 %v2169_v49, %v2156_v10  ;;  %v4466_v10 = vld [vmem:[%s6812_s21 + $0x114] sm:$0xf0]  ;;  %v4472_v49 = vld [vmem:[%s6812_s21 + $0x110] sm:$0xf] }
 0x89b   : > { %v2143_v46 = vpop.f32.mrf.mxu3 }
 0x89c   : > { %v2144_v6 = vadd.f32 %v5186_v29, %v2143_v46  ;;  %v4464_v29 = vld [vmem:[%s6812_s21 + $0x108] sm:$0xf]  ;;  %v5013_v46 = vld [vmem:[%s6812_s21 + $0x118] sm:$0xf0] }
 0x89d   : > { %v4465_v12 = vor.u32 %v5012_v27, %v4464_v29 }
 0x89e   : > { %v2183_v21 = vpop.f32.mrf.mxu2  ;;  %v2158_v1 = vadd.f32 %v2157_v24, %v2144_v6  ;;  %v4469_v6 = vor.u32 %v5011_v23, %v4466_v10  ;;  %v4473_v24 = vor.u32 %v5013_v46, %v4472_v49 }
 0x89f   : > { %v2184_v59 = vadd.f32 %v2183_v21, %v2170_v44  ;;  %v4452_v21 = vld [vmem:[%s6812_s21 + $0xf0] sm:$0xf] }
 0x8a0   : > { %v2172_v33 = vadd.f32 %v2171_v31, %v2158_v1  ;;  %v5008_v1 = vld [vmem:[%s6812_s21 + $0xf4] sm:$0xf]  ;;  %2431 = vmatpush.bf16.msrb.mxu0 %v4469_v6  ;;  %2445 = vmatpush.bf16.msrb.mxu1 %v4473_v24 }
 0x8a1   : > { %v2188_v5 = vadd.f32 %v2184_v59, %v5897_v55  ;;  %v5009_v59 = vld [vmem:[%s6812_s21 + $0xf8] sm:$0xf0] }
 0x8a2   : > { %v4453_v31 = vor.u32 %v5009_v59, %v4452_v21 }
 0x8a3   : > { %2192 = vadd.xlane.f32.xlu2 %v2188_v5 }
 0x8a6   : > { %v2185_v51 = vpop.f32.mrf.mxu2 }
 0x8a7   : > { %v2186_v37 = vadd.f32 %v2185_v51, %v2172_v33  ;;  %v4454_v33 = vld [vmem:[%s6812_s21 + $0xfc] sm:$0xf0]  ;;  %v4460_v51 = vld [vmem:[%s6812_s21 + $0xf8] sm:$0xf] }
 0x8a9   : > { %v2189_v17 = vadd.f32 %v2186_v37, %v5899_v2  ;;  %v4512_v2 = vld [vmem:[%s6812_s21 + $0x168] sm:$0xf]  ;;  %v5010_v37 = vld [vmem:[%s6812_s21 + $0x100] sm:$0xf0] }
 0x8aa   : > { %v4513_v36 = vor.u32 %v5024_v18, %v4512_v2  ;;  %v4448_v2 = vld [vmem:[%s6812_s21 + $0xe0] sm:$0xf]  ;;  %v5007_v18 = vld [vmem:[%s6812_s21 + $0xe8] sm:$0xf0] }
 0x8ab   : > { %2194 = vadd.xlane.f32.xlu0 %v2189_v17  ;;  %v4449_v48 = vor.u32 %v5007_v18, %v4448_v2 }
 0x8ac   : > { %2413 = vmatpush.bf16.msra.mxu3 %v4513_v36 }
 0x8b0   : > { %2414 = vmatpush.bf16.msra.mxu3 %v4501_v63 }
 0x8b4   : > { %2415 = vmatpush.bf16.msra.mxu3 %v4489_v43 }
 0x8b8   : > { %2416 = vmatpush.bf16.msra.mxu3 %v4477_v3  ;;  %v5187_v3 = vld [vmem:[%s6776_s14] ss:$0 sm:$0xff] }
 0x8bc   : > { %2417 = vmatpush.bf16.msra.mxu3 %v4465_v12 }
 0x8c0   : > { %2418 = vmatpush.bf16.msra.mxu3 %v4453_v31 }
 0x916   : > { %v2193_v41 = vpop.xlane.xlu2 %2192 }
 0x917   : > { %v2196_v4 = vmul.f32 %v2193_v41, %v5642_v8  ;;  %v4461_v41 = vor.u32 %v5010_v37, %v4460_v51 }
 0x919   : > { %v6162_v40 = vsub.f32 %v2188_v5, %v2196_v4  ;;  %v4440_v4 = vld [vmem:[%s6812_s21 + $0xd8] sm:$0xf]  ;;  %2446 = vmatpush.bf16.msrb.mxu1 %v4461_v41 }
 0x91b   : > { %v2200_v58 = vmul.f32 %v6162_v40, %v6162_v40 }
 0x91d   : > { %2202 = vadd.xlane.f32.xlu1 %v2200_v58  ;;  %v5006_v58 = vld [vmem:[%s6812_s21 + $0xe0] sm:$0xf0]  ;;  %2447 = vmatpush.bf16.msrb.mxu1 %v4449_v48 }
 0x91e   : > { %v2195_v42 = vpop.xlane.xlu0 %2194  ;;  %v4441_v13 = vor.u32 %v5006_v58, %v4440_v4 }
 0x91f   : > { %v2197_v55 = vmul.f32 %v2195_v42, %v5642_v8  ;;  %v5005_v42 = vld [vmem:[%s6812_s21 + $0xdc] sm:$0xf] }
 0x920   : > { %2419 = vmatpush.bf16.msra.mxu3 %v4441_v13 }
 0x921   : > { %v6167_v26 = vsub.f32 %v2189_v17, %v2197_v55  ;;  %v4457_v17 = vor.u32 %v5008_v1, %v4454_v33  ;;  %2448 = vmatpush.bf16.msrb.mxu1 %v4437_v16 }
 0x923   : > { %v2201_v45 = vmul.f32 %v6167_v26, %v6167_v26  ;;  %2432 = vmatpush.bf16.msrb.mxu0 %v4457_v17 }
 0x924   : > { %2420 = vmatpush.bf16.msra.mxu3 %v4429_v54 }
 0x925   : > { %2204 = vadd.xlane.f32.xlu2 %v2201_v45  ;;  %v4442_v45 = vld [vmem:[%s6812_s21 + $0xe4] sm:$0xf0] }
 0x926   : > { %v4445_v36 = vor.u32 %v5005_v42, %v4442_v45 }
 0x928   : > { %2433 = vmatpush.bf16.msrb.mxu0 %v4445_v36 }
 0x92c   : > { %2434 = vmatpush.bf16.msrb.mxu0 %v4433_v50 }
 0x990   : > { %v2203_v44 = vpop.xlane.xlu1 %2202 }
 0x991   : > { %v2206_v5 = vmul.f32 %v2203_v44, %v5642_v8 }
 0x993   : > { %v2208_v55 = vadd.f32 1e-12, %v2206_v5 }
 0x995   : > { %5253 = vrsqrt.f32 %v2208_v55  ;;  %vm2216_vm14 = vweird.f32 %v2208_v55 }
 0x998   : > { %v2205_v19 = vpop.xlane.xlu2 %2204 }
 0x999   : > { %v2207_v63 = vmul.f32 %v2205_v19, %v5642_v8 }
 0x99b   : > { %v5254_v52 = vpop.eup %5253  ;;  %v2209_v28 = vadd.f32 1e-12, %v2207_v63 }
 0x99c   : > { %v2211_v11 = vmul.f32 %v5254_v52, %v2208_v55  ;;  %vm2217_vm13 = vweird.f32 %v5254_v52 }
 0x99d   : > { %5255 = vrsqrt.f32 %v2209_v28  ;;  %vm2218_vm15 = vmor %vm2216_vm14, %vm2217_vm13  ;;  %vm2226_vm1 = vweird.f32 %v2209_v28 }
 0x99e   : > { %v2212_v56 = vmul.f32 %v5254_v52, %v2211_v11 }
 0x9a0   : > { %v2213_v60 = vmul.f32 0.5, %v2212_v56 }
 0x9a2   : > { %v2214_v43 = vsub.f32 1.5, %v2213_v60  ;;  %v5313_v60 = vld [vmem:[%s5640_s26] ss:$0 sm:$0xff]  ;;  %s5394_s26 = scalar_lea.hbm %s6782_s20, 2 }
 0x9a3   : > { %v5256_v62 = vpop.eup %5255  ;;  %p5396_p4 = scmp.lt.s32.totalorder %s5394_s26, %s5390_s27 }
 0x9a4   : > { %v2215_v9 = vmul.f32 %v5254_v52, %v2214_v43  ;;  %v2221_v30 = vmul.f32 %v5256_v62, %v2209_v28  ;;  %vm2227_vm0 = vweird.f32 %v5256_v62 }
 0x9a5   : > { %vm2228_vm2 = vmor %vm2226_vm1, %vm2227_vm0  ;;  %p5397_p7 = por %p5396_p4, %p5395_p3 }
 0x9a6   : > { %v2222_v32 = vmul.f32 %v5256_v62, %v2221_v30  ;;  %v2219_v61 = vsel %vm2218_vm15, %v5254_v52, %v2215_v9 }
 0x9a7   : > { %v2230_v20 = vmul.f32 %v2219_v61, %v6162_v40  ;;  %p5398_p8 = pnand %p5397_p7, %p5393_p2 }
 0x9a8   : > { %v2223_v34 = vmul.f32 0.5, %v2222_v32 }
 0x9a9   : > { %v2235_v22 = vmul.f32 %v5187_v3, %v2230_v20 }
 0x9aa   : > { %v2224_v39 = vsub.f32 1.5, %v2223_v34 }
 0x9ab   : > { %v6325_v27 = vadd.f32 %v5188_v25, %v2235_v22 }
 0x9ac   : > { %v2225_v15 = vmul.f32 %v5256_v62, %v2224_v39 }
 0x9ae   : > { %v2229_v7 = vsel %vm2228_vm2, %v5256_v62, %v2225_v15 }
 0x9af   : > { %v2231_v57 = vmul.f32 %v2229_v7, %v6167_v26  ;;  %v4425_v26 = vld [vmem:[%s6767_s5 + $0x3] sm:$0x7] }
 0x9b0   : > { %v2280_v49 = vperm.slane %v4425_v26, 1  ;;  %v2279_v46 = vperm.slane %v4425_v26, 0  ;;  %v2281_v1 = vperm.slane %v4425_v26, 2 }
 0x9b1   : > { %v2236_v29 = vmul.f32 %v5187_v3, %v2231_v57 }
 0x9b3   : > { %v6327_v23 = vadd.f32 %v5188_v25, %v2236_v29 }
 0x9b5   : > { %v2242_v40 = vpack.c.bf16 %v6327_v23, %v6325_v27 }
 0x9b7   : > { %2421 = vmatmul.bf16.vlgmr.msra.gmra.mxu3 %v2242_v40  ;;  %2435 = vmatmul.bf16.vlgmr.msrb.gmra.mxu0 %v2242_v40 }
 0x9b8   : > { %2449 = vmatmul.bf16.vlgmr.msrb.gmra.mxu1 %v2242_v40 }
 0xa34   : > { %v2436_v10 = vpop.f32.mrf.mxu0 }
 0xa35   : > { %v2450_v12 = vpop.f32.mrf.mxu1  ;;  %v2437_v6 = vadd.f32 %v2436_v10, %v2280_v49 }
 0xa36   : > { %v2451_v51 = vadd.f32 %v2450_v12, %v2281_v1 }
 0xa38   : > { %v2456_v42 = vpack.c.bf16 %v2451_v51, %v2451_v51 }
 0xa3a   : > { %v2422_v44 = vpop.f32.mrf.mxu3  ;;  %v2524_v0 = vunpack.c.l.b16 %v2456_v42 }
 0xa3b   : > { %v2423_v24 = vadd.f32 %v2422_v44, %v2279_v46 }
 0xa3c   : > { %v2438_v5 = vpop.f32.mrf.mxu0 }
 0xa3d   : > { %v2455_v21 = vpack.c.bf16 %v2437_v6, %v2423_v24  ;;  %v2452_v59 = vpop.f32.mrf.mxu1  ;;  %v2439_v37 = vadd.f32 %v2438_v5, %v2280_v49 }
 0xa3e   : > { %v2453_v31 = vadd.f32 %v2452_v59, %v2281_v1 }
 0xa3f   : > { %2555 = vrot.lane.b32.xlu1 %v2455_v21, %s6815_s1  ;;  %v2461_v41 = vrot.slane %v2455_v21, 4  ;;  %v2463_v45 = vunpack.c.l.b16 %v2455_v21 }
 0xa40   : > { %v2458_v4 = vpack.c.bf16 %v2453_v31, %v2453_v31 }
 0xa41   : > { %v2466_v36 = vunpack.c.l.b16 %v2461_v41 }
 0xa42   : > { %v2424_v33 = vpop.f32.mrf.mxu3  ;;  %v2525_v18 = vunpack.c.l.b16 %v2458_v4 }
 0xa43   : > { %v2425_v17 = vadd.f32 %v2424_v33, %v2279_v46 }
 0xa44   : > { %v6337_v47 = vpack.c.b16 %v2525_v18, %v2524_v0  ;;  %v5029_v0 = vld [vmem:[%s6768_s6 + $0x58] sm:$0xff] }
 0xa45   : > { %v2457_v58 = vpack.c.bf16 %v2439_v37, %v2425_v17 }
 0xa47   : > { %v2462_v55 = vrot.slane %v2457_v58, 4  ;;  %2557 = vrot.lane.b32.xlu2 %v2457_v58, %s6815_s1  ;;  %v2464_v2 = vunpack.c.l.b16 %v2457_v58 }
 0xa49   : > { %v2465_v13 = vpack.c.b16 %v2464_v2, %v2463_v45  ;;  %v2467_v48 = vunpack.c.l.b16 %v2462_v55 }
 0xa4b   : > { %2561 = vrot.lane.b32.xlu1 %v2465_v13, %s6815_s1  ;;  %v2468_v53 = vpack.c.b16 %v2467_v48, %v2466_v36 }
 0xa4d   : > { %v2473_v14 = vsel %vm963_vm7, %v2468_v53, 0 }
 0xa4e   : > { %2482 = vmatpush.bf16.xpose.msrb.mxu2 %v2473_v14 }
 0xa55   : > { %4522 = vmatmul.msk.bf16.vlgmr.msrb.gmra.mxu2 %vm963_vm7, %v2465_v13 }
 0xa56   : > { %2538 = vmatpush.bf16.msra.mxu2 %v6337_v47 }
 0xa5a   : > { %2721 = vmatpush.bf16.msrb.mxu2 %v5029_v0  ;;  %v5061_v0 = vld [vmem:[#allocation2 + $0x1d4] sm:$0xf0] }
 0xaa1   : > { %v2558_v35 = vpop.permute.xlu2 %2557 }
 0xaa2   : > { %v2560_v38 = vrot.slane %v2558_v35, 4 }
 0xaa4   : > { %v2564_v54 = vunpack.c.l.b16 %v2560_v38 }
 0xab1   : > { %v2556_v19 = vpop.permute.xlu1 %2555 }
 0xab2   : > { %v2559_v63 = vrot.slane %v2556_v19, 4 }
 0xab4   : > { %v2563_v50 = vunpack.c.l.b16 %v2559_v63 }
 0xab6   : > { %v2565_v16 = vpack.c.b16 %v2564_v54, %v2563_v50  ;;  %v5028_v54 = vld [vmem:[%s6768_s6 + $0x50] sm:$0xff] }
 0xab7   : > { %2722 = vmatpush.bf16.msrb.mxu2 %v5028_v54  ;;  %v5054_v54 = vld [vmem:[#allocation2 + $0x1a4] sm:$0xf] }
 0xab8   : > { %v2570_v52 = vsel %vm963_vm7, %v2565_v16, 0  ;;  %v5027_v16 = vld [vmem:[%s6768_s6 + $0x48] sm:$0xff] }
 0xab9   : > { %2579 = vmatpush.bf16.xpose.msrb.mxu3 %v2570_v52 }
 0xabb   : > { %2723 = vmatpush.bf16.msrb.mxu2 %v5027_v16  ;;  %v4664_v16 = vld [vmem:[#allocation2 + $0x1b0] sm:$0xf0] }
 0xabd   : > { %v2562_v28 = vpop.permute.xlu1 %2561 }
 0xac0   : > { %4532 = vmatmul.msk.bf16.vlgmr.msrb.gmra.mxu3 %vm963_vm7, %v2562_v28 }
 0xad8   : > { %v2484_v11 = vpop.f32.mrf.mxu2 }
 0xad9   : > { %v2489_v56 = vmul.f32 0.125, %v2484_v11 }
 0xadb   : > { %v2491_v43 = vadd.f32 %v5313_v60, %v2489_v56 }
 0xadd   : > { %v2493_v62 = vsel %vm991_vm8, %v2491_v43, -inf }
 0xade   : > { %2494 = vmax.xlane.f32.xlu2 %v2493_v62 }
 0xae0   : > { %v2486_v9 = vpop.f32.mrf.mxu2 }
 0xae1   : > { %v2490_v30 = vmul.f32 0.125, %v2486_v9 }
 0xae3   : > { %v2492_v32 = vadd.f32 %v5313_v60, %v2490_v30 }
 0xae5   : > { %v2496_v61 = vsel %vm991_vm8, %v2492_v32, -inf }
 0xae6   : > { %2497 = vmax.xlane.f32.xlu0 %v2496_v61  ;;  %v5031_v61 = vld [vmem:[%s6768_s6 + $0x68] sm:$0xff] }
 0xb43   : > { %v2581_v34 = vpop.f32.mrf.mxu3 }
 0xb44   : > { %v2586_v39 = vmul.f32 0.125, %v2581_v34  ;;  %v5030_v34 = vld [vmem:[%s6768_s6 + $0x60] sm:$0xff] }
 0xb46   : > { %v2588_v20 = vadd.f32 %v5313_v60, %v2586_v39 }
 0xb48   : > { %v2590_v3 = vsel %vm991_vm8, %v2588_v20, -inf }
 0xb49   : > { %2591 = vmax.xlane.f32.xlu1 %v2590_v3 }
 0xb4b   : > { %v2583_v15 = vpop.f32.mrf.mxu3 }
 0xb4c   : > { %v2587_v7 = vmul.f32 0.125, %v2583_v15 }
 0xb4e   : > { %v2589_v57 = vadd.f32 %v5313_v60, %v2587_v7  ;;  %v5026_v60 = vld [vmem:[%s6768_s6 + $0x40] sm:$0xff] }
 0xb4f   : > { %2724 = vmatpush.bf16.msrb.mxu2 %v5026_v60  ;;  %v5189_v7 = vld [vmem:[%s6769_s7 + $0x1] ss:$0 sm:$0xff]  ;;  %v5055_v60 = vld [vmem:[#allocation2 + $0x1ac] sm:$0xf] }
 0xb50   : > { %v2593_v22 = vsel %vm991_vm8, %v2589_v57, -inf }
 0xb51   : > { %v2495_v25 = vpop.xlane.xlu2 %2494  ;;  %2594 = vmax.xlane.f32.xlu0 %v2593_v22 }
 0xb52   : > { %v2499_v29 = vsub.f32 %v2491_v43, %v2495_v25  ;;  %v5033_v43 = vld [vmem:[%s6768_s6 + $0x78] sm:$0xff] }
 0xb53   : > { %2680 = vmatpush.bf16.msra.mxu1 %v5033_v43  ;;  %v4672_v43 = vld [vmem:[#allocation2 + $0x1b8] sm:$0xf0] }
 0xb54   : > { %v2501_v40 = vmul.f32 1.442695, %v2499_v29 }
 0xb56   : > { %5257 = vpow2.f32 %v2501_v40 }
 0xb59   : > { %v2498_v26 = vpop.xlane.xlu0 %2497 }
 0xb5a   : > { %v2500_v12 = vsub.f32 %v2492_v32, %v2498_v26  ;;  %v5032_v32 = vld [vmem:[%s6768_s6 + $0x70] sm:$0xff] }
 0xb5b   : > { %2681 = vmatpush.bf16.msra.mxu1 %v5032_v32  ;;  %v5050_v32 = vld [vmem:[#allocation2 + $0x184] sm:$0xf] }
 0xb5c   : > { %v5258_v10 = vpop.eup %5257  ;;  %v2503_v49 = vmul.f32 1.442695, %v2500_v12 }
 0xb5d   : > { %v2505_v46 = vsel %vm991_vm8, %v5258_v10, 0.0 }
 0xb5e   : > { %5259 = vpow2.f32 %v2503_v49  ;;  %2506 = vadd.xlane.f32.xlu0 %v2505_v46 }
 0xb5f   : > { %2682 = vmatpush.bf16.msra.mxu1 %v5031_v61 }
 0xb63   : > { %2683 = vmatpush.bf16.msra.mxu1 %v5030_v34  ;;  %v4648_v34 = vld [vmem:[#allocation2 + $0x190] sm:$0xf0] }
 0xb64   : > { %v5260_v44 = vpop.eup %5259 }
 0xb65   : > { %v2508_v6 = vsel %vm991_vm8, %v5260_v44, 0.0 }
 0xb66   : > { %2509 = vadd.xlane.f32.xlu0 %v2508_v6 }
 0xbbc   : > { %v2592_v24 = vpop.xlane.xlu1 %2591 }
 0xbbd   : > { %v2596_v21 = vsub.f32 %v2588_v20, %v2592_v24 }
 0xbbf   : > { %v2598_v59 = vmul.f32 1.442695, %v2596_v21 }
 0xbc1   : > { %5261 = vpow2.f32 %v2598_v59 }
 0xbc4   : > { %v2595_v1 = vpop.xlane.xlu0 %2594 }
 0xbc5   : > { %v2597_v5 = vsub.f32 %v2589_v57, %v2595_v1 }
 0xbc7   : > { %v5262_v31 = vpop.eup %5261  ;;  %v2600_v33 = vmul.f32 1.442695, %v2597_v5  ;;  %v5064_v5 = vld [vmem:[#allocation2 + $0x1ec] sm:$0xf0] }
 0xbc8   : > { %v2602_v51 = vsel %vm991_vm8, %v5262_v31, 0.0 }
 0xbc9   : > { %5263 = vpow2.f32 %v2600_v33  ;;  %2603 = vadd.xlane.f32.xlu0 %v2602_v51  ;;  %v4696_v51 = vld [vmem:[#allocation2 + $0x1f0] sm:$0xf0] }
 0xbcf   : > { %v5264_v37 = vpop.eup %5263 }
 0xbd0   : > { %v2605_v17 = vsel %vm991_vm8, %v5264_v37, 0.0 }
 0xbd1   : > { %2606 = vadd.xlane.f32.xlu2 %v2605_v17  ;;  %v2507_v41 = vpop.xlane.xlu0 %2506  ;;  %v5065_v17 = vld [vmem:[#allocation2 + $0x1f4] sm:$0xf0] }
 0xbd2   : > { %5265 = vrcp.f32 %v2507_v41 }
 0xbd8   : > { %v5266_v58 = vpop.eup %5265 }
 0xbd9   : > { %v2510_v4 = vpop.xlane.xlu0 %2509  ;;  %v2513_v42 = vmul.f32 %v5266_v58, %v5258_v10  ;;  %v5063_v58 = vld [vmem:[#allocation2 + $0x1ec] sm:$0xf] }
 0xbda   : > { %5267 = vrcp.f32 %v2510_v4 }
 0xbdb   : > { %v2515_v45 = vpack.c.bf16 %v2513_v42, %v2513_v42  ;;  %v4704_v42 = vld [vmem:[#allocation2 + $0x1f8] sm:$0xf0] }
 0xbdd   : > { %2619 = vrot.lane.b32.xlu0 %v6337_v47, %s6815_s1  ;;  %v2519_v13 = vunpack.c.l.b16 %v2515_v45  ;;  %v4678_v45 = vld [vmem:[#allocation2 + $0x1c0] sm:$0xf]  ;;  %s665_s1 = sand.u32 1, %s5436_s22  }
 0xbde   : > { %s666_s29 = scalar_lea.vmem [#allocation7], %s665_s1  ;;  %s3887_s30 = scalar_lea.sflag [#allocation4], %s665_s1 }
 0xbdf   : > { %s3897_s12 = sshll.u32 %s666_s29, 4  ;;  %s3898_s12 = int_to_ptr.vmem [resolvable:$true] %s3897_s12 }
 0xbe0   : > { %v5268_v55 = vpop.eup %5267 }
 0xbe1   : > { %v2514_v2 = vmul.f32 %v5268_v55, %v5260_v44  ;;  %v4707_v55 = vor.u32 %v5063_v58, %v4704_v42  ;;  %v5043_v58 = vld [vmem:[#allocation2 + $0x14c] sm:$0xf] }
 0xbe3   : > { %v2516_v18 = vpack.c.bf16 %v2514_v2, %v2514_v2  ;;  %v5060_v2 = vld [vmem:[#allocation2 + $0x1cc] sm:$0xf0] }
 0xbe5   : > { %v2520_v36 = vunpack.c.l.b16 %v2516_v18  ;;  %v5058_v18 = vld [vmem:[#allocation2 + $0x1c4] sm:$0xf] }
 0xbe7   : > { %v2521_v48 = vpack.c.b16 %v2520_v36, %v2519_v13  ;;  %v4679_v13 = vor.u32 %v5060_v2, %v4678_v45  ;;  %v4680_v36 = vld [vmem:[#allocation2 + $0x1d0] sm:$0xf0]  ;;  %v4624_v45 = vld [vmem:[#allocation2 + $0x158] sm:$0xf0]  ;;  %v4598_v2 = vld [vmem:[#allocation2 + $0x120] sm:$0xf] }
 0xbe9   : > { %4523 = vmatmul.msk.bf16.vlgmr.msra.gmra.mxu2 %vm991_vm8, %v2521_v48  ;;  %v4686_v48 = vld [vmem:[#allocation2 + $0x1c8] sm:$0xf] }
 0xbea   : > { %3041 = vmatpush.bf16.msra.mxu2 %v4707_v55 }
 0xc3c   : > { %v2604_v53 = vpop.xlane.xlu0 %2603 }
 0xc3d   : > { %5269 = vrcp.f32 %v2604_v53  ;;  %v4683_v53 = vor.u32 %v5058_v18, %v4680_v36  ;;  %v4627_v18 = vor.u32 %v5043_v58, %v4624_v45  ;;  %v5038_v36 = vld [vmem:[#allocation2 + $0x124] sm:$0xf] }
 0xc43   : > { %v5270_v35 = vpop.eup %5269 }
 0xc44   : > { %v2607_v14 = vpop.xlane.xlu2 %2606  ;;  %v2610_v47 = vmul.f32 %v5270_v35, %v5262_v31  ;;  %v5062_v31 = vld [vmem:[#allocation2 + $0x1e4] sm:$0xf]  ;;  %v5059_v35 = vld [vmem:[#allocation2 + $0x1cc] sm:$0xf] }
 0xc45   : > { %5271 = vrcp.f32 %v2607_v14  ;;  %v4699_v41 = vor.u32 %v5062_v31, %v4696_v51  ;;  %v4687_v14 = vor.u32 %v5061_v0, %v4686_v48  ;;  %v5044_v31 = vld [vmem:[#allocation2 + $0x14c] sm:$0xf0]  ;;  %v4616_v51 = vld [vmem:[#allocation2 + $0x150] sm:$0xf0] }
 0xc46   : > { %v2612_v19 = vpack.c.bf16 %v2610_v47, %v2610_v47  ;;  %v4688_v47 = vld [vmem:[#allocation2 + $0x1d8] sm:$0xf0]  ;;  %v4600_v48 = vld [vmem:[#allocation2 + $0x130] sm:$0xf0] }
 0xc48   : > { %v2616_v28 = vunpack.c.l.b16 %v2612_v19  ;;  %v4662_v19 = vld [vmem:[#allocation2 + $0x1a0] sm:$0xf] }
 0xc4b   : > { %v5272_v38 = vpop.eup %5271 }
 0xc4c   : > { %v2611_v63 = vmul.f32 %v5272_v38, %v5264_v37  ;;  %v4702_v37 = vld [vmem:[#allocation2 + $0x1e8] sm:$0xf]  ;;  %v4691_v38 = vor.u32 %v5059_v35, %v4688_v47  ;;  %v5039_v35 = vld [vmem:[#allocation2 + $0x12c] sm:$0xf]  ;;  %v4603_v47 = vor.u32 %v5038_v36, %v4600_v48 }
 0xc4d   : > { %v4703_v4 = vor.u32 %v5065_v17, %v4702_v37 }
 0xc4e   : > { %v2613_v50 = vpack.c.bf16 %v2611_v63, %v2611_v63  ;;  %v5056_v63 = vld [vmem:[#allocation2 + $0x1ac] sm:$0xf0]  ;;  %3042 = vmatpush.bf16.msra.mxu2 %v4691_v38 }
 0xc4f   : > { %v2620_v52 = vpop.permute.xlu0 %2619  ;;  %3027 = vmatpush.bf16.msrb.mxu1 %v4703_v4  ;;  %v5045_v4 = vld [vmem:[#allocation2 + $0x154] sm:$0xf0] }
 0xc50   : > { %v2617_v11 = vunpack.c.l.b16 %v2613_v50  ;;  %2632 = vmatpush.bf16.msra.mxu0 %v2620_v52  ;;  %v4663_v50 = vor.u32 %v5056_v63, %v4662_v19  ;;  %v4670_v52 = vld [vmem:[#allocation2 + $0x1a8] sm:$0xf]  ;;  %v4608_v19 = vld [vmem:[#allocation2 + $0x138] sm:$0xf0]  ;;  %v4582_v63 = vld [vmem:[#allocation2 + $0x100] sm:$0xf] }
 0xc52   : > { %v2618_v56 = vpack.c.b16 %v2617_v11, %v2616_v28  ;;  %v5057_v28 = vld [vmem:[#allocation2 + $0x1b4] sm:$0xf0]  ;;  %v4667_v11 = vor.u32 %v5054_v54, %v4664_v16  ;;  %v5036_v54 = vld [vmem:[#allocation2 + $0x10c] sm:$0xf0]  ;;  %v5034_v16 = vld [vmem:[#allocation2 + $0x104] sm:$0xf] }
 0xc53   : > { %3028 = vmatpush.bf16.msrb.mxu1 %v4687_v14  ;;  %v5041_v14 = vld [vmem:[#allocation2 + $0x134] sm:$0xf0] }
 0xc54   : > { %4533 = vmatmul.msk.bf16.vlgmr.msra.gmra.mxu0 %vm991_vm8, %v2618_v56  ;;  %v4671_v56 = vor.u32 %v5057_v28, %v4670_v52  ;;  %v4584_v52 = vld [vmem:[#allocation2 + $0x110] sm:$0xf0]  ;;  %v4590_v28 = vld [vmem:[#allocation2 + $0x108] sm:$0xf] }
 0xc55   : > { %3013 = vmatpush.bf16.msrb.mxu0 %v4699_v41  ;;  %v4622_v41 = vld [vmem:[#allocation2 + $0x148] sm:$0xf] }
 0xc56   : > { %v4623_v55 = vor.u32 %v5045_v4, %v4622_v41 }
 0xc57   : > { %3029 = vmatpush.bf16.msrb.mxu1 %v4671_v56  ;;  %v5037_v56 = vld [vmem:[#allocation2 + $0x114] sm:$0xf0] }
 0xc59   : > { %3014 = vmatpush.bf16.msrb.mxu0 %v4683_v53  ;;  %v4606_v53 = vld [vmem:[#allocation2 + $0x128] sm:$0xf] }
 0xc5a   : > { %v4607_v38 = vor.u32 %v5041_v14, %v4606_v53 }
 0xc5d   : > { %3015 = vmatpush.bf16.msrb.mxu0 %v4667_v11 }
 0xc6c   : > { %v2540_v62 = vpop.f32.mrf.mxu2 }
 0xc74   : > { %v2542_v9 = vpop.f32.mrf.mxu2 }
 0xc75   : > { %v2545_v30 = vpack.c.bf16 %v2542_v9, %v2540_v62  ;;  %v4675_v62 = vor.u32 %v5055_v60, %v4672_v43  ;;  %v4646_v9 = vld [vmem:[#allocation2 + $0x180] sm:$0xf]  ;;  %v5035_v60 = vld [vmem:[#allocation2 + $0x10c] sm:$0xf]  ;;  %v4592_v43 = vld [vmem:[#allocation2 + $0x118] sm:$0xf0] }
 0xc77   : > { %4575 = vmatmul.msk.bf16.vlgmr.msrb.gmra.mxu2 %vm963_vm7, %v2545_v30  ;;  %v5052_v30 = vld [vmem:[#allocation2 + $0x18c] sm:$0xf0] }
 0xc78   : > { %3043 = vmatpush.bf16.msra.mxu2 %v4675_v62  ;;  %v4647_v61 = vor.u32 %v5052_v30, %v4646_v9  ;;  %v4583_v9 = vor.u32 %v5036_v54, %v4582_v63  ;;  %v4587_v30 = vor.u32 %v5034_v16, %v4584_v52 }
 0xcd1   : > { %v2634_v39 = vpop.f32.mrf.mxu0 }
 0xcd9   : > { %v2636_v20 = vpop.f32.mrf.mxu0 }
 0xcda   : > { %v2639_v3 = vpack.c.bf16 %v2636_v20, %v2634_v39  ;;  %v4654_v39 = vld [vmem:[#allocation2 + $0x188] sm:$0xf]  ;;  %v5053_v20 = vld [vmem:[#allocation2 + $0x194] sm:$0xf0] }
 0xcdc   : > { %4558 = vmatmul.msk.bf16.vlgmr.msra.gmra.mxu1 %vm963_vm7, %v2639_v3  ;;  %v4651_v3 = vor.u32 %v5050_v32, %v4648_v34  ;;  %v4591_v32 = vor.u32 %v5037_v56, %v4590_v28 }
 0xcde   : > { %3016 = vmatpush.bf16.msrb.mxu0 %v4651_v3 }
 0xcfa   : > { %v2726_v15 = vpop.f32.mrf.mxu2 }
 0xd02   : > { %v2728_v40 = vpop.f32.mrf.mxu2 }
 0xd59   : > { %v2685_v57 = vpop.f32.mrf.mxu1 }
 0xd5a   : > { %v2727_v22 = vadd.f32 %v2726_v15, %v2685_v57  ;;  %v4655_v15 = vor.u32 %v5053_v20, %v4654_v39  ;;  %v4656_v57 = vld [vmem:[#allocation2 + $0x198] sm:$0xf0]  ;;  %v4595_v39 = vor.u32 %v5035_v60, %v4592_v43 }
 0xd5c   : > { %v2736_v25 = vadd.f32 %v5189_v7, %v2727_v22  ;;  %3030 = vmatpush.bf16.msrb.mxu1 %v4655_v15 }
 0xd5e   : > { %v2738_v29 = vadd.f32 %v2736_v25, %v6325_v27  ;;  %v4630_v25 = vld [vmem:[#allocation2 + $0x160] sm:$0xf] }
 0xd60   : > { %2744 = vadd.xlane.f32.xlu1 %v2738_v29 }
 0xd61   : > { %v2687_v26 = vpop.f32.mrf.mxu1 }
 0xd62   : > { %v2729_v12 = vadd.f32 %v2728_v40, %v2687_v26  ;;  %v5046_v40 = vld [vmem:[#allocation2 + $0x164] sm:$0xf] }
 0xd64   : > { %v2737_v10 = vadd.f32 %v5189_v7, %v2729_v12  ;;  %v5051_v7 = vld [vmem:[#allocation2 + $0x18c] sm:$0xf]  ;;  %v4632_v12 = vld [vmem:[#allocation2 + $0x170] sm:$0xf0] }
 0xd65   : > { %v4659_v22 = vor.u32 %v5051_v7, %v4656_v57 }
 0xd66   : > { %v2739_v49 = vadd.f32 %v2737_v10, %v6327_v23  ;;  %v4694_v23 = vld [vmem:[#allocation2 + $0x1e0] sm:$0xf]  ;;  %v4638_v10 = vld [vmem:[#allocation2 + $0x168] sm:$0xf] }
 0xd67   : > { %v4695_v33 = vor.u32 %v5064_v5, %v4694_v23  ;;  %3044 = vmatpush.bf16.msra.mxu2 %v4659_v22 }
 0xd68   : > { %2746 = vadd.xlane.f32.xlu2 %v2739_v49 }
 0xd69   : > { %2999 = vmatpush.bf16.msra.mxu3 %v4695_v33  ;;  %v5042_v33 = vld [vmem:[#allocation2 + $0x144] sm:$0xf] }
 0xd6a   : > { %v4619_v17 = vor.u32 %v5042_v33, %v4616_v51 }
 0xd6d   : > { %3000 = vmatpush.bf16.msra.mxu3 %v4679_v13  ;;  %v5040_v13 = vld [vmem:[#allocation2 + $0x12c] sm:$0xf0] }
 0xd6e   : > { %v4599_v0 = vor.u32 %v5040_v13, %v4598_v2 }
 0xd71   : > { %3001 = vmatpush.bf16.msra.mxu3 %v4663_v50  ;;  %v4611_v50 = vor.u32 %v5039_v35, %v4608_v19 }
 0xd75   : > { %3002 = vmatpush.bf16.msra.mxu3 %v4647_v61 }
 0xdd3   : > { %v2745_v46 = vpop.xlane.xlu1 %2744 }
 0xdd4   : > { %v2748_v44 = vmul.f32 %v2745_v46, %v5642_v8 }
 0xdd6   : > { %v6389_v6 = vsub.f32 %v2738_v29, %v2748_v44  ;;  %v5048_v29 = vld [vmem:[#allocation2 + $0x16c] sm:$0xf0]  ;;  %v4635_v44 = vor.u32 %v5046_v40, %v4632_v12 }
 0xdd7   : > { %v4631_v26 = vor.u32 %v5048_v29, %v4630_v25 }
 0xdd8   : > { %v2752_v24 = vmul.f32 %v6389_v6, %v6389_v6  ;;  %3017 = vmatpush.bf16.msrb.mxu0 %v4635_v44 }
 0xdd9   : > { %3003 = vmatpush.bf16.msra.mxu3 %v4631_v26 }
 0xdda   : > { %2754 = vadd.xlane.f32.xlu1 %v2752_v24 }
 0xddb   : > { %v2747_v21 = vpop.xlane.xlu2 %2746 }
 0xddc   : > { %v2749_v27 = vmul.f32 %v2747_v21, %v5642_v8  ;;  %v5047_v21 = vld [vmem:[#allocation2 + $0x16c] sm:$0xf]  ;;  %3018 = vmatpush.bf16.msrb.mxu0 %v4619_v17 }
 0xdde   : > { %v6394_v59 = vsub.f32 %v2739_v49, %v2749_v27  ;;  %v5049_v49 = vld [vmem:[#allocation2 + $0x174] sm:$0xf0]  ;;  %v4640_v27 = vld [vmem:[#allocation2 + $0x178] sm:$0xf0] }
 0xddf   : > { %v4639_v24 = vor.u32 %v5049_v49, %v4638_v10  ;;  %v4643_v5 = vor.u32 %v5047_v21, %v4640_v27  ;;  %v5190_v49 = vld [vmem:[%s6770_s8 + $0x1] ss:$0 sm:$0xff] }
 0xde0   : > { %v2753_v1 = vmul.f32 %v6394_v59, %v6394_v59  ;;  %3019 = vmatpush.bf16.msrb.mxu0 %v4603_v47  ;;  %v5191_v27 = vld [vmem:[%s6771_s9 + $0x1] ss:$0 sm:$0xff] }
 0xde1   : > { %3031 = vmatpush.bf16.msrb.mxu1 %v4639_v24  ;;  %3045 = vmatpush.bf16.msra.mxu2 %v4643_v5 }
 0xde2   : > { %2756 = vadd.xlane.f32.xlu2 %v2753_v1  ;;  %v4614_v1 = vld [vmem:[#allocation2 + $0x140] sm:$0xf] }
 0xde3   : > { %v4615_v37 = vor.u32 %v5044_v31, %v4614_v1  ;;  %v6414_v31 = vld [vmem:[%s6773_s11 + $0x4] sm:$0xf] }
 0xde4   : > { %3020 = vmatpush.bf16.msrb.mxu0 %v4587_v30  ;;  %v2833_v33 = vperm.slane %v6414_v31, 2  ;;  %v2831_v58 = vperm.slane %v6414_v31, 0 }
 0xde5   : > { %3004 = vmatpush.bf16.msra.mxu3 %v4615_v37  ;;  %3032 = vmatpush.bf16.msrb.mxu1 %v4623_v55  ;;  %v2834_v55 = vperm.slane %v6414_v31, 3 }
 0xde6   : > { %3046 = vmatpush.bf16.msra.mxu2 %v4627_v18 }
 0xde9   : > { %3005 = vmatpush.bf16.msra.mxu3 %v4599_v0  ;;  %3033 = vmatpush.bf16.msrb.mxu1 %v4607_v38 }
 0xdea   : > { %3047 = vmatpush.bf16.msra.mxu2 %v4611_v50 }
 0xded   : > { %3006 = vmatpush.bf16.msra.mxu3 %v4583_v9  ;;  %3034 = vmatpush.bf16.msrb.mxu1 %v4591_v32 }
 0xdee   : > { %3048 = vmatpush.bf16.msra.mxu2 %v4595_v39 }
 0xe4d   : > { %v2755_v46 = vpop.xlane.xlu1 %2754 }
 0xe4e   : > { %v2758_v23 = vmul.f32 %v2755_v46, %v5642_v8 }
 0xe50   : > { %v2760_v42 = vadd.f32 1e-12, %v2758_v23 }
 0xe52   : > { %5273 = vrsqrt.f32 %v2760_v42  ;;  %vm2768_vm8 = vweird.f32 %v2760_v42 }
 0xe55   : > { %v2757_v11 = vpop.xlane.xlu2 %2756 }
 0xe56   : > { %v2759_v62 = vmul.f32 %v2757_v11, %v5642_v8 }
 0xe58   : > { %v5274_v61 = vpop.eup %5273  ;;  %v2761_v34 = vadd.f32 1e-12, %v2759_v62 }
 0xe59   : > { %v2763_v20 = vmul.f32 %v5274_v61, %v2760_v42  ;;  %vm2769_vm7 = vweird.f32 %v5274_v61 }
 0xe5a   : > { %5275 = vrsqrt.f32 %v2761_v34  ;;  %vm2770_vm3 = vmor %vm2768_vm8, %vm2769_vm7  ;;  %vm2778_vm5 = vweird.f32 %v2761_v34 }
 0xe5b   : > { %v2764_v3 = vmul.f32 %v5274_v61, %v2763_v20 }
 0xe5d   : > { %v2765_v15 = vmul.f32 0.5, %v2764_v3 }
 0xe5f   : > { %v2766_v7 = vsub.f32 1.5, %v2765_v15 }
 0xe60   : > { %v5276_v57 = vpop.eup %5275 }
 0xe61   : > { %v2767_v22 = vmul.f32 %v5274_v61, %v2766_v7  ;;  %v2773_v25 = vmul.f32 %v5276_v57, %v2761_v34  ;;  %vm2779_vm4 = vweird.f32 %v5276_v57 }
 0xe62   : > { %vm2780_vm6 = vmor %vm2778_vm5, %vm2779_vm4 }
 0xe63   : > { %v2774_v29 = vmul.f32 %v5276_v57, %v2773_v25  ;;  %v2771_v40 = vsel %vm2770_vm3, %v5274_v61, %v2767_v22 }
 0xe64   : > { %v2782_v10 = vmul.f32 %v2771_v40, %v6389_v6 }
 0xe65   : > { %v2775_v26 = vmul.f32 0.5, %v2774_v29 }
 0xe66   : > { %v2787_v21 = vmul.f32 %v5190_v49, %v2782_v10 }
 0xe67   : > { %v2776_v12 = vsub.f32 1.5, %v2775_v26 }
 0xe68   : > { %v6408_v23 = vadd.f32 %v5191_v27, %v2787_v21 }
 0xe69   : > { %v2777_v46 = vmul.f32 %v5276_v57, %v2776_v12 }
 0xe6b   : > { %v2781_v44 = vsel %vm2780_vm6, %v5276_v57, %v2777_v46 }
 0xe6c   : > { %v2783_v24 = vmul.f32 %v2781_v44, %v6394_v59  ;;  %v2832_v59 = vperm.slane %v6414_v31, 1 }
 0xe6e   : > { %v2788_v1 = vmul.f32 %v5190_v49, %v2783_v24 }
 0xe70   : > { %v2793_v5 = vadd.f32 %v5191_v27, %v2788_v1 }
 0xe72   : > { %v2794_v6 = vpack.c.bf16 %v2793_v5, %v6408_v23 }
 0xe74   : > { %3007 = vmatmul.bf16.vlgmr.msra.gmra.mxu3 %v2794_v6  ;;  %3021 = vmatmul.bf16.vlgmr.msrb.gmra.mxu0 %v2794_v6 }
 0xe75   : > { %3035 = vmatmul.bf16.vlgmr.msrb.gmra.mxu1 %v2794_v6  ;;  %3049 = vmatmul.bf16.vlgmr.msra.gmra.mxu2 %v2794_v6 }
 0xef1   : > { %v3022_v51 = vpop.f32.mrf.mxu0 }
 0xef2   : > { %v6418_v37 = vadd.f32 %v3022_v51, %v2832_v59  ;;  %v3036_v17 = vpop.f32.mrf.mxu1 }
 0xef3   : > { %v6420_v41 = vadd.f32 %v3036_v17, %v2833_v33 }
 0xef4   : > { %v6423_v4 = vmul.f32 0.70710677, %v6418_v37 }
 0xef5   : > { %v6427_v42 = vmul.f32 0.70710677, %v6420_v41 }
 0xef6   : > { %v6431_v45 = vand.u32 2147483647, %v6423_v4 }
 0xef7   : > { %v6434_v2 = vand.u32 2147483647, %v6427_v42  ;;  %v3008_v18 = vpop.f32.mrf.mxu3 }
 0xef8   : > { %v3080_v13 = vmul.f32 0.3275911, %v6431_v45  ;;  %v6439_v36 = vadd.f32 %v3008_v18, %v2831_v58  ;;  %v3050_v48 = vpop.f32.mrf.mxu2 }
 0xef9   : > { %v3081_v0 = vmul.f32 0.3275911, %v6434_v2  ;;  %v6444_v53 = vadd.f32 %v3050_v48, %v2834_v55  ;;  %v3024_v56 = vpop.f32.mrf.mxu0 }
 0xefa   : > { %v3088_v14 = vadd.f32 1.0, %v3080_v13  ;;  %v6447_v47 = vmul.f32 0.70710677, %v6439_v36  ;;  %v3038_v62 = vpop.f32.mrf.mxu1  ;;  %v6466_v34 = vadd.f32 %v3024_v56, %v2832_v59 }
 0xefb   : > { %v3089_v35 = vadd.f32 1.0, %v3081_v0  ;;  %v6450_v38 = vmul.f32 0.70710677, %v6444_v53  ;;  %v6468_v3 = vadd.f32 %v3038_v62, %v2833_v33 }
 0xefc   : > { %5277 = vrcp.f32 %v3088_v14  ;;  %v6453_v19 = vand.u32 2147483647, %v6447_v47  ;;  %v3119_v30 = vand.u32 2147483647, %v3088_v14  ;;  %v3121_v32 = vand.u32 2147483648, %v3088_v14 }
 0xefd   : > { %5279 = vrcp.f32 %v3089_v35  ;;  %v6456_v63 = vand.u32 2147483647, %v6450_v38  ;;  %v3136_v20 = vand.u32 2147483648, %v3089_v35  ;;  %v3134_v7 = vand.u32 2147483647, %v3089_v35 }
 0xefe   : > { %v3079_v54 = vmul.f32 0.3275911, %v6453_v19  ;;  %vm3115_vm11 = vweird.f32 %v3088_v14  ;;  %v3122_v22 = vor.u32 1.1754944e-38, %v3121_v32  ;;  %vm3130_vm13 = vweird.f32 %v3089_v35 }
 0xeff   : > { %v3082_v16 = vmul.f32 0.3275911, %v6456_v63  ;;  %v6471_v29 = vmul.f32 0.70710677, %v6466_v34  ;;  %vm3120_vm14 = vcmp.eq.f32.partialorder %v3119_v30, 8.507059e+37  ;;  %v3137_v12 = vor.u32 1.1754944e-38, %v3136_v20 }
 0xf00   : > { %v6460_v11 = vadd.f32 1.0, %v3079_v54  ;;  %v6474_v10 = vmul.f32 0.70710677, %v6468_v3  ;;  %vm3135_vm0 = vcmp.eq.f32.partialorder %v3134_v7, 8.507059e+37 }
 0xf01   : > { %v6462_v43 = vadd.f32 1.0, %v3082_v16  ;;  %v6488_v59 = vand.u32 2147483647, %v6471_v29 }
 0xf02   : > { %v5278_v50 = vpop.eup %5277  ;;  %5281 = vrcp.f32 %v6460_v11  ;;  %v6491_v17 = vand.u32 2147483647, %v6474_v10  ;;  %v3106_v16 = vand.u32 2147483648, %v6460_v11  ;;  %vm3100_vm2 = vweird.f32 %v6460_v11 }
 0xf03   : > { %v5280_v52 = vpop.eup %5279  ;;  %v3111_v28 = vmul.f32 %v5278_v50, %v3088_v14  ;;  %5283 = vrcp.f32 %v6462_v43  ;;  %vm3116_vm9 = vweird.f32 %v5278_v50  ;;  %v3084_v48 = vmul.f32 0.3275911, %v6488_v59 }
 0xf04   : > { %v3126_v60 = vmul.f32 %v5280_v52, %v3089_v35  ;;  %vm3131_vm10 = vweird.f32 %v5280_v52  ;;  %vm3117_vm12 = vmor %vm3115_vm11, %vm3116_vm9  ;;  %v3288_v14 = vsub.f32 0.0, %v6431_v45  ;;  %v3085_v35 = vmul.f32 0.3275911, %v6491_v17 }
 0xf05   : > { %v3112_v9 = vsub.f32 1.0, %v3111_v28  ;;  %vm3132_vm15 = vmor %vm3130_vm13, %vm3131_vm10  ;;  %vm3145_vm4 = vweird.f32 %v6462_v43 }
 0xf06   : > { %v3127_v61 = vsub.f32 1.0, %v3126_v60  ;;  %v6504_v60 = vadd.f32 1.0, %v3085_v35  ;;  %v3296_v30 = vmul.f32 %v3288_v14, %v6431_v45  ;;  %v3149_v45 = vand.u32 2147483647, %v6462_v43 }
 0xf07   : > { %v3113_v39 = vmul.f32 %v5278_v50, %v3112_v9  ;;  %v3289_v9 = vsub.f32 0.0, %v6434_v2 }
 0xf08   : > { %v3128_v15 = vmul.f32 %v5280_v52, %v3127_v61  ;;  %v5282_v40 = vpop.eup %5281  ;;  %v3107_v61 = vor.u32 1.1754944e-38, %v3106_v16  ;;  %vm3150_vm6 = vcmp.eq.f32.partialorder %v3149_v45, 8.507059e+37  ;;  %v3287_v45 = vsub.f32 0.0, %v6453_v19 }
 0xf09   : > { %v3114_v57 = vadd.f32 %v5278_v50, %v3113_v39  ;;  %v6476_v49 = vpop.eup %5283  ;;  %v3096_v24 = vmul.f32 %v5282_v40, %v6460_v11  ;;  %vm3101_vm1 = vweird.f32 %v5282_v40 }
 0xf0a   : > { %v3129_v25 = vadd.f32 %v5280_v52, %v3128_v15  ;;  %v3141_v1 = vmul.f32 %v6476_v49, %v6462_v43  ;;  %vm3102_vm7 = vmor %vm3100_vm2, %vm3101_vm1  ;;  %vm3146_vm3 = vweird.f32 %v6476_v49  ;;  %v3297_v15 = vmul.f32 %v3289_v9, %v6434_v2 }
 0xf0b   : > { %v3118_v26 = vsel %vm3117_vm12, %v5278_v50, %v3114_v57  ;;  %v3097_v6 = vsub.f32 1.0, %v3096_v24  ;;  %v3104_v50 = vand.u32 2147483647, %v6460_v11  ;;  %v3151_v57 = vand.u32 2147483648, %v6462_v43  ;;  %vm3147_vm5 = vmor %vm3145_vm4, %vm3146_vm3 }
 0xf0c   : > { %v6478_v46 = vsel %vm3120_vm14, %v3122_v22, %v3118_v26  ;;  %v3133_v44 = vsel %vm3132_vm15, %v5280_v52, %v3129_v25  ;;  %v3142_v51 = vsub.f32 1.0, %v3141_v1  ;;  %v6499_v52 = vadd.f32 1.0, %v3084_v48  ;;  %v3010_v25 = vpop.f32.mrf.mxu3 }
 0xf0d   : > { %v3216_v21 = vmul.f32 1.0614054, %v6478_v46  ;;  %v6482_v27 = vsel %vm3135_vm0, %v3137_v12, %v3133_v44  ;;  %v3098_v13 = vmul.f32 %v5282_v40, %v3097_v6  ;;  %vm3105_vm8 = vcmp.eq.f32.partialorder %v3104_v50, 8.507059e+37 }
 0xf0e   : > { %v3217_v5 = vmul.f32 1.0614054, %v6482_v27  ;;  %v3143_v56 = vmul.f32 %v6476_v49, %v3142_v51  ;;  %5285 = vrcp.f32 %v6499_v52  ;;  %v3305_v22 = vmul.f32 1.442695, %v3296_v30 }
 0xf0f   : > { %v3224_v33 = vadd.f32 -1.4531521, %v3216_v21  ;;  %v3099_v54 = vadd.f32 %v5282_v40, %v3098_v13  ;;  %5287 = vrcp.f32 %v6504_v60  ;;  %v3307_v21 = vmul.f32 1.442695, %v3297_v15 }
 0xf10   : > { %v3225_v18 = vadd.f32 -1.4531521, %v3217_v5  ;;  %v3144_v20 = vadd.f32 %v6476_v49, %v3143_v56  ;;  %v3152_v1 = vor.u32 1.1754944e-38, %v3151_v57  ;;  %v6525_v5 = vadd.f32 %v3010_v25, %v2831_v58 }
 0xf11   : > { %v3232_v0 = vmul.f32 %v3224_v33, %v6478_v46  ;;  %v3103_v32 = vsel %vm3102_vm7, %v5282_v40, %v3099_v54  ;;  %5289 = vpow2.f32 %v3305_v22  ;;  %v3181_v33 = vand.u32 2147483648, %v6499_v52 }
 0xf12   : > { %v3233_v28 = vmul.f32 %v3225_v18, %v6482_v27  ;;  %v6514_v7 = vsel %vm3105_vm8, %v3107_v61, %v3103_v32  ;;  %v3148_v44 = vsel %vm3147_vm5, %v6476_v49, %v3144_v20  ;;  %v3179_v18 = vand.u32 2147483647, %v6499_v52  ;;  %v5081_v32 = vld [vmem:[#allocation5 + $0x178] sm:$0xff] }
 0xf13   : > { %v3240_v62 = vadd.f32 1.4214138, %v3232_v0  ;;  %v3215_v12 = vmul.f32 1.0614054, %v6514_v7  ;;  %v6528_v51 = vsel %vm3150_vm6, %v3152_v1, %v3148_v44  ;;  %v3292_v49 = vsub.f32 0.0, %v6488_v59  ;;  %3654 = vmatpush.bf16.msra.mxu0 %v5081_v32 }
 0xf14   : > { %v3241_v39 = vadd.f32 1.4214138, %v3233_v28  ;;  %v5286_v40 = vpop.eup %5285  ;;  %vm3175_vm10 = vweird.f32 %v6499_v52  ;;  %v6536_v54 = vmul.f32 0.70710677, %v6525_v5  ;;  %v3218_v50 = vmul.f32 1.0614054, %v6528_v51 }
 0xf15   : > { %v3248_v11 = vmul.f32 %v3240_v62, %v6478_v46  ;;  %v3171_v2 = vmul.f32 %v5286_v40, %v6499_v52  ;;  %v5288_v6 = vpop.eup %5287  ;;  %v3223_v0 = vadd.f32 -1.4531521, %v3215_v12  ;;  %vm3176_vm9 = vweird.f32 %v5286_v40  ;;  %v5089_v52 = vld [vmem:[#allocation5 + $0x1b8] sm:$0xff] }
 0xf16   : > { %v3249_v26 = vmul.f32 %v3241_v39, %v6482_v27  ;;  %v3186_v13 = vmul.f32 %v5288_v6, %v6504_v60  ;;  %v3182_v28 = vor.u32 1.1754944e-38, %v3181_v33  ;;  %v3196_v56 = vand.u32 2147483648, %v6504_v60  ;;  %vm3177_vm11 = vmor %vm3175_vm10, %vm3176_vm9  ;;  %3667 = vmatpush.bf16.msra.mxu1 %v5089_v52 }
 0xf17   : > { %v3256_v24 = vadd.f32 -0.28449672, %v3248_v11  ;;  %v3172_v43 = vsub.f32 1.0, %v3171_v2  ;;  %vm3191_vm12 = vweird.f32 %v5288_v6  ;;  %v3194_v9 = vand.u32 2147483647, %v6504_v60  ;;  %v5290_v61 = vpop.eup %5289  ;;  %v5080_v2 = vld [vmem:[#allocation5 + $0x170] sm:$0xff] }
 0xf18   : > { %v3257_v48 = vadd.f32 -0.28449672, %v3249_v26  ;;  %v3187_v35 = vsub.f32 1.0, %v3186_v13  ;;  %v6542_v30 = vand.u32 2147483647, %v6536_v54  ;;  %v3231_v20 = vmul.f32 %v3223_v0, %v6514_v7  ;;  %3655 = vmatpush.bf16.msra.mxu0 %v5080_v2 }
 0xf19   : > { %v3173_v14 = vmul.f32 %v5286_v40, %v3172_v43  ;;  %v3264_v58 = vmul.f32 %v3256_v24, %v6478_v46  ;;  %vm3180_vm13 = vcmp.eq.f32.partialorder %v3179_v18, 8.507059e+37  ;;  %vm3190_vm14 = vweird.f32 %v6504_v60  ;;  %v5088_v24 = vld [vmem:[#allocation5 + $0x1b0] sm:$0xff]  ;;  %v3052_v18 = vpop.f32.mrf.mxu2 }
 0xf1a   : > { %v3188_v62 = vmul.f32 %v5288_v6, %v3187_v35  ;;  %v3265_v39 = vmul.f32 %v3257_v48, %v6482_v27  ;;  %vm3192_vm15 = vmor %vm3190_vm14, %vm3191_vm12  ;;  %v3197_v26 = vor.u32 1.1754944e-38, %v3196_v56  ;;  %v3083_v12 = vmul.f32 0.3275911, %v6542_v30  ;;  %3668 = vmatpush.bf16.msra.mxu1 %v5088_v24 }
 0xf1b   : > { %v3174_v16 = vadd.f32 %v5286_v40, %v3173_v14  ;;  %v3272_v15 = vadd.f32 0.2548296, %v3264_v58  ;;  %5291 = vpow2.f32 %v3307_v21  ;;  %vm3195_vm0 = vcmp.eq.f32.partialorder %v3194_v9, 8.507059e+37  ;;  %v5073_v21 = vld [vmem:[#allocation5 + $0x138] sm:$0xff] }
 0xf1c   : > { %v3189_v22 = vadd.f32 %v5288_v6, %v3188_v62  ;;  %v3293_v44 = vsub.f32 0.0, %v6491_v17  ;;  %v3273_v1 = vadd.f32 0.2548296, %v3265_v39  ;;  %v3239_v60 = vadd.f32 1.4214138, %v3231_v20  ;;  %3641 = vmatpush.bf16.msrb.mxu3 %v5073_v21  ;;  %v5096_v39 = vld [vmem:[#allocation5 + $0x1f0] sm:$0xff] }
 0xf1d   : > { %v3178_v11 = vsel %vm3177_vm11, %v5286_v40, %v3174_v16  ;;  %v3280_v13 = vmul.f32 %v3272_v15, %v6478_v46  ;;  %v3300_v48 = vmul.f32 %v3292_v49, %v6488_v59  ;;  %v6559_v14 = vadd.f32 1.0, %v3083_v12  ;;  %v5079_v59 = vld [vmem:[#allocation5 + $0x168] sm:$0xff]  ;;  %v5086_v12 = vld [vmem:[#allocation5 + $0x1a0] sm:$0xff] }
 0xf1e   : > { %v6546_v57 = vsel %vm3180_vm13, %v3182_v28, %v3178_v11  ;;  %v3193_v40 = vsel %vm3192_vm15, %v5288_v6, %v3189_v22  ;;  %v5097_v6 = vld [vmem:[#allocation5 + $0x1f8] sm:$0xff]  ;;  %v3295_v58 = vmul.f32 %v3287_v45, %v6453_v19  ;;  %v3226_v35 = vadd.f32 -1.4531521, %v3218_v50  ;;  %v5087_v49 = vld [vmem:[#allocation5 + $0x1a8] sm:$0xff]  ;;  %3656 = vmatpush.bf16.msra.mxu0 %v5079_v59 }
 0xf1f   : > { %v3220_v25 = vmul.f32 1.0614054, %v6546_v57  ;;  %v6554_v33 = vsel %vm3195_vm0, %v3197_v26, %v3193_v40  ;;  %v3301_v56 = vmul.f32 %v3293_v44, %v6491_v17  ;;  %5293 = vrcp.f32 %v6559_v14  ;;  %3680 = vmatpush.bf16.msrb.mxu2 %v5097_v6  ;;  %3669 = vmatpush.bf16.msra.mxu1 %v5087_v49  ;;  %v5077_v6 = vld [vmem:[#allocation5 + $0x158] sm:$0xff] }
 0xf20   : > { %v3221_v0 = vmul.f32 1.0614054, %v6554_v33  ;;  %v6567_v46 = vadd.f32 %v3052_v18, %v2834_v55  ;;  %v3281_v62 = vmul.f32 %v3273_v1, %v6482_v27  ;;  %v3247_v19 = vmul.f32 %v3239_v60, %v6514_v7  ;;  %v5072_v55 = vld [vmem:[#allocation5 + $0x130] sm:$0xff]  ;;  %v5071_v1 = vld [vmem:[#allocation5 + $0x128] sm:$0xff] }
 0xf21   : > { %v3228_v43 = vadd.f32 -1.4531521, %v3220_v25  ;;  %v5292_v9 = vpop.eup %5291  ;;  %v6572_v32 = vmul.f32 0.5, %v6418_v37  ;;  %v6574_v17 = vmul.f32 %v5290_v61, %v3280_v13  ;;  %v3313_v52 = vmul.f32 1.442695, %v3300_v48  ;;  %3642 = vmatpush.bf16.msrb.mxu3 %v5072_v55  ;;  %v5095_v60 = vld [vmem:[#allocation5 + $0x1e8] sm:$0xff] }
 0xf22   : > { %v3229_v28 = vadd.f32 -1.4531521, %v3221_v0  ;;  %v6578_v20 = vmul.f32 0.5, %v6420_v41  ;;  %v3303_v27 = vmul.f32 1.442695, %v3295_v58  ;;  %v3234_v11 = vmul.f32 %v3226_v35, %v6528_v51  ;;  %v5078_v41 = vld [vmem:[#allocation5 + $0x160] sm:$0xff] }
 0xf23   : > { %v3236_v16 = vmul.f32 %v3228_v43, %v6546_v57  ;;  %v3315_v37 = vmul.f32 1.442695, %v3301_v56  ;;  %v6583_v61 = vmul.f32 0.70710677, %v6567_v46  ;;  %3681 = vmatpush.bf16.msrb.mxu2 %v5096_v39  ;;  %vm3336_vm1 = vcmp.lt.f32.partialorder %v6423_v4, 0.0  ;;  %3657 = vmatpush.bf16.msra.mxu0 %v5078_v41  ;;  %v5085_v56 = vld [vmem:[#allocation5 + $0x198] sm:$0xff] }
 0xf24   : > { %v3237_v31 = vmul.f32 %v3229_v28, %v6554_v33  ;;  %v6586_v45 = vmul.f32 %v5292_v9, %v3281_v62  ;;  %v3255_v25 = vadd.f32 -0.28449672, %v3247_v19  ;;  %v3328_v44 = vsub.f32 1.0, %v6574_v17  ;;  %3670 = vmatpush.bf16.msra.mxu1 %v5086_v12  ;;  %v5094_v9 = vld [vmem:[#allocation5 + $0x1e0] sm:$0xff] }
 0xf25   : > { %v3244_v50 = vadd.f32 1.4214138, %v3236_v16  ;;  %v6588_v40 = vpop.eup %5293  ;;  %5295 = vpow2.f32 %v3313_v52  ;;  %v6593_v24 = vand.u32 2147483647, %v6583_v61  ;;  %v3242_v43 = vadd.f32 1.4214138, %v3234_v11  ;;  %3643 = vmatpush.bf16.msrb.mxu3 %v5071_v1 }
 0xf26   : > { %v3245_v22 = vadd.f32 1.4214138, %v3237_v31  ;;  %5297 = vpow2.f32 %v3303_v27  ;;  %v3156_v13 = vmul.f32 %v6588_v40, %v6559_v14  ;;  %vm3337_vm2 = vcmp.lt.f32.partialorder %v6427_v42, 0.0  ;;  %v5069_v1 = vld [vmem:[#allocation5 + $0x118] sm:$0xff] }
 0xf27   : > { %v3252_v15 = vmul.f32 %v3244_v50, %v6546_v57  ;;  %v3290_v48 = vsub.f32 0.0, %v6456_v63  ;;  %5299 = vpow2.f32 %v3315_v37  ;;  %v3086_v21 = vmul.f32 0.3275911, %v6593_v24  ;;  %3682 = vmatpush.bf16.msrb.mxu2 %v5095_v60  ;;  %v5070_v50 = vld [vmem:[#allocation5 + $0x120] sm:$0xff]  ;;  %3658 = vmatpush.bf16.msra.mxu0 %v5077_v6  ;;  %v5093_v60 = vld [vmem:[#allocation5 + $0x1d8] sm:$0xff] }
 0xf28   : > { %v3253_v2 = vmul.f32 %v3245_v22, %v6554_v33  ;;  %v3329_v58 = vsub.f32 1.0, %v6586_v45  ;;  %v3263_v35 = vmul.f32 %v3255_v25, %v6514_v7  ;;  %v3157_v28 = vsub.f32 1.0, %v3156_v13  ;;  %3671 = vmatpush.bf16.msra.mxu1 %v5085_v56  ;;  %v5068_v56 = vld [vmem:[#allocation5 + $0x110] sm:$0xff] }
 0xf29   : > { %v3260_v26 = vadd.f32 -0.28449672, %v3252_v15  ;;  %v3344_v59 = vsub.f32 0.0, %v3328_v44  ;;  %v3166_v62 = vand.u32 2147483648, %v6559_v14  ;;  %v6605_v19 = vadd.f32 1.0, %v3086_v21  ;;  %3644 = vmatpush.bf16.msrb.mxu3 %v5070_v50  ;;  %v5084_v15 = vld [vmem:[#allocation5 + $0x190] sm:$0xff] }
 0xf2a   : > { %v3261_v0 = vadd.f32 -0.28449672, %v3253_v2  ;;  %v3158_v52 = vmul.f32 %v6588_v40, %v3157_v28  ;;  %vm3161_vm7 = vweird.f32 %v6588_v40  ;;  %v3164_v31 = vand.u32 2147483647, %v6559_v14 }
 0xf2b   : > { %v3268_v18 = vmul.f32 %v3260_v26, %v6546_v57  ;;  %v5296_v55 = vpop.eup %5295  ;;  %v3250_v39 = vmul.f32 %v3242_v43, %v6528_v51  ;;  %v6613_v27 = vmul.f32 %v3290_v48, %v6456_v63  ;;  %5301 = vrcp.f32 %v6605_v19  ;;  %3683 = vmatpush.bf16.msrb.mxu2 %v5094_v9  ;;  %v5083_v48 = vld [vmem:[#allocation5 + $0x188] sm:$0xff] }
 0xf2c   : > { %v3269_v49 = vmul.f32 %v3261_v0, %v6554_v33  ;;  %v6616_v22 = vpop.eup %5297  ;;  %v3345_v37 = vsub.f32 0.0, %v3329_v58  ;;  %v3159_v25 = vadd.f32 %v6588_v40, %v3158_v52  ;;  %vm3160_vm8 = vweird.f32 %v6559_v14  ;;  %3672 = vmatpush.bf16.msra.mxu1 %v5084_v15  ;;  %v5082_v52 = vld [vmem:[#allocation5 + $0x180] sm:$0xff] }
 0xf2d   : > { %v3276_v16 = vadd.f32 0.2548296, %v3268_v18  ;;  %v5300_v26 = vpop.eup %5299  ;;  %v3352_v63 = vsel %vm3336_vm1, %v3344_v59, %v3328_v44  ;;  %v3060_v41 = vmul.f32 0.5, %v6466_v34  ;;  %vm3162_vm3 = vmor %vm3160_vm8, %vm3161_vm7  ;;  %v3167_v2 = vor.u32 1.1754944e-38, %v3166_v62  ;;  %3645 = vmatpush.bf16.msrb.mxu3 %v5069_v1  ;;  %v5092_v59 = vld [vmem:[#allocation5 + $0x1d0] sm:$0xff] }
 0xf2e   : > { %v3277_v11 = vadd.f32 0.2548296, %v3269_v49  ;;  %v3271_v43 = vadd.f32 0.2548296, %v3263_v35  ;;  %v3163_v13 = vsel %vm3162_vm3, %v6588_v40, %v3159_v25  ;;  %vm3165_vm4 = vcmp.eq.f32.partialorder %v3164_v31, 8.507059e+37 }
 0xf2f   : > { %v3284_v17 = vmul.f32 %v3276_v16, %v6546_v57  ;;  %v5076_v57 = vld [vmem:[#allocation5 + $0x150] sm:$0xff]  ;;  %v3258_v14 = vadd.f32 -0.28449672, %v3250_v39  ;;  %v6627_v44 = vsel %vm3165_vm4, %v3167_v2, %v3163_v13  ;;  %v3291_v34 = vsub.f32 0.0, %v6542_v30  ;;  %3684 = vmatpush.bf16.msrb.mxu2 %v5093_v60  ;;  %v5066_v13 = vld [vmem:[#allocation5 + $0x100] sm:$0xff] }
 0xf30   : > { %v3285_v12 = vmul.f32 %v3277_v11, %v6554_v33  ;;  %3659 = vmatpush.bf16.msra.mxu0 %v5076_v57  ;;  %v5075_v33 = vld [vmem:[#allocation5 + $0x148] sm:$0xff]  ;;  %v3360_v0 = vadd.f32 1.0, %v3352_v63  ;;  %v3353_v21 = vsel %vm3337_vm2, %v3345_v37, %v3329_v58  ;;  %v3219_v40 = vmul.f32 1.0614054, %v6627_v44  ;;  %3673 = vmatpush.bf16.msra.mxu1 %v5083_v48 }
 0xf31   : > { %v3324_v45 = vmul.f32 %v5296_v55, %v3284_v17  ;;  %v5302_v35 = vpop.eup %5301  ;;  %vm3340_vm5 = vcmp.lt.f32.partialorder %v6471_v29, 0.0  ;;  %v3061_v16 = vmul.f32 0.5, %v6468_v3  ;;  %vm3341_vm6 = vcmp.lt.f32.partialorder %v6474_v10, 0.0  ;;  %3646 = vmatpush.bf16.msrb.mxu3 %v5068_v56  ;;  %v5074_v3 = vld [vmem:[#allocation5 + $0x140] sm:$0xff] }
 0xf32   : > { %v3325_v4 = vmul.f32 %v5300_v26, %v3285_v12  ;;  %v3279_v49 = vmul.f32 %v3271_v43, %v6514_v7  ;;  %v3227_v50 = vadd.f32 -1.4531521, %v3219_v40  ;;  %v3201_v42 = vmul.f32 %v5302_v35, %v6605_v19 }
 0xf33   : > { %v3332_v18 = vsub.f32 1.0, %v3324_v45  ;;  %v3361_v58 = vadd.f32 1.0, %v3353_v21  ;;  %v3299_v29 = vmul.f32 %v3291_v34, %v6542_v30  ;;  %3685 = vmatpush.bf16.msrb.mxu2 %v5092_v59  ;;  %v3368_v31 = vmul.f32 %v3360_v0, %v6572_v32  ;;  %v5067_v30 = vld [vmem:[#allocation5 + $0x108] sm:$0xff] }
 0xf34   : > { %v3333_v28 = vsub.f32 1.0, %v3325_v4  ;;  %3660 = vmatpush.bf16.msra.mxu0 %v5075_v33  ;;  %v3266_v55 = vmul.f32 %v3258_v14, %v6528_v51  ;;  %v3235_v7 = vmul.f32 %v3227_v50, %v6627_v44  ;;  %v3202_v39 = vsub.f32 1.0, %v3201_v42  ;;  %v5091_v45 = vld [vmem:[#allocation5 + $0x1c8] sm:$0xff]  ;;  %3674 = vmatpush.bf16.msra.mxu1 %v5082_v52  ;;  %v5090_v14 = vld [vmem:[#allocation5 + $0x1c0] sm:$0xff] }
 0xf35   : > { %v3348_v6 = vsub.f32 0.0, %v3332_v18  ;;  %v3209_v15 = vand.u32 2147483647, %v6605_v19  ;;  %v3211_v37 = vand.u32 2147483648, %v6605_v19  ;;  %vm3206_vm9 = vweird.f32 %v5302_v35  ;;  %3647 = vmatpush.bf16.msrb.mxu3 %v5067_v30 }
 0xf36   : > { %v3349_v17 = vsub.f32 0.0, %v3333_v28  ;;  %v3243_v26 = vadd.f32 1.4214138, %v3235_v7  ;;  %v3203_v63 = vmul.f32 %v5302_v35, %v3202_v39  ;;  %v3369_v32 = vmul.f32 %v3361_v58, %v6578_v20 }
 0xf37   : > { %v3356_v62 = vsel %vm3340_vm5, %v3348_v6, %v3332_v18  ;;  %v3319_v12 = vmul.f32 %v6616_v22, %v3279_v49  ;;  %v3311_v2 = vmul.f32 1.442695, %v3299_v29  ;;  %3686 = vmatpush.bf16.msrb.mxu2 %v5091_v45  ;;  %vm3205_vm10 = vweird.f32 %v6605_v19 }
 0xf38   : > { %v3364_v9 = vadd.f32 1.0, %v3356_v62  ;;  %v3357_v57 = vsel %vm3341_vm6, %v3349_v17, %v3333_v28  ;;  %3661 = vmatpush.bf16.msra.mxu0 %v5074_v3  ;;  %v3251_v1 = vmul.f32 %v3243_v26, %v6627_v44  ;;  %v3204_v60 = vadd.f32 %v5302_v35, %v3203_v63  ;;  %vm3207_vm11 = vmor %vm3205_vm10, %vm3206_vm9 }
 0xf39   : > { %v3365_v25 = vadd.f32 1.0, %v3357_v57  ;;  %v3309_v43 = vmul.f32 1.442695, %v6613_v27  ;;  %v3212_v18 = vor.u32 1.1754944e-38, %v3211_v37  ;;  %vm3210_vm12 = vcmp.eq.f32.partialorder %v3209_v15, 8.507059e+37  ;;  %3648 = vmatpush.bf16.msrb.mxu3 %v5066_v13 }
 0xf3a   : > { %v3372_v11 = vmul.f32 %v3364_v9, %v3060_v41  ;;  %v3259_v4 = vadd.f32 -0.28449672, %v3251_v1  ;;  %v3208_v22 = vsel %vm3207_vm11, %v5302_v35, %v3204_v60  ;;  %5303 = vpow2.f32 %v3311_v2  ;;  %v5192_v13 = vld [vmem:[%s6775_s13 + $0x1] ss:$0 sm:$0xff] }
 0xf3b   : > { %v3373_v10 = vmul.f32 %v3365_v25, %v3061_v16  ;;  %v3213_v34 = vsel %vm3210_vm12, %v3212_v18, %v3208_v22  ;;  %v3294_v33 = vsub.f32 0.0, %v6593_v24  ;;  %3687 = vmatpush.bf16.msrb.mxu2 %v5090_v14  ;;  %v3327_v48 = vsub.f32 1.0, %v3319_v12 }
 0xf3c   : > { %v3376_v41 = vpack.c.bf16 %v3372_v11, %v3368_v31  ;;  %v3274_v0 = vadd.f32 0.2548296, %v3266_v55  ;;  %v3267_v19 = vmul.f32 %v3259_v4, %v6627_v44  ;;  %v3222_v27 = vmul.f32 1.0614054, %v3213_v34 }
 0xf3d   : > { %v3377_v20 = vpack.c.bf16 %v3373_v10, %v3369_v32  ;;  %5305 = vpow2.f32 %v3309_v43  ;;  %v3302_v40 = vmul.f32 %v3294_v33, %v6593_v24  ;;  %v3343_v16 = vsub.f32 0.0, %v3327_v48 }
 0xf3e   : > { %3662 = vmatmul.bf16.vlgmr.msra.gmra.mxu0 %v3376_v41  ;;  %v3275_v21 = vadd.f32 0.2548296, %v3267_v19  ;;  %v3230_v6 = vadd.f32 -1.4531521, %v3222_v27  ;;  %v3282_v35 = vmul.f32 %v3274_v0, %v6528_v51  ;;  %vm3335_vm13 = vcmp.lt.f32.partialorder %v6447_v47, 0.0 }
 0xf3f   : > { %3675 = vmatmul.bf16.vlgmr.msra.gmra.mxu1 %v3377_v20  ;;  %v3317_v42 = vmul.f32 1.442695, %v3302_v40  ;;  %v3351_v58 = vsel %vm3335_vm13, %v3343_v16, %v3327_v48  ;;  %vm3339_vm14 = vcmp.lt.f32.partialorder %v6536_v54, 0.0  ;;  %v3055_v55 = vmul.f32 0.5, %v6439_v36  ;;  %v5105_v48 = vld [vmem:[%s6778_s16 + $0x38] sm:$0xff]  ;;  %v5102_v40 = vld [vmem:[%s6778_s16 + $0x20] sm:$0xff] }
 0xf40   : > { %v3283_v28 = vmul.f32 %v3275_v21, %v6627_v44  ;;  %v3238_v56 = vmul.f32 %v3230_v6, %v3213_v34  ;;  %v5304_v59 = vpop.eup %5303  ;;  %v3359_v24 = vadd.f32 1.0, %v3351_v58  ;;  %v3059_v7 = vmul.f32 0.5, %v6525_v5  ;;  %3792 = vmatpush.bf16.msra.mxu3 %v5105_v48  ;;  %v5104_v6 = vld [vmem:[%s6778_s16 + $0x30] sm:$0xff]  ;;  %v5101_v16 = vld [vmem:[%s6778_s16 + $0x18] sm:$0xff]  ;;  %v5111_v58 = vld [vmem:[%s6780_s18 + $0x28] sm:$0xff] }
 0xf41   : > { %5307 = vpow2.f32 %v3317_v42  ;;  %vm3338_vm15 = vcmp.lt.f32.partialorder %v6450_v38, 0.0  ;;  %vm3342_vm0 = vcmp.lt.f32.partialorder %v6583_v61, 0.0  ;;  %v3058_v5 = vmul.f32 0.5, %v6444_v53 }
 0xf42   : > { %v3323_v49 = vmul.f32 %v5304_v59, %v3283_v28  ;;  %v3246_v62 = vadd.f32 1.4214138, %v3238_v56  ;;  %v3367_v11 = vmul.f32 %v3359_v24, %v3055_v55  ;;  %v3062_v12 = vmul.f32 0.5, %v6567_v46  ;;  %v5099_v28 = vld [vmem:[%s6778_s16 + $0x8] sm:$0xff]  ;;  %v5113_v56 = vld [vmem:[%s6780_s18 + $0x38] sm:$0xff] }
 0xf43   : > { %v5306_v50 = vpop.eup %5305  ;;  %3872 = vmatpush.bf16.msrb.mxu0 %v5113_v56 }
 0xf44   : > { %v3322_v9 = vmul.f32 %v5306_v50, %v3282_v35  ;;  %v3331_v17 = vsub.f32 1.0, %v3323_v49  ;;  %v3254_v29 = vmul.f32 %v3246_v62, %v3213_v34  ;;  %3793 = vmatpush.bf16.msra.mxu3 %v5104_v6  ;;  %v5100_v35 = vld [vmem:[%s6778_s16 + $0x10] sm:$0xff]  ;;  %v5098_v62 = vld [vmem:[%s6778_s16] sm:$0xff] }
 0xf45   : > { %v5112_v50 = vld [vmem:[%s6780_s18 + $0x30] sm:$0xff] }
 0xf46   : > { %v3347_v3 = vsub.f32 0.0, %v3331_v17  ;;  %v3262_v52 = vadd.f32 -0.28449672, %v3254_v29  ;;  %v3330_v51 = vsub.f32 1.0, %v3322_v9  ;;  %v5109_v29 = vld [vmem:[%s6780_s18 + $0x18] sm:$0xff] }
 0xf47   : > { %v5308_v30 = vpop.eup %5307  ;;  %3873 = vmatpush.bf16.msrb.mxu0 %v5112_v50 }
 0xf48   : > { %v3355_v44 = vsel %vm3339_vm14, %v3347_v3, %v3331_v17  ;;  %v3270_v31 = vmul.f32 %v3262_v52, %v3213_v34  ;;  %v3346_v15 = vsub.f32 0.0, %v3330_v51 }
 0xf49   : > { %v3363_v39 = vadd.f32 1.0, %v3355_v44  ;;  %v5193_v44 = vld [vmem:[%s6776_s14 + $0x1] ss:$0 sm:$0xff] }
 0xf4a   : > { %v3278_v47 = vadd.f32 0.2548296, %v3270_v31  ;;  %v3354_v54 = vsel %vm3338_vm15, %v3346_v15, %v3330_v51  ;;  %v5107_v15 = vld [vmem:[%s6780_s18 + $0x8] sm:$0xff] }
 0xf4b   : > { %v3371_v57 = vmul.f32 %v3363_v39, %v3059_v7  ;;  %v3362_v32 = vadd.f32 1.0, %v3354_v54  ;;  %3874 = vmatpush.bf16.msrb.mxu0 %v5111_v58  ;;  %v5194_v7 = vld [vmem:[%s6777_s15 + $0x1] ss:$0 sm:$0xff] }
 0xf4c   : > { %v3286_v37 = vmul.f32 %v3278_v47, %v3213_v34 }
 0xf4d   : > { %v3375_v45 = vpack.c.bf16 %v3371_v57, %v3367_v11  ;;  %v3370_v2 = vmul.f32 %v3362_v32, %v3058_v5  ;;  %v5108_v57 = vld [vmem:[%s6780_s18 + $0x10] sm:$0xff]  ;;  %v3823_v32 = vld [vmem:[%s6781_s19] sm:$0x1] }
 0xf4e   : > { %v3326_v25 = vmul.f32 %v5308_v30, %v3286_v37  ;;  %v5106_v37 = vld [vmem:[%s6780_s18] sm:$0xff] }
 0xf4f   : > { %3649 = vmatmul.bf16.vlgmr.msrb.gmra.mxu3 %v3375_v45  ;;  %v3743_v30 = vld [vmem:[%s6779_s17] sm:$0x1] }
 0xf50   : > { %v3334_v26 = vsub.f32 1.0, %v3326_v25 }
 0xf52   : > { %v3350_v63 = vsub.f32 0.0, %v3334_v26 }
 0xf54   : > { %v3358_v36 = vsel %vm3342_vm0, %v3350_v63, %v3334_v26 }
 0xf55   : > { %v3366_v41 = vadd.f32 1.0, %v3358_v36 }
 0xf57   : > { %v3374_v10 = vmul.f32 %v3366_v41, %v3062_v12 }
 0xf59   : > { %v3378_v1 = vpack.c.bf16 %v3374_v10, %v3370_v2 }
 0xf5b   : > { %3688 = vmatmul.bf16.vlgmr.msrb.gmra.mxu2 %v3378_v1 }
 0xfbb   : > { %v3663_v60 = vpop.f32.mrf.mxu0 }
 0xfbc   : > { %v3676_v43 = vpop.f32.mrf.mxu1 }
 0xfc3   : > { %v3665_v38 = vpop.f32.mrf.mxu0 }
 0xfc4   : > { %v3678_v18 = vpop.f32.mrf.mxu1 }
 0xfd2   : > { %v3650_v14 = vpop.f32.mrf.mxu3 }
 0xfd3   : > { %v3651_v61 = vadd.f32 %v5192_v13, %v3650_v14 }
 0xfd5   : > { %v3664_v20 = vadd.f32 %v3663_v60, %v3651_v61 }
 0xfd7   : > { %v3677_v53 = vadd.f32 %v3676_v43, %v3664_v20 }
 0xfda   : > { %v3652_v4 = vpop.f32.mrf.mxu3 }
 0xfde   : > { %v3689_v22 = vpop.f32.mrf.mxu2 }
 0xfdf   : > { %v3690_v46 = vadd.f32 %v3689_v22, %v3677_v53 }
 0xfe1   : > { %v3693_v34 = vadd.f32 %v3690_v46, %v6408_v23  ;;  %v5103_v23 = vld [vmem:[%s6778_s16 + $0x28] sm:$0xff] }
 0xfe2   : > { %3794 = vmatpush.bf16.msra.mxu3 %v5103_v23 }
 0xfe3   : > { %3698 = vadd.xlane.f32.xlu1 %v3693_v34 }
 0xfe6   : > { %v3691_v33 = vpop.f32.mrf.mxu2  ;;  %3795 = vmatpush.bf16.msra.mxu3 %v5102_v40 }
 0xfea   : > { %3796 = vmatpush.bf16.msra.mxu3 %v5101_v16 }
 0xfee   : > { %3797 = vmatpush.bf16.msra.mxu3 %v5100_v35 }
 0xff2   : > { %3798 = vmatpush.bf16.msra.mxu3 %v5099_v28 }
 0xff6   : > { %3799 = vmatpush.bf16.msra.mxu3 %v5098_v62 }
0x1056   : > { %v3699_v0 = vpop.xlane.xlu1 %3698 }
0x1057   : > { %v3700_v19 = vmul.f32 %v3699_v0, %v5642_v8 }
0x1059   : > { %v3701_v27 = vsub.f32 %v3693_v34, %v3700_v19 }
0x105b   : > { %v3702_v21 = vmul.f32 %v3701_v27, %v3701_v27 }
0x105d   : > { %3703 = vadd.xlane.f32.xlu0 %v3702_v21 }
0x10d0   : > { %v3704_v59 = vpop.xlane.xlu0 %3703 }
0x10d1   : > { %v3705_v49 = vmul.f32 %v3704_v59, %v5642_v8  ;;  %v5110_v8 = vld [vmem:[%s6780_s18 + $0x20] sm:$0xff] }
0x10d2   : > { %3875 = vmatpush.bf16.msrb.mxu0 %v5110_v8 }
0x10d3   : > { %v3706_v42 = vadd.f32 1e-12, %v3705_v49 }
0x10d5   : > { %5309 = vrsqrt.f32 %v3706_v42  ;;  %vm3713_vm2 = vweird.f32 %v3706_v42 }
0x10d6   : > { %3876 = vmatpush.bf16.msrb.mxu0 %v5109_v29 }
0x10da   : > { %3877 = vmatpush.bf16.msrb.mxu0 %v5108_v57 }
0x10db   : > { %v5310_v9 = vpop.eup %5309 }
0x10dc   : > { %v3708_v17 = vmul.f32 %v5310_v9, %v3706_v42  ;;  %vm3714_vm1 = vweird.f32 %v5310_v9 }
0x10dd   : > { %vm3715_vm7 = vmor %vm3713_vm2, %vm3714_vm1 }
0x10de   : > { %v3709_v3 = vmul.f32 %v5310_v9, %v3708_v17  ;;  %3878 = vmatpush.bf16.msrb.mxu0 %v5107_v15 }
0x10e0   : > { %v3710_v52 = vmul.f32 0.5, %v3709_v3 }
0x10e2   : > { %v3711_v24 = vsub.f32 1.5, %v3710_v52  ;;  %3879 = vmatpush.bf16.msrb.mxu0 %v5106_v37 }
0x10e4   : > { %v3712_v51 = vmul.f32 %v5310_v9, %v3711_v24 }
0x10e6   : > { %v3716_v31 = vsel %vm3715_vm7, %v5310_v9, %v3712_v51 }
0x10e7   : > { %v3717_v55 = vmul.f32 %v3716_v31, %v3701_v27 }
0x10e9   : > { %v3721_v39 = vmul.f32 %v5193_v44, %v3717_v55 }
0x10eb   : > { %v3725_v47 = vadd.f32 %v5194_v7, %v3721_v39 }
0x10ed   : > { %v3726_v11 = vpack.c.bf16 %v3725_v47, %v3725_v47 }
0x10ef   : > { %3800 = vmatmul.bf16.vlgmr.msra.gmra.mxu3 %v3726_v11 }
0x1172   : > { %v3801_v45 = vpop.f32.mrf.mxu3 }
0x1173   : > { %v3802_v25 = vadd.f32 %v3801_v45, %v3743_v30 }
0x1175   : > { %5311 = vtanh.f32 %v3802_v25 }
0x117a   : > { %v3803_v54 = vpop.f32.mrf.mxu3 }
0x117b   : > { %v5312_v26 = vpop.eup %5311 }
0x117c   : > { %v3806_v63 = vpack.c.bf16 %v5312_v26, %v5312_v26 }
0x117e   : > { %3880 = vmatmul.bf16.vlgmr.msrb.gmra.mxu0 %v3806_v63 }
0x11fb   : > { %v3881_v36 = vpop.f32.mrf.mxu0 }
0x11fc   : > { %v3882_v5 = vadd.f32 %v3881_v36, %v3823_v32 }
0x11fe   : > { %3885 = vst [vmem:[%s666_s29] sm:$0x1] %v3882_v5 }
0x11ff   : > { %5401 = shalt.err (!%p5398_p8)
}
0x1200   : > { %5122 = dma.vmem_to_hbm [thread:$0]  (%p5597_p5), %s3898_s12, 16, %s3900_s24, %s3887_s30  }
0x1203   : > { %v3883_v12 = vpop.f32.mrf.mxu0 }
0x1204 PF: > { %s6816_s1 = sld [smem:[#allocation13_spill]] }
0x1205   : > { %s6817_s23 = sld [smem:[#allocation11_spill]] }
0x120a   : > { %p5139_p9 = scmp.ge.s32.totalorder %s6816_s1, 2 }
0x120b   : > { %s3911_s29 = sand.u32 1, %s6817_s23  }
0x120c   : > { %p5132_p10 = pnand %p5139_p9, %p5601_p6  ;;  %s3912_s2 = scalar_lea.sflag [#allocation4], %s3911_s29 }
0x120e   : > { %p5133_p11 = pneg %p5132_p10 }
0x1210   : > { %5427 = dma.done.wait (%p5133_p11), %s3912_s2, 16  }
0x1211   : > { %5429 = vsyncadd (%p5133_p11), %s3912_s2, 4294967280  ;;  %s6819_s24 = sld [smem:[#allocation14_spill]]  ;;  %s6822_s1 = smov %s5436_s22 }
0x1212   : > { %s6820_s25 = sld [smem:[#allocation12_spill]] }
0x1213   : > { %s6821_s23 = sld [smem:[#allocation15_spill]] }
0x1217   : > { %p32_p12 = scmp.ge.s32.totalorder %s6819_s24, 4  }
0x1218   : > { %s6823_s22 = smov %s6820_s25 }
0x1219   :  { %34 = sbr.rel (!%p32_p12) target bundleno = 13 (0xd), region = 161 }
0x121e   :  { %3917 = vsyncpa [#allocation3], 1 }
0x121f   :  { %3919 = vsyncpa [#allocation3 + $0x1], 1 }
0x1220   :  { %3920 = vsyncpa [#allocation6], 1 }
0x1221   :  { %3921 = vsyncpa [#allocation4], 1 }
0x1222   :  { %3923 = vsyncpa [#allocation4 + $0x1], 1 }

</bundles_post_ra>
